<compile_context>
chip_gen: v5e
topology: v5e:2x2
jax: 0.10.0
libtpu: 0.0.40
codegen_flags: <defaults>
</compile_context>

<pallas_src>
import functools

import jax
import jax.numpy as jnp
from jax.experimental import pallas as pl
from jax.experimental.pallas import tpu as pltpu


# ----------------------------------------------------------------------------
# Tile selection helpers
# ----------------------------------------------------------------------------

def _pick_tile(dim, candidates):
    """Largest candidate that evenly divides `dim`; else the full dim."""
    for c in candidates:
        if c <= dim and dim % c == 0:
            return c
    return dim


def _row_tile(m):
    # f32 activations: keep row tiles <= 256 so VMEM budgets also hold on v7x
    # (64 MiB physical / 32 MiB scoped, inputs double-buffered).
    return _pick_tile(m, (256, 128, 64, 32, 16, 8))


def _col_tile(n):
    return _pick_tile(n, (512, 256, 128))


# ----------------------------------------------------------------------------
# Kernel helpers
# ----------------------------------------------------------------------------

def _layernorm_f32(x, g, b, eps):
    mu = jnp.mean(x, axis=-1, keepdims=True)
    var = jnp.mean(jnp.square(x - mu), axis=-1, keepdims=True)
    return (x - mu) * jax.lax.rsqrt(var + eps) * g + b


# ----------------------------------------------------------------------------
# Kernels
# ----------------------------------------------------------------------------

def _attn_block_kernel(*refs, heads, scale, eps, add_pos):
    """Whole attention sub-block for one batch element:

        x' = x (+ pos)
        out = x' + out_proj( causal_MHA( ln_1(x') ) )

    refs layout: x, (pos), ln1_g, ln1_b, w_qkv, b_qkv, w_o, b_o, out
    """
    if add_pos:
        (x_ref, pos_ref, g_ref, b_ref, wqkv_ref, bqkv_ref,
         wo_ref, bo_ref, o_ref) = refs
    else:
        (x_ref, g_ref, b_ref, wqkv_ref, bqkv_ref,
         wo_ref, bo_ref, o_ref) = refs
        pos_ref = None

    x = x_ref[0].astype(jnp.float32)                              # (S, D)
    if add_pos:
        x = x + pos_ref[0].astype(jnp.float32)

    S, D = x.shape
    Dh = D // heads

    # ln_1 -> fused QKV projection (bf16 MXU operands, f32 accumulate).
    h = _layernorm_f32(x, g_ref[...], b_ref[...], eps)
    qkv = jnp.dot(h.astype(jnp.bfloat16),
                  wqkv_ref[...].astype(jnp.bfloat16),
                  preferred_element_type=jnp.float32) + bqkv_ref[...]   # (S, 3D)

    # Causal additive mask built in-kernel (no HBM input needed).
    row = jax.lax.broadcasted_iota(jnp.int32, (S, S), 0)
    col = jax.lax.broadcasted_iota(jnp.int32, (S, S), 1)
    neg = jnp.where(col > row, -1e9, 0.0).astype(jnp.float32)

    outs = []
    for hh in range(heads):
        q = qkv[:, hh * Dh:(hh + 1) * Dh]
        k = qkv[:, D + hh * Dh:D + (hh + 1) * Dh]
        v = qkv[:, 2 * D + hh * Dh:2 * D + (hh + 1) * Dh]

        s = jax.lax.dot_general(
            q.astype(jnp.bfloat16), k.astype(jnp.bfloat16),
            (((1,), (1,)), ((), ())),
            preferred_element_type=jnp.float32) * scale
        s = s + neg
        s = s - jnp.max(s, axis=-1, keepdims=True)
        p = jnp.exp(s)
        p = p * pl.reciprocal(jnp.sum(p, axis=-1, keepdims=True), approx=True)

        outs.append(jnp.dot(p.astype(jnp.bfloat16), v.astype(jnp.bfloat16),
                            preferred_element_type=jnp.float32))

    # Lane-dense (S, D) head concat, then out_proj + bias + residual epilogue.
    attn = jnp.concatenate(outs, axis=-1)                         # (S, D)
    out = jnp.dot(attn.astype(jnp.bfloat16),
                  wo_ref[...].astype(jnp.bfloat16),
                  preferred_element_type=jnp.float32) + bo_ref[...]
    o_ref[0] = (x + out).astype(o_ref.dtype)


def _mlp_block_kernel(x_ref, g_ref, b_ref, wfc_ref, bfc_ref,
                      wproj_ref, bproj_ref, o_ref, *, eps):
    """Whole MLP sub-block: out = x + c_proj(QuickGELU(c_fc(ln_2(x))))."""
    x = x_ref[...].astype(jnp.float32)                            # (tm, D)
    h = _layernorm_f32(x, g_ref[...], b_ref[...], eps)
    ff = jnp.dot(h.astype(jnp.bfloat16), wfc_ref[...].astype(jnp.bfloat16),
                 preferred_element_type=jnp.float32) + bfc_ref[...]
    ff = ff * jax.nn.sigmoid(1.702 * ff)                          # CLIP QuickGELU
    out = jnp.dot(ff.astype(jnp.bfloat16), wproj_ref[...].astype(jnp.bfloat16),
                  preferred_element_type=jnp.float32) + bproj_ref[...]
    o_ref[...] = (x + out).astype(o_ref.dtype)


def _ln_linear_kernel(x_ref, g_ref, b_ref, w_ref, bias_ref, o_ref, *, eps):
    """Fused LayerNorm(x) @ W + bias (used for ln_final + text_projection)."""
    x = x_ref[...].astype(jnp.float32)
    h = _layernorm_f32(x, g_ref[...], b_ref[...], eps)
    y = jnp.dot(h.astype(jnp.bfloat16), w_ref[...].astype(jnp.bfloat16),
                preferred_element_type=jnp.float32) + bias_ref[...]
    o_ref[...] = y.astype(o_ref.dtype)


# ----------------------------------------------------------------------------
# pallas_call wrappers
# ----------------------------------------------------------------------------

def pallas_attention_block(x, pos, blk, *, heads, eps=1e-5):
    """x: (B, S, D) residual stream; pos: (S, D) or None (fused add)."""
    B, S, D = x.shape
    scale = float(D // heads) ** -0.5
    add_pos = pos is not None

    in_specs = [pl.BlockSpec((1, S, D), lambda b: (b, 0, 0))]
    args = [x]
    if add_pos:
        in_specs.append(pl.BlockSpec((1, S, D), lambda b: (0, 0, 0)))
        args.append(pos.reshape(1, S, D))
    in_specs += [
        pl.BlockSpec((1, D), lambda b: (0, 0)),            # ln1_g
        pl.BlockSpec((1, D), lambda b: (0, 0)),            # ln1_b
        pl.BlockSpec((D, 3 * D), lambda b: (0, 0)),        # w_qkv
        pl.BlockSpec((1, 3 * D), lambda b: (0, 0)),        # b_qkv
        pl.BlockSpec((D, D), lambda b: (0, 0)),            # w_o
        pl.BlockSpec((1, D), lambda b: (0, 0)),            # b_o
    ]
    args += [blk["ln1_g"].reshape(1, D), blk["ln1_b"].reshape(1, D),
             blk["w_qkv"], blk["b_qkv"].reshape(1, 3 * D),
             blk["w_o"], blk["b_o"].reshape(1, D)]

    return pl.pallas_call(
        functools.partial(_attn_block_kernel, heads=heads, scale=scale,
                          eps=eps, add_pos=add_pos),
        out_shape=jax.ShapeDtypeStruct((B, S, D), x.dtype),
        grid=(B,),
        in_specs=in_specs,
        out_specs=pl.BlockSpec((1, S, D), lambda b: (b, 0, 0)),
        compiler_params=pltpu.CompilerParams(dimension_semantics=("parallel",)),
    )(*args)


def pallas_mlp_block(x, blk, *, eps=1e-5):
    """x: (M, D) flattened residual stream rows."""
    M, D = x.shape
    Dff = blk["w_fc"].shape[1]
    tm = _row_tile(M)
    return pl.pallas_call(
        functools.partial(_mlp_block_kernel, eps=eps),
        out_shape=jax.ShapeDtypeStruct((M, D), x.dtype),
        grid=(M // tm,),
        in_specs=[
            pl.BlockSpec((tm, D), lambda i: (i, 0)),
            pl.BlockSpec((1, D), lambda i: (0, 0)),        # ln2_g
            pl.BlockSpec((1, D), lambda i: (0, 0)),        # ln2_b
            pl.BlockSpec((D, Dff), lambda i: (0, 0)),      # w_fc
            pl.BlockSpec((1, Dff), lambda i: (0, 0)),      # b_fc
            pl.BlockSpec((Dff, D), lambda i: (0, 0)),      # w_proj
            pl.BlockSpec((1, D), lambda i: (0, 0)),        # b_proj
        ],
        out_specs=pl.BlockSpec((tm, D), lambda i: (i, 0)),
        compiler_params=pltpu.CompilerParams(dimension_semantics=("parallel",)),
    )(x, blk["ln2_g"].reshape(1, D), blk["ln2_b"].reshape(1, D),
      blk["w_fc"], blk["b_fc"].reshape(1, Dff),
      blk["w_proj"], blk["b_proj"].reshape(1, D))


def pallas_ln_linear(x, g, b, w, bias, *, eps=1e-5):
    """Fused ln_final + text_projection on the gathered EOT rows."""
    M, K = x.shape
    N = w.shape[1]
    tm, tn = _row_tile(M), _col_tile(N)
    return pl.pallas_call(
        functools.partial(_ln_linear_kernel, eps=eps),
        out_shape=jax.ShapeDtypeStruct((M, N), x.dtype),
        grid=(M // tm, N // tn),
        in_specs=[
            pl.BlockSpec((tm, K), lambda i, j: (i, 0)),
            pl.BlockSpec((1, K), lambda i, j: (0, 0)),
            pl.BlockSpec((1, K), lambda i, j: (0, 0)),
            pl.BlockSpec((K, tn), lambda i, j: (0, j)),
            pl.BlockSpec((1, tn), lambda i, j: (0, j)),
        ],
        out_specs=pl.BlockSpec((tm, tn), lambda i, j: (i, j)),
        compiler_params=pltpu.CompilerParams(
            dimension_semantics=("parallel", "parallel")),
    )(x, g.reshape(1, K), b.reshape(1, K), w, bias.reshape(1, N))


# ----------------------------------------------------------------------------
# Parameter construction (deterministic, synthetic). Weights bf16, LN/bias f32.
# ----------------------------------------------------------------------------

def init_params(key, *, seq, dim, heads, layers, embed_dim):
    keys = jax.random.split(key, 4 + 8 * layers)
    ki = iter(range(len(keys)))
    s = 0.02

    def nrm(shape, dtype=jnp.float32):
        return (s * jax.random.normal(keys[next(ki)], shape, jnp.float32)).astype(dtype)

    params = {
        "pos_emb": nrm((seq, dim)),
        "lnf_g": jnp.ones((dim,), jnp.float32),
        "lnf_b": jnp.zeros((dim,), jnp.float32),
        "text_projection": nrm((dim, embed_dim), jnp.bfloat16),
        "blocks": [],
    }
    for _ in range(layers):
        blk = {
            "ln1_g": jnp.ones((dim,), jnp.float32),
            "ln1_b": jnp.zeros((dim,), jnp.float32),
            "w_qkv": nrm((dim, 3 * dim), jnp.bfloat16),   # = in_proj_weight.T
            "b_qkv": nrm((3 * dim,)),
            "w_o": nrm((dim, dim), jnp.bfloat16),         # = out_proj.weight.T
            "b_o": nrm((dim,)),
            "ln2_g": jnp.ones((dim,), jnp.float32),
            "ln2_b": jnp.zeros((dim,), jnp.float32),
            "w_fc": nrm((dim, 4 * dim), jnp.bfloat16),    # mlp.c_fc.weight.T
            "b_fc": nrm((4 * dim,)),
            "w_proj": nrm((4 * dim, dim), jnp.bfloat16),  # mlp.c_proj.weight.T
            "b_proj": nrm((dim,)),
        }
        params["blocks"].append(blk)
    return params


# ----------------------------------------------------------------------------
# TextEncoder forward
# ----------------------------------------------------------------------------

def text_encoder_forward(params, prompts, tokenized_prompts, *, heads):
    B, S, D = prompts.shape

    # Positional-embedding add is fused into the first attention sub-block
    # (PyTorch permutes to (S,B,D) for nn.MultiheadAttention; math is
    #  batch-symmetric so the batch-first layout here is equivalent.)
    x = prompts
    if not params["blocks"]:
        x = x + params["pos_emb"][None, :, :]

    for li, blk in enumerate(params["blocks"]):
        pos = params["pos_emb"] if li == 0 else None
        # --- attention sub-block: x = x + out_proj(attn(ln_1(x))) ---
        x = pallas_attention_block(x, pos, blk, heads=heads)            # (B, S, D)
        # --- MLP sub-block: x = x + c_proj(QuickGELU(c_fc(ln_2(x)))) ---
        x = pallas_mlp_block(x.reshape(B * S, D), blk).reshape(B, S, D)

    # Gather EOT rows first (LN is row-wise, so LN-then-gather == gather-then-LN),
    # then fuse ln_final with the text_projection matmul.
    eot_idx = jnp.argmax(tokenized_prompts, axis=-1)                    # (B,)
    x_eot = x[jnp.arange(B), eot_idx]                                   # (B, D) glue gather

    E = params["text_projection"].shape[1]
    zero_bias = jnp.zeros((E,), jnp.float32)
    out = pallas_ln_linear(x_eot, params["lnf_g"], params["lnf_b"],
                           params["text_projection"], zero_bias)        # (B, E)
    return out


# ----------------------------------------------------------------------------
# Main
# ----------------------------------------------------------------------------

if __name__ == "__main__":
    # Lane-friendly small config: D and E multiples of 128, S multiple of 8.
    B, S, D, H, L, E = 2, 8, 128, 4, 2, 128

    root = jax.random.PRNGKey(0)
    k_params, k_prompts, k_tokens = jax.random.split(root, 3)

    params = init_params(k_params, seq=S, dim=D, heads=H, layers=L, embed_dim=E)

    prompts = jax.random.normal(k_prompts, (B, S, D), jnp.float32)
    tokenized_prompts = jax.random.randint(k_tokens, (B, S), 0, 1000, jnp.int32)

    fwd = jax.jit(functools.partial(text_encoder_forward, heads=H))
    out = fwd(params, prompts, tokenized_prompts)
    out = jax.block_until_ready(out)

    assert out.shape == (B, E), out.shape
    assert jnp.all(jnp.isfinite(out))
    print("KERNEL_OK")
</pallas_src>

<mosaic_0001>
module attributes {stable_mosaic.version = 11 : i64} {
  func.func @_attn_block_kernel(%arg0: i32, %arg1: memref<1x8x128xf32, #tpu.memory_space<vmem>>, %arg2: memref<1x8x128xf32, #tpu.memory_space<vmem>>, %arg3: memref<1x128xf32, #tpu.memory_space<vmem>>, %arg4: memref<1x128xf32, #tpu.memory_space<vmem>>, %arg5: memref<128x384xbf16, #tpu.memory_space<vmem>>, %arg6: memref<1x384xf32, #tpu.memory_space<vmem>>, %arg7: memref<128x128xbf16, #tpu.memory_space<vmem>>, %arg8: memref<1x128xf32, #tpu.memory_space<vmem>>, %arg9: memref<1x8x128xf32, #tpu.memory_space<vmem>>) attributes {dimension_semantics = [#tpu.dimension_semantics<parallel>], iteration_bounds = array<i64: 2>, scalar_prefetch = 0 : i64, scratch_operands = 0 : i64, tpu.core_type = #tpu.core_type<tc>, window_params = [{transform_indices = @transform_0, window_bounds = array<i64: 1, 8, 128>}, {pipeline_mode = #tpu.pipeline_mode<synchronous>, transform_indices = @transform_1, window_bounds = array<i64: 1, 8, 128>}, {pipeline_mode = #tpu.pipeline_mode<synchronous>, transform_indices = @transform_2, window_bounds = array<i64: 1, 128>}, {pipeline_mode = #tpu.pipeline_mode<synchronous>, transform_indices = @transform_3, window_bounds = array<i64: 1, 128>}, {pipeline_mode = #tpu.pipeline_mode<synchronous>, transform_indices = @transform_4, window_bounds = array<i64: 128, 384>}, {pipeline_mode = #tpu.pipeline_mode<synchronous>, transform_indices = @transform_5, window_bounds = array<i64: 1, 384>}, {pipeline_mode = #tpu.pipeline_mode<synchronous>, transform_indices = @transform_6, window_bounds = array<i64: 128, 128>}, {pipeline_mode = #tpu.pipeline_mode<synchronous>, transform_indices = @transform_7, window_bounds = array<i64: 1, 128>}, {transform_indices = @transform_8, window_bounds = array<i64: 1, 8, 128>}]} {
    %c0 = arith.constant 0 : index
    %c0_0 = arith.constant 0 : index
    %c0_1 = arith.constant 0 : index
    %0 = vector.load %arg1[%c0, %c0_0, %c0_1] : memref<1x8x128xf32, #tpu.memory_space<vmem>>, vector<1x8x128xf32>
    %1 = vector.shape_cast %0 : vector<1x8x128xf32> to vector<8x128xf32>
    %c0_2 = arith.constant 0 : index
    %c0_3 = arith.constant 0 : index
    %c0_4 = arith.constant 0 : index
    %2 = vector.load %arg2[%c0_2, %c0_3, %c0_4] : memref<1x8x128xf32, #tpu.memory_space<vmem>>, vector<1x8x128xf32>
    %3 = vector.shape_cast %2 : vector<1x8x128xf32> to vector<8x128xf32>
    %4 = arith.addf %1, %3 : vector<8x128xf32>
    %c0_5 = arith.constant 0 : index
    %c0_6 = arith.constant 0 : index
    %5 = vector.load %arg3[%c0_5, %c0_6] : memref<1x128xf32, #tpu.memory_space<vmem>>, vector<1x128xf32>
    %c0_7 = arith.constant 0 : index
    %c0_8 = arith.constant 0 : index
    %6 = vector.load %arg4[%c0_7, %c0_8] : memref<1x128xf32, #tpu.memory_space<vmem>>, vector<1x128xf32>
    %cst = arith.constant dense<0.000000e+00> : vector<8xf32>
    %7 = vector.multi_reduction <add>, %4, %cst [1] : vector<8x128xf32> to vector<8xf32>
    %8 = vector.shape_cast %7 : vector<8xf32> to vector<8x1xf32>
    %cst_9 = arith.constant 1.280000e+02 : f32
    %9 = vector.broadcast %cst_9 : f32 to vector<8x1xf32>
    %10 = arith.divf %8, %9 : vector<8x1xf32>
    %11 = vector.broadcast %10 : vector<8x1xf32> to vector<8x128xf32>
    %12 = arith.subf %4, %11 : vector<8x128xf32>
    %13 = arith.mulf %12, %12 : vector<8x128xf32>
    %cst_10 = arith.constant dense<0.000000e+00> : vector<8xf32>
    %14 = vector.multi_reduction <add>, %13, %cst_10 [1] : vector<8x128xf32> to vector<8xf32>
    %15 = vector.shape_cast %14 : vector<8xf32> to vector<8x1xf32>
    %cst_11 = arith.constant 1.280000e+02 : f32
    %16 = vector.broadcast %cst_11 : f32 to vector<8x1xf32>
    %17 = arith.divf %15, %16 : vector<8x1xf32>
    %18 = vector.broadcast %10 : vector<8x1xf32> to vector<8x128xf32>
    %19 = arith.subf %4, %18 : vector<8x128xf32>
    %cst_12 = arith.constant 9.99999974E-6 : f32
    %20 = vector.broadcast %cst_12 : f32 to vector<8x1xf32>
    %21 = arith.addf %17, %20 : vector<8x1xf32>
    %22 = math.rsqrt %21 : vector<8x1xf32>
    %23 = vector.broadcast %22 : vector<8x1xf32> to vector<8x128xf32>
    %24 = arith.mulf %19, %23 : vector<8x128xf32>
    %25 = vector.broadcast %5 : vector<1x128xf32> to vector<8x128xf32>
    %26 = arith.mulf %24, %25 : vector<8x128xf32>
    %27 = vector.broadcast %6 : vector<1x128xf32> to vector<8x128xf32>
    %28 = arith.addf %26, %27 : vector<8x128xf32>
    %29 = arith.truncf %28 : vector<8x128xf32> to vector<8x128xbf16>
    %c0_13 = arith.constant 0 : index
    %c0_14 = arith.constant 0 : index
    %30 = vector.load %arg5[%c0_13, %c0_14] : memref<128x384xbf16, #tpu.memory_space<vmem>>, vector<128x384xbf16>
    %cst_15 = arith.constant dense<0.000000e+00> : vector<8x384xf32>
    %31 = tpu.matmul %29, %30, %cst_15 {dimension_numbers = #tpu.dot_dimension_numbers<[1], [0], [0], [1], [0, 0, 1, 1], [], []>} : vector<8x128xbf16>, vector<128x384xbf16>, vector<8x384xf32> -> vector<8x384xf32>
    %c0_16 = arith.constant 0 : index
    %c0_17 = arith.constant 0 : index
    %32 = vector.load %arg6[%c0_16, %c0_17] : memref<1x384xf32, #tpu.memory_space<vmem>>, vector<1x384xf32>
    %33 = vector.broadcast %32 : vector<1x384xf32> to vector<8x384xf32>
    %34 = arith.addf %31, %33 : vector<8x384xf32>
    %35 = tpu.iota {dimensions = array<i32: 0>} : vector<8x8xi32>
    %36 = tpu.iota {dimensions = array<i32: 1>} : vector<8x8xi32>
    %37 = arith.cmpi sgt, %36, %35 : vector<8x8xi32>
    %cst_18 = arith.constant -1.000000e+09 : f32
    %cst_19 = arith.constant 0.000000e+00 : f32
    %38 = vector.broadcast %cst_18 : f32 to vector<8x8xf32>
    %39 = vector.broadcast %cst_19 : f32 to vector<8x8xf32>
    %40 = arith.select %37, %38, %39 : vector<8x8xi1>, vector<8x8xf32>
    %41 = vector.extract_strided_slice %34 {offsets = [0, 0], sizes = [8, 32], strides = [1, 1]} : vector<8x384xf32> to vector<8x32xf32>
    %42 = vector.extract_strided_slice %34 {offsets = [0, 128], sizes = [8, 32], strides = [1, 1]} : vector<8x384xf32> to vector<8x32xf32>
    %43 = vector.extract_strided_slice %34 {offsets = [0, 256], sizes = [8, 32], strides = [1, 1]} : vector<8x384xf32> to vector<8x32xf32>
    %44 = arith.truncf %41 : vector<8x32xf32> to vector<8x32xbf16>
    %45 = arith.truncf %42 : vector<8x32xf32> to vector<8x32xbf16>
    %cst_20 = arith.constant dense<0.000000e+00> : vector<8x8xf32>
    %46 = tpu.matmul %44, %45, %cst_20 {dimension_numbers = #tpu.dot_dimension_numbers<[1], [1], [0], [0], [0, 0, 1, 0], [], []>} : vector<8x32xbf16>, vector<8x32xbf16>, vector<8x8xf32> -> vector<8x8xf32>
    %cst_21 = arith.constant 0.176776692 : f32
    %47 = vector.broadcast %cst_21 : f32 to vector<8x8xf32>
    %48 = arith.mulf %46, %47 : vector<8x8xf32>
    %49 = arith.addf %48, %40 : vector<8x8xf32>
    %cst_22 = arith.constant dense<0xFF800000> : vector<8xf32>
    %50 = vector.multi_reduction <maximumf>, %49, %cst_22 [1] : vector<8x8xf32> to vector<8xf32>
    %51 = vector.shape_cast %50 : vector<8xf32> to vector<8x1xf32>
    %52 = vector.broadcast %51 : vector<8x1xf32> to vector<8x8xf32>
    %53 = arith.subf %49, %52 : vector<8x8xf32>
    %54 = math.exp %53 : vector<8x8xf32>
    %cst_23 = arith.constant dense<0.000000e+00> : vector<8xf32>
    %55 = vector.multi_reduction <add>, %54, %cst_23 [1] : vector<8x8xf32> to vector<8xf32>
    %56 = vector.shape_cast %55 : vector<8xf32> to vector<8x1xf32>
    %57 = tpu.reciprocal %56 {approx = true} : vector<8x1xf32> -> vector<8x1xf32>
    %58 = vector.broadcast %57 : vector<8x1xf32> to vector<8x8xf32>
    %59 = arith.mulf %54, %58 : vector<8x8xf32>
    %60 = arith.truncf %59 : vector<8x8xf32> to vector<8x8xbf16>
    %61 = arith.truncf %43 : vector<8x32xf32> to vector<8x32xbf16>
    %cst_24 = arith.constant dense<0.000000e+00> : vector<8x32xf32>
    %62 = tpu.matmul %60, %61, %cst_24 {dimension_numbers = #tpu.dot_dimension_numbers<[1], [0], [0], [1], [0, 0, 1, 1], [], []>} : vector<8x8xbf16>, vector<8x32xbf16>, vector<8x32xf32> -> vector<8x32xf32>
    %63 = vector.extract_strided_slice %34 {offsets = [0, 32], sizes = [8, 32], strides = [1, 1]} : vector<8x384xf32> to vector<8x32xf32>
    %64 = vector.extract_strided_slice %34 {offsets = [0, 160], sizes = [8, 32], strides = [1, 1]} : vector<8x384xf32> to vector<8x32xf32>
    %65 = vector.extract_strided_slice %34 {offsets = [0, 288], sizes = [8, 32], strides = [1, 1]} : vector<8x384xf32> to vector<8x32xf32>
    %66 = arith.truncf %63 : vector<8x32xf32> to vector<8x32xbf16>
    %67 = arith.truncf %64 : vector<8x32xf32> to vector<8x32xbf16>
    %cst_25 = arith.constant dense<0.000000e+00> : vector<8x8xf32>
    %68 = tpu.matmul %66, %67, %cst_25 {dimension_numbers = #tpu.dot_dimension_numbers<[1], [1], [0], [0], [0, 0, 1, 0], [], []>} : vector<8x32xbf16>, vector<8x32xbf16>, vector<8x8xf32> -> vector<8x8xf32>
    %cst_26 = arith.constant 0.176776692 : f32
    %69 = vector.broadcast %cst_26 : f32 to vector<8x8xf32>
    %70 = arith.mulf %68, %69 : vector<8x8xf32>
    %71 = arith.addf %70, %40 : vector<8x8xf32>
    %cst_27 = arith.constant dense<0xFF800000> : vector<8xf32>
    %72 = vector.multi_reduction <maximumf>, %71, %cst_27 [1] : vector<8x8xf32> to vector<8xf32>
    %73 = vector.shape_cast %72 : vector<8xf32> to vector<8x1xf32>
    %74 = vector.broadcast %73 : vector<8x1xf32> to vector<8x8xf32>
    %75 = arith.subf %71, %74 : vector<8x8xf32>
    %76 = math.exp %75 : vector<8x8xf32>
    %cst_28 = arith.constant dense<0.000000e+00> : vector<8xf32>
    %77 = vector.multi_reduction <add>, %76, %cst_28 [1] : vector<8x8xf32> to vector<8xf32>
    %78 = vector.shape_cast %77 : vector<8xf32> to vector<8x1xf32>
    %79 = tpu.reciprocal %78 {approx = true} : vector<8x1xf32> -> vector<8x1xf32>
    %80 = vector.broadcast %79 : vector<8x1xf32> to vector<8x8xf32>
    %81 = arith.mulf %76, %80 : vector<8x8xf32>
    %82 = arith.truncf %81 : vector<8x8xf32> to vector<8x8xbf16>
    %83 = arith.truncf %65 : vector<8x32xf32> to vector<8x32xbf16>
    %cst_29 = arith.constant dense<0.000000e+00> : vector<8x32xf32>
    %84 = tpu.matmul %82, %83, %cst_29 {dimension_numbers = #tpu.dot_dimension_numbers<[1], [0], [0], [1], [0, 0, 1, 1], [], []>} : vector<8x8xbf16>, vector<8x32xbf16>, vector<8x32xf32> -> vector<8x32xf32>
    %85 = vector.extract_strided_slice %34 {offsets = [0, 64], sizes = [8, 32], strides = [1, 1]} : vector<8x384xf32> to vector<8x32xf32>
    %86 = vector.extract_strided_slice %34 {offsets = [0, 192], sizes = [8, 32], strides = [1, 1]} : vector<8x384xf32> to vector<8x32xf32>
    %87 = vector.extract_strided_slice %34 {offsets = [0, 320], sizes = [8, 32], strides = [1, 1]} : vector<8x384xf32> to vector<8x32xf32>
    %88 = arith.truncf %85 : vector<8x32xf32> to vector<8x32xbf16>
    %89 = arith.truncf %86 : vector<8x32xf32> to vector<8x32xbf16>
    %cst_30 = arith.constant dense<0.000000e+00> : vector<8x8xf32>
    %90 = tpu.matmul %88, %89, %cst_30 {dimension_numbers = #tpu.dot_dimension_numbers<[1], [1], [0], [0], [0, 0, 1, 0], [], []>} : vector<8x32xbf16>, vector<8x32xbf16>, vector<8x8xf32> -> vector<8x8xf32>
    %cst_31 = arith.constant 0.176776692 : f32
    %91 = vector.broadcast %cst_31 : f32 to vector<8x8xf32>
    %92 = arith.mulf %90, %91 : vector<8x8xf32>
    %93 = arith.addf %92, %40 : vector<8x8xf32>
    %cst_32 = arith.constant dense<0xFF800000> : vector<8xf32>
    %94 = vector.multi_reduction <maximumf>, %93, %cst_32 [1] : vector<8x8xf32> to vector<8xf32>
    %95 = vector.shape_cast %94 : vector<8xf32> to vector<8x1xf32>
    %96 = vector.broadcast %95 : vector<8x1xf32> to vector<8x8xf32>
    %97 = arith.subf %93, %96 : vector<8x8xf32>
    %98 = math.exp %97 : vector<8x8xf32>
    %cst_33 = arith.constant dense<0.000000e+00> : vector<8xf32>
    %99 = vector.multi_reduction <add>, %98, %cst_33 [1] : vector<8x8xf32> to vector<8xf32>
    %100 = vector.shape_cast %99 : vector<8xf32> to vector<8x1xf32>
    %101 = tpu.reciprocal %100 {approx = true} : vector<8x1xf32> -> vector<8x1xf32>
    %102 = vector.broadcast %101 : vector<8x1xf32> to vector<8x8xf32>
    %103 = arith.mulf %98, %102 : vector<8x8xf32>
    %104 = arith.truncf %103 : vector<8x8xf32> to vector<8x8xbf16>
    %105 = arith.truncf %87 : vector<8x32xf32> to vector<8x32xbf16>
    %cst_34 = arith.constant dense<0.000000e+00> : vector<8x32xf32>
    %106 = tpu.matmul %104, %105, %cst_34 {dimension_numbers = #tpu.dot_dimension_numbers<[1], [0], [0], [1], [0, 0, 1, 1], [], []>} : vector<8x8xbf16>, vector<8x32xbf16>, vector<8x32xf32> -> vector<8x32xf32>
    %107 = vector.extract_strided_slice %34 {offsets = [0, 96], sizes = [8, 32], strides = [1, 1]} : vector<8x384xf32> to vector<8x32xf32>
    %108 = vector.extract_strided_slice %34 {offsets = [0, 224], sizes = [8, 32], strides = [1, 1]} : vector<8x384xf32> to vector<8x32xf32>
    %109 = vector.extract_strided_slice %34 {offsets = [0, 352], sizes = [8, 32], strides = [1, 1]} : vector<8x384xf32> to vector<8x32xf32>
    %110 = arith.truncf %107 : vector<8x32xf32> to vector<8x32xbf16>
    %111 = arith.truncf %108 : vector<8x32xf32> to vector<8x32xbf16>
    %cst_35 = arith.constant dense<0.000000e+00> : vector<8x8xf32>
    %112 = tpu.matmul %110, %111, %cst_35 {dimension_numbers = #tpu.dot_dimension_numbers<[1], [1], [0], [0], [0, 0, 1, 0], [], []>} : vector<8x32xbf16>, vector<8x32xbf16>, vector<8x8xf32> -> vector<8x8xf32>
    %cst_36 = arith.constant 0.176776692 : f32
    %113 = vector.broadcast %cst_36 : f32 to vector<8x8xf32>
    %114 = arith.mulf %112, %113 : vector<8x8xf32>
    %115 = arith.addf %114, %40 : vector<8x8xf32>
    %cst_37 = arith.constant dense<0xFF800000> : vector<8xf32>
    %116 = vector.multi_reduction <maximumf>, %115, %cst_37 [1] : vector<8x8xf32> to vector<8xf32>
    %117 = vector.shape_cast %116 : vector<8xf32> to vector<8x1xf32>
    %118 = vector.broadcast %117 : vector<8x1xf32> to vector<8x8xf32>
    %119 = arith.subf %115, %118 : vector<8x8xf32>
    %120 = math.exp %119 : vector<8x8xf32>
    %cst_38 = arith.constant dense<0.000000e+00> : vector<8xf32>
    %121 = vector.multi_reduction <add>, %120, %cst_38 [1] : vector<8x8xf32> to vector<8xf32>
    %122 = vector.shape_cast %121 : vector<8xf32> to vector<8x1xf32>
    %123 = tpu.reciprocal %122 {approx = true} : vector<8x1xf32> -> vector<8x1xf32>
    %124 = vector.broadcast %123 : vector<8x1xf32> to vector<8x8xf32>
    %125 = arith.mulf %120, %124 : vector<8x8xf32>
    %126 = arith.truncf %125 : vector<8x8xf32> to vector<8x8xbf16>
    %127 = arith.truncf %109 : vector<8x32xf32> to vector<8x32xbf16>
    %cst_39 = arith.constant dense<0.000000e+00> : vector<8x32xf32>
    %128 = tpu.matmul %126, %127, %cst_39 {dimension_numbers = #tpu.dot_dimension_numbers<[1], [0], [0], [1], [0, 0, 1, 1], [], []>} : vector<8x8xbf16>, vector<8x32xbf16>, vector<8x32xf32> -> vector<8x32xf32>
    %129 = tpu.concatenate %62, %84, %106, %128 in 1 : vector<8x32xf32>, vector<8x32xf32>, vector<8x32xf32>, vector<8x32xf32> -> vector<8x128xf32>
    %130 = arith.truncf %129 : vector<8x128xf32> to vector<8x128xbf16>
    %c0_40 = arith.constant 0 : index
    %c0_41 = arith.constant 0 : index
    %131 = vector.load %arg7[%c0_40, %c0_41] : memref<128x128xbf16, #tpu.memory_space<vmem>>, vector<128x128xbf16>
    %cst_42 = arith.constant dense<0.000000e+00> : vector<8x128xf32>
    %132 = tpu.matmul %130, %131, %cst_42 {dimension_numbers = #tpu.dot_dimension_numbers<[1], [0], [0], [1], [0, 0, 1, 1], [], []>} : vector<8x128xbf16>, vector<128x128xbf16>, vector<8x128xf32> -> vector<8x128xf32>
    %c0_43 = arith.constant 0 : index
    %c0_44 = arith.constant 0 : index
    %133 = vector.load %arg8[%c0_43, %c0_44] : memref<1x128xf32, #tpu.memory_space<vmem>>, vector<1x128xf32>
    %134 = vector.broadcast %133 : vector<1x128xf32> to vector<8x128xf32>
    %135 = arith.addf %132, %134 : vector<8x128xf32>
    %136 = arith.addf %4, %135 : vector<8x128xf32>
    %c0_45 = arith.constant 0 : index
    %c0_46 = arith.constant 0 : index
    %c0_47 = arith.constant 0 : index
    %137 = vector.load %arg9[%c0_45, %c0_46, %c0_47] : memref<1x8x128xf32, #tpu.memory_space<vmem>>, vector<1x8x128xf32>
    %138 = vector.shape_cast %137 : vector<1x8x128xf32> to vector<8x128xf32>
    %139 = vector.shape_cast %136 : vector<8x128xf32> to vector<1x8x128xf32>
    tpu.vector_store %arg9[%c0_45, %c0_46, %c0_47], %139 {strides = array<i32>} : memref<1x8x128xf32, #tpu.memory_space<vmem>>, vector<1x8x128xf32>,
    return
  }
  func.func @transform_0(%arg0: i32) -> (i32, i32, i32) {
    %c0_i32 = arith.constant 0 : i32
    %c0_i32_0 = arith.constant 0 : i32
    %c0_i32_1 = arith.constant 0 : i32
    return %arg0, %c0_i32, %c0_i32_0 : i32, i32, i32
  }
  func.func @transform_1(%arg0: i32) -> (i32, i32, i32) {
    %c0_i32 = arith.constant 0 : i32
    %c0_i32_0 = arith.constant 0 : i32
    %c0_i32_1 = arith.constant 0 : i32
    %c0_i32_2 = arith.constant 0 : i32
    return %c0_i32, %c0_i32_0, %c0_i32_1 : i32, i32, i32
  }
  func.func @transform_2(%arg0: i32) -> (i32, i32) {
    %c0_i32 = arith.constant 0 : i32
    %c0_i32_0 = arith.constant 0 : i32
    %c0_i32_1 = arith.constant 0 : i32
    return %c0_i32, %c0_i32_0 : i32, i32
  }
  func.func @transform_3(%arg0: i32) -> (i32, i32) {
    %c0_i32 = arith.constant 0 : i32
    %c0_i32_0 = arith.constant 0 : i32
    %c0_i32_1 = arith.constant 0 : i32
    return %c0_i32, %c0_i32_0 : i32, i32
  }
  func.func @transform_4(%arg0: i32) -> (i32, i32) {
    %c0_i32 = arith.constant 0 : i32
    %c0_i32_0 = arith.constant 0 : i32
    %c0_i32_1 = arith.constant 0 : i32
    return %c0_i32, %c0_i32_0 : i32, i32
  }
  func.func @transform_5(%arg0: i32) -> (i32, i32) {
    %c0_i32 = arith.constant 0 : i32
    %c0_i32_0 = arith.constant 0 : i32
    %c0_i32_1 = arith.constant 0 : i32
    return %c0_i32, %c0_i32_0 : i32, i32
  }
  func.func @transform_6(%arg0: i32) -> (i32, i32) {
    %c0_i32 = arith.constant 0 : i32
    %c0_i32_0 = arith.constant 0 : i32
    %c0_i32_1 = arith.constant 0 : i32
    return %c0_i32, %c0_i32_0 : i32, i32
  }
  func.func @transform_7(%arg0: i32) -> (i32, i32) {
    %c0_i32 = arith.constant 0 : i32
    %c0_i32_0 = arith.constant 0 : i32
    %c0_i32_1 = arith.constant 0 : i32
    return %c0_i32, %c0_i32_0 : i32, i32
  }
  func.func @transform_8(%arg0: i32) -> (i32, i32, i32) {
    %c0_i32 = arith.constant 0 : i32
    %c0_i32_0 = arith.constant 0 : i32
    %c0_i32_1 = arith.constant 0 : i32
    return %arg0, %c0_i32, %c0_i32_0 : i32, i32, i32
  }
}

module attributes {stable_mosaic.version = 11 : i64} {
  func.func @_mlp_block_kernel(%arg0: i32, %arg1: memref<16x128xf32, #tpu.memory_space<vmem>>, %arg2: memref<1x128xf32, #tpu.memory_space<vmem>>, %arg3: memref<1x128xf32, #tpu.memory_space<vmem>>, %arg4: memref<128x512xbf16, #tpu.memory_space<vmem>>, %arg5: memref<1x512xf32, #tpu.memory_space<vmem>>, %arg6: memref<512x128xbf16, #tpu.memory_space<vmem>>, %arg7: memref<1x128xf32, #tpu.memory_space<vmem>>, %arg8: memref<16x128xf32, #tpu.memory_space<vmem>>) attributes {dimension_semantics = [#tpu.dimension_semantics<parallel>], iteration_bounds = array<i64: 1>, scalar_prefetch = 0 : i64, scratch_operands = 0 : i64, tpu.core_type = #tpu.core_type<tc>, window_params = [{transform_indices = @transform_0, window_bounds = array<i64: 16, 128>}, {pipeline_mode = #tpu.pipeline_mode<synchronous>, transform_indices = @transform_1, window_bounds = array<i64: 1, 128>}, {pipeline_mode = #tpu.pipeline_mode<synchronous>, transform_indices = @transform_2, window_bounds = array<i64: 1, 128>}, {pipeline_mode = #tpu.pipeline_mode<synchronous>, transform_indices = @transform_3, window_bounds = array<i64: 128, 512>}, {pipeline_mode = #tpu.pipeline_mode<synchronous>, transform_indices = @transform_4, window_bounds = array<i64: 1, 512>}, {pipeline_mode = #tpu.pipeline_mode<synchronous>, transform_indices = @transform_5, window_bounds = array<i64: 512, 128>}, {pipeline_mode = #tpu.pipeline_mode<synchronous>, transform_indices = @transform_6, window_bounds = array<i64: 1, 128>}, {transform_indices = @transform_7, window_bounds = array<i64: 16, 128>}]} {
    %c0 = arith.constant 0 : index
    %c0_0 = arith.constant 0 : index
    %0 = vector.load %arg1[%c0, %c0_0] : memref<16x128xf32, #tpu.memory_space<vmem>>, vector<16x128xf32>
    %c0_1 = arith.constant 0 : index
    %c0_2 = arith.constant 0 : index
    %1 = vector.load %arg2[%c0_1, %c0_2] : memref<1x128xf32, #tpu.memory_space<vmem>>, vector<1x128xf32>
    %c0_3 = arith.constant 0 : index
    %c0_4 = arith.constant 0 : index
    %2 = vector.load %arg3[%c0_3, %c0_4] : memref<1x128xf32, #tpu.memory_space<vmem>>, vector<1x128xf32>
    %cst = arith.constant dense<0.000000e+00> : vector<16xf32>
    %3 = vector.multi_reduction <add>, %0, %cst [1] : vector<16x128xf32> to vector<16xf32>
    %4 = vector.shape_cast %3 : vector<16xf32> to vector<16x1xf32>
    %cst_5 = arith.constant 1.280000e+02 : f32
    %5 = vector.broadcast %cst_5 : f32 to vector<16x1xf32>
    %6 = arith.divf %4, %5 : vector<16x1xf32>
    %7 = vector.broadcast %6 : vector<16x1xf32> to vector<16x128xf32>
    %8 = arith.subf %0, %7 : vector<16x128xf32>
    %9 = arith.mulf %8, %8 : vector<16x128xf32>
    %cst_6 = arith.constant dense<0.000000e+00> : vector<16xf32>
    %10 = vector.multi_reduction <add>, %9, %cst_6 [1] : vector<16x128xf32> to vector<16xf32>
    %11 = vector.shape_cast %10 : vector<16xf32> to vector<16x1xf32>
    %cst_7 = arith.constant 1.280000e+02 : f32
    %12 = vector.broadcast %cst_7 : f32 to vector<16x1xf32>
    %13 = arith.divf %11, %12 : vector<16x1xf32>
    %14 = vector.broadcast %6 : vector<16x1xf32> to vector<16x128xf32>
    %15 = arith.subf %0, %14 : vector<16x128xf32>
    %cst_8 = arith.constant 9.99999974E-6 : f32
    %16 = vector.broadcast %cst_8 : f32 to vector<16x1xf32>
    %17 = arith.addf %13, %16 : vector<16x1xf32>
    %18 = math.rsqrt %17 : vector<16x1xf32>
    %19 = vector.broadcast %18 : vector<16x1xf32> to vector<16x128xf32>
    %20 = arith.mulf %15, %19 : vector<16x128xf32>
    %21 = vector.broadcast %1 : vector<1x128xf32> to vector<16x128xf32>
    %22 = arith.mulf %20, %21 : vector<16x128xf32>
    %23 = vector.broadcast %2 : vector<1x128xf32> to vector<16x128xf32>
    %24 = arith.addf %22, %23 : vector<16x128xf32>
    %25 = arith.truncf %24 : vector<16x128xf32> to vector<16x128xbf16>
    %c0_9 = arith.constant 0 : index
    %c0_10 = arith.constant 0 : index
    %26 = vector.load %arg4[%c0_9, %c0_10] : memref<128x512xbf16, #tpu.memory_space<vmem>>, vector<128x512xbf16>
    %cst_11 = arith.constant dense<0.000000e+00> : vector<16x512xf32>
    %27 = tpu.matmul %25, %26, %cst_11 {dimension_numbers = #tpu.dot_dimension_numbers<[1], [0], [0], [1], [0, 0, 1, 1], [], []>} : vector<16x128xbf16>, vector<128x512xbf16>, vector<16x512xf32> -> vector<16x512xf32>
    %c0_12 = arith.constant 0 : index
    %c0_13 = arith.constant 0 : index
    %28 = vector.load %arg5[%c0_12, %c0_13] : memref<1x512xf32, #tpu.memory_space<vmem>>, vector<1x512xf32>
    %29 = vector.broadcast %28 : vector<1x512xf32> to vector<16x512xf32>
    %30 = arith.addf %27, %29 : vector<16x512xf32>
    %cst_14 = arith.constant 1.702000e+00 : f32
    %31 = vector.broadcast %cst_14 : f32 to vector<16x512xf32>
    %32 = arith.mulf %31, %30 : vector<16x512xf32>
    %33 = arith.negf %32 : vector<16x512xf32>
    %34 = math.exp %33 : vector<16x512xf32>
    %cst_15 = arith.constant 1.000000e+00 : f32
    %35 = vector.broadcast %cst_15 : f32 to vector<16x512xf32>
    %36 = arith.addf %35, %34 : vector<16x512xf32>
    %37 = arith.divf %35, %36 : vector<16x512xf32>
    %38 = arith.mulf %30, %37 : vector<16x512xf32>
    %39 = arith.truncf %38 : vector<16x512xf32> to vector<16x512xbf16>
    %c0_16 = arith.constant 0 : index
    %c0_17 = arith.constant 0 : index
    %40 = vector.load %arg6[%c0_16, %c0_17] : memref<512x128xbf16, #tpu.memory_space<vmem>>, vector<512x128xbf16>
    %cst_18 = arith.constant dense<0.000000e+00> : vector<16x128xf32>
    %41 = tpu.matmul %39, %40, %cst_18 {dimension_numbers = #tpu.dot_dimension_numbers<[1], [0], [0], [1], [0, 0, 1, 1], [], []>} : vector<16x512xbf16>, vector<512x128xbf16>, vector<16x128xf32> -> vector<16x128xf32>
    %c0_19 = arith.constant 0 : index
    %c0_20 = arith.constant 0 : index
    %42 = vector.load %arg7[%c0_19, %c0_20] : memref<1x128xf32, #tpu.memory_space<vmem>>, vector<1x128xf32>
    %43 = vector.broadcast %42 : vector<1x128xf32> to vector<16x128xf32>
    %44 = arith.addf %41, %43 : vector<16x128xf32>
    %45 = arith.addf %0, %44 : vector<16x128xf32>
    %c0_21 = arith.constant 0 : index
    %c0_22 = arith.constant 0 : index
    %46 = vector.load %arg8[%c0_21, %c0_22] : memref<16x128xf32, #tpu.memory_space<vmem>>, vector<16x128xf32>
    tpu.vector_store %arg8[%c0_21, %c0_22], %45 {strides = array<i32>} : memref<16x128xf32, #tpu.memory_space<vmem>>, vector<16x128xf32>,
    return
  }
  func.func @transform_0(%arg0: i32) -> (i32, i32) {
    %c0_i32 = arith.constant 0 : i32
    %c0_i32_0 = arith.constant 0 : i32
    return %arg0, %c0_i32 : i32, i32
  }
  func.func @transform_1(%arg0: i32) -> (i32, i32) {
    %c0_i32 = arith.constant 0 : i32
    %c0_i32_0 = arith.constant 0 : i32
    %c0_i32_1 = arith.constant 0 : i32
    return %c0_i32, %c0_i32_0 : i32, i32
  }
  func.func @transform_2(%arg0: i32) -> (i32, i32) {
    %c0_i32 = arith.constant 0 : i32
    %c0_i32_0 = arith.constant 0 : i32
    %c0_i32_1 = arith.constant 0 : i32
    return %c0_i32, %c0_i32_0 : i32, i32
  }
  func.func @transform_3(%arg0: i32) -> (i32, i32) {
    %c0_i32 = arith.constant 0 : i32
    %c0_i32_0 = arith.constant 0 : i32
    %c0_i32_1 = arith.constant 0 : i32
    return %c0_i32, %c0_i32_0 : i32, i32
  }
  func.func @transform_4(%arg0: i32) -> (i32, i32) {
    %c0_i32 = arith.constant 0 : i32
    %c0_i32_0 = arith.constant 0 : i32
    %c0_i32_1 = arith.constant 0 : i32
    return %c0_i32, %c0_i32_0 : i32, i32
  }
  func.func @transform_5(%arg0: i32) -> (i32, i32) {
    %c0_i32 = arith.constant 0 : i32
    %c0_i32_0 = arith.constant 0 : i32
    %c0_i32_1 = arith.constant 0 : i32
    return %c0_i32, %c0_i32_0 : i32, i32
  }
  func.func @transform_6(%arg0: i32) -> (i32, i32) {
    %c0_i32 = arith.constant 0 : i32
    %c0_i32_0 = arith.constant 0 : i32
    %c0_i32_1 = arith.constant 0 : i32
    return %c0_i32, %c0_i32_0 : i32, i32
  }
  func.func @transform_7(%arg0: i32) -> (i32, i32) {
    %c0_i32 = arith.constant 0 : i32
    %c0_i32_0 = arith.constant 0 : i32
    return %arg0, %c0_i32 : i32, i32
  }
}

module attributes {stable_mosaic.version = 11 : i64} {
  func.func @_attn_block_kernel(%arg0: i32, %arg1: memref<1x8x128xf32, #tpu.memory_space<vmem>>, %arg2: memref<1x128xf32, #tpu.memory_space<vmem>>, %arg3: memref<1x128xf32, #tpu.memory_space<vmem>>, %arg4: memref<128x384xbf16, #tpu.memory_space<vmem>>, %arg5: memref<1x384xf32, #tpu.memory_space<vmem>>, %arg6: memref<128x128xbf16, #tpu.memory_space<vmem>>, %arg7: memref<1x128xf32, #tpu.memory_space<vmem>>, %arg8: memref<1x8x128xf32, #tpu.memory_space<vmem>>) attributes {dimension_semantics = [#tpu.dimension_semantics<parallel>], iteration_bounds = array<i64: 2>, scalar_prefetch = 0 : i64, scratch_operands = 0 : i64, tpu.core_type = #tpu.core_type<tc>, window_params = [{transform_indices = @transform_0, window_bounds = array<i64: 1, 8, 128>}, {pipeline_mode = #tpu.pipeline_mode<synchronous>, transform_indices = @transform_1, window_bounds = array<i64: 1, 128>}, {pipeline_mode = #tpu.pipeline_mode<synchronous>, transform_indices = @transform_2, window_bounds = array<i64: 1, 128>}, {pipeline_mode = #tpu.pipeline_mode<synchronous>, transform_indices = @transform_3, window_bounds = array<i64: 128, 384>}, {pipeline_mode = #tpu.pipeline_mode<synchronous>, transform_indices = @transform_4, window_bounds = array<i64: 1, 384>}, {pipeline_mode = #tpu.pipeline_mode<synchronous>, transform_indices = @transform_5, window_bounds = array<i64: 128, 128>}, {pipeline_mode = #tpu.pipeline_mode<synchronous>, transform_indices = @transform_6, window_bounds = array<i64: 1, 128>}, {transform_indices = @transform_7, window_bounds = array<i64: 1, 8, 128>}]} {
    %c0 = arith.constant 0 : index
    %c0_0 = arith.constant 0 : index
    %c0_1 = arith.constant 0 : index
    %0 = vector.load %arg1[%c0, %c0_0, %c0_1] : memref<1x8x128xf32, #tpu.memory_space<vmem>>, vector<1x8x128xf32>
    %1 = vector.shape_cast %0 : vector<1x8x128xf32> to vector<8x128xf32>
    %c0_2 = arith.constant 0 : index
    %c0_3 = arith.constant 0 : index
    %2 = vector.load %arg2[%c0_2, %c0_3] : memref<1x128xf32, #tpu.memory_space<vmem>>, vector<1x128xf32>
    %c0_4 = arith.constant 0 : index
    %c0_5 = arith.constant 0 : index
    %3 = vector.load %arg3[%c0_4, %c0_5] : memref<1x128xf32, #tpu.memory_space<vmem>>, vector<1x128xf32>
    %cst = arith.constant dense<0.000000e+00> : vector<8xf32>
    %4 = vector.multi_reduction <add>, %1, %cst [1] : vector<8x128xf32> to vector<8xf32>
    %5 = vector.shape_cast %4 : vector<8xf32> to vector<8x1xf32>
    %cst_6 = arith.constant 1.280000e+02 : f32
    %6 = vector.broadcast %cst_6 : f32 to vector<8x1xf32>
    %7 = arith.divf %5, %6 : vector<8x1xf32>
    %8 = vector.broadcast %7 : vector<8x1xf32> to vector<8x128xf32>
    %9 = arith.subf %1, %8 : vector<8x128xf32>
    %10 = arith.mulf %9, %9 : vector<8x128xf32>
    %cst_7 = arith.constant dense<0.000000e+00> : vector<8xf32>
    %11 = vector.multi_reduction <add>, %10, %cst_7 [1] : vector<8x128xf32> to vector<8xf32>
    %12 = vector.shape_cast %11 : vector<8xf32> to vector<8x1xf32>
    %cst_8 = arith.constant 1.280000e+02 : f32
    %13 = vector.broadcast %cst_8 : f32 to vector<8x1xf32>
    %14 = arith.divf %12, %13 : vector<8x1xf32>
    %15 = vector.broadcast %7 : vector<8x1xf32> to vector<8x128xf32>
    %16 = arith.subf %1, %15 : vector<8x128xf32>
    %cst_9 = arith.constant 9.99999974E-6 : f32
    %17 = vector.broadcast %cst_9 : f32 to vector<8x1xf32>
    %18 = arith.addf %14, %17 : vector<8x1xf32>
    %19 = math.rsqrt %18 : vector<8x1xf32>
    %20 = vector.broadcast %19 : vector<8x1xf32> to vector<8x128xf32>
    %21 = arith.mulf %16, %20 : vector<8x128xf32>
    %22 = vector.broadcast %2 : vector<1x128xf32> to vector<8x128xf32>
    %23 = arith.mulf %21, %22 : vector<8x128xf32>
    %24 = vector.broadcast %3 : vector<1x128xf32> to vector<8x128xf32>
    %25 = arith.addf %23, %24 : vector<8x128xf32>
    %26 = arith.truncf %25 : vector<8x128xf32> to vector<8x128xbf16>
    %c0_10 = arith.constant 0 : index
    %c0_11 = arith.constant 0 : index
    %27 = vector.load %arg4[%c0_10, %c0_11] : memref<128x384xbf16, #tpu.memory_space<vmem>>, vector<128x384xbf16>
    %cst_12 = arith.constant dense<0.000000e+00> : vector<8x384xf32>
    %28 = tpu.matmul %26, %27, %cst_12 {dimension_numbers = #tpu.dot_dimension_numbers<[1], [0], [0], [1], [0, 0, 1, 1], [], []>} : vector<8x128xbf16>, vector<128x384xbf16>, vector<8x384xf32> -> vector<8x384xf32>
    %c0_13 = arith.constant 0 : index
    %c0_14 = arith.constant 0 : index
    %29 = vector.load %arg5[%c0_13, %c0_14] : memref<1x384xf32, #tpu.memory_space<vmem>>, vector<1x384xf32>
    %30 = vector.broadcast %29 : vector<1x384xf32> to vector<8x384xf32>
    %31 = arith.addf %28, %30 : vector<8x384xf32>
    %32 = tpu.iota {dimensions = array<i32: 0>} : vector<8x8xi32>
    %33 = tpu.iota {dimensions = array<i32: 1>} : vector<8x8xi32>
    %34 = arith.cmpi sgt, %33, %32 : vector<8x8xi32>
    %cst_15 = arith.constant -1.000000e+09 : f32
    %cst_16 = arith.constant 0.000000e+00 : f32
    %35 = vector.broadcast %cst_15 : f32 to vector<8x8xf32>
    %36 = vector.broadcast %cst_16 : f32 to vector<8x8xf32>
    %37 = arith.select %34, %35, %36 : vector<8x8xi1>, vector<8x8xf32>
    %38 = vector.extract_strided_slice %31 {offsets = [0, 0], sizes = [8, 32], strides = [1, 1]} : vector<8x384xf32> to vector<8x32xf32>
    %39 = vector.extract_strided_slice %31 {offsets = [0, 128], sizes = [8, 32], strides = [1, 1]} : vector<8x384xf32> to vector<8x32xf32>
    %40 = vector.extract_strided_slice %31 {offsets = [0, 256], sizes = [8, 32], strides = [1, 1]} : vector<8x384xf32> to vector<8x32xf32>
    %41 = arith.truncf %38 : vector<8x32xf32> to vector<8x32xbf16>
    %42 = arith.truncf %39 : vector<8x32xf32> to vector<8x32xbf16>
    %cst_17 = arith.constant dense<0.000000e+00> : vector<8x8xf32>
    %43 = tpu.matmul %41, %42, %cst_17 {dimension_numbers = #tpu.dot_dimension_numbers<[1], [1], [0], [0], [0, 0, 1, 0], [], []>} : vector<8x32xbf16>, vector<8x32xbf16>, vector<8x8xf32> -> vector<8x8xf32>
    %cst_18 = arith.constant 0.176776692 : f32
    %44 = vector.broadcast %cst_18 : f32 to vector<8x8xf32>
    %45 = arith.mulf %43, %44 : vector<8x8xf32>
    %46 = arith.addf %45, %37 : vector<8x8xf32>
    %cst_19 = arith.constant dense<0xFF800000> : vector<8xf32>
    %47 = vector.multi_reduction <maximumf>, %46, %cst_19 [1] : vector<8x8xf32> to vector<8xf32>
    %48 = vector.shape_cast %47 : vector<8xf32> to vector<8x1xf32>
    %49 = vector.broadcast %48 : vector<8x1xf32> to vector<8x8xf32>
    %50 = arith.subf %46, %49 : vector<8x8xf32>
    %51 = math.exp %50 : vector<8x8xf32>
    %cst_20 = arith.constant dense<0.000000e+00> : vector<8xf32>
    %52 = vector.multi_reduction <add>, %51, %cst_20 [1] : vector<8x8xf32> to vector<8xf32>
    %53 = vector.shape_cast %52 : vector<8xf32> to vector<8x1xf32>
    %54 = tpu.reciprocal %53 {approx = true} : vector<8x1xf32> -> vector<8x1xf32>
    %55 = vector.broadcast %54 : vector<8x1xf32> to vector<8x8xf32>
    %56 = arith.mulf %51, %55 : vector<8x8xf32>
    %57 = arith.truncf %56 : vector<8x8xf32> to vector<8x8xbf16>
    %58 = arith.truncf %40 : vector<8x32xf32> to vector<8x32xbf16>
    %cst_21 = arith.constant dense<0.000000e+00> : vector<8x32xf32>
    %59 = tpu.matmul %57, %58, %cst_21 {dimension_numbers = #tpu.dot_dimension_numbers<[1], [0], [0], [1], [0, 0, 1, 1], [], []>} : vector<8x8xbf16>, vector<8x32xbf16>, vector<8x32xf32> -> vector<8x32xf32>
    %60 = vector.extract_strided_slice %31 {offsets = [0, 32], sizes = [8, 32], strides = [1, 1]} : vector<8x384xf32> to vector<8x32xf32>
    %61 = vector.extract_strided_slice %31 {offsets = [0, 160], sizes = [8, 32], strides = [1, 1]} : vector<8x384xf32> to vector<8x32xf32>
    %62 = vector.extract_strided_slice %31 {offsets = [0, 288], sizes = [8, 32], strides = [1, 1]} : vector<8x384xf32> to vector<8x32xf32>
    %63 = arith.truncf %60 : vector<8x32xf32> to vector<8x32xbf16>
    %64 = arith.truncf %61 : vector<8x32xf32> to vector<8x32xbf16>
    %cst_22 = arith.constant dense<0.000000e+00> : vector<8x8xf32>
    %65 = tpu.matmul %63, %64, %cst_22 {dimension_numbers = #tpu.dot_dimension_numbers<[1], [1], [0], [0], [0, 0, 1, 0], [], []>} : vector<8x32xbf16>, vector<8x32xbf16>, vector<8x8xf32> -> vector<8x8xf32>
    %cst_23 = arith.constant 0.176776692 : f32
    %66 = vector.broadcast %cst_23 : f32 to vector<8x8xf32>
    %67 = arith.mulf %65, %66 : vector<8x8xf32>
    %68 = arith.addf %67, %37 : vector<8x8xf32>
    %cst_24 = arith.constant dense<0xFF800000> : vector<8xf32>
    %69 = vector.multi_reduction <maximumf>, %68, %cst_24 [1] : vector<8x8xf32> to vector<8xf32>
    %70 = vector.shape_cast %69 : vector<8xf32> to vector<8x1xf32>
    %71 = vector.broadcast %70 : vector<8x1xf32> to vector<8x8xf32>
    %72 = arith.subf %68, %71 : vector<8x8xf32>
    %73 = math.exp %72 : vector<8x8xf32>
    %cst_25 = arith.constant dense<0.000000e+00> : vector<8xf32>
    %74 = vector.multi_reduction <add>, %73, %cst_25 [1] : vector<8x8xf32> to vector<8xf32>
    %75 = vector.shape_cast %74 : vector<8xf32> to vector<8x1xf32>
    %76 = tpu.reciprocal %75 {approx = true} : vector<8x1xf32> -> vector<8x1xf32>
    %77 = vector.broadcast %76 : vector<8x1xf32> to vector<8x8xf32>
    %78 = arith.mulf %73, %77 : vector<8x8xf32>
    %79 = arith.truncf %78 : vector<8x8xf32> to vector<8x8xbf16>
    %80 = arith.truncf %62 : vector<8x32xf32> to vector<8x32xbf16>
    %cst_26 = arith.constant dense<0.000000e+00> : vector<8x32xf32>
    %81 = tpu.matmul %79, %80, %cst_26 {dimension_numbers = #tpu.dot_dimension_numbers<[1], [0], [0], [1], [0, 0, 1, 1], [], []>} : vector<8x8xbf16>, vector<8x32xbf16>, vector<8x32xf32> -> vector<8x32xf32>
    %82 = vector.extract_strided_slice %31 {offsets = [0, 64], sizes = [8, 32], strides = [1, 1]} : vector<8x384xf32> to vector<8x32xf32>
    %83 = vector.extract_strided_slice %31 {offsets = [0, 192], sizes = [8, 32], strides = [1, 1]} : vector<8x384xf32> to vector<8x32xf32>
    %84 = vector.extract_strided_slice %31 {offsets = [0, 320], sizes = [8, 32], strides = [1, 1]} : vector<8x384xf32> to vector<8x32xf32>
    %85 = arith.truncf %82 : vector<8x32xf32> to vector<8x32xbf16>
    %86 = arith.truncf %83 : vector<8x32xf32> to vector<8x32xbf16>
    %cst_27 = arith.constant dense<0.000000e+00> : vector<8x8xf32>
    %87 = tpu.matmul %85, %86, %cst_27 {dimension_numbers = #tpu.dot_dimension_numbers<[1], [1], [0], [0], [0, 0, 1, 0], [], []>} : vector<8x32xbf16>, vector<8x32xbf16>, vector<8x8xf32> -> vector<8x8xf32>
    %cst_28 = arith.constant 0.176776692 : f32
    %88 = vector.broadcast %cst_28 : f32 to vector<8x8xf32>
    %89 = arith.mulf %87, %88 : vector<8x8xf32>
    %90 = arith.addf %89, %37 : vector<8x8xf32>
    %cst_29 = arith.constant dense<0xFF800000> : vector<8xf32>
    %91 = vector.multi_reduction <maximumf>, %90, %cst_29 [1] : vector<8x8xf32> to vector<8xf32>
    %92 = vector.shape_cast %91 : vector<8xf32> to vector<8x1xf32>
    %93 = vector.broadcast %92 : vector<8x1xf32> to vector<8x8xf32>
    %94 = arith.subf %90, %93 : vector<8x8xf32>
    %95 = math.exp %94 : vector<8x8xf32>
    %cst_30 = arith.constant dense<0.000000e+00> : vector<8xf32>
    %96 = vector.multi_reduction <add>, %95, %cst_30 [1] : vector<8x8xf32> to vector<8xf32>
    %97 = vector.shape_cast %96 : vector<8xf32> to vector<8x1xf32>
    %98 = tpu.reciprocal %97 {approx = true} : vector<8x1xf32> -> vector<8x1xf32>
    %99 = vector.broadcast %98 : vector<8x1xf32> to vector<8x8xf32>
    %100 = arith.mulf %95, %99 : vector<8x8xf32>
    %101 = arith.truncf %100 : vector<8x8xf32> to vector<8x8xbf16>
    %102 = arith.truncf %84 : vector<8x32xf32> to vector<8x32xbf16>
    %cst_31 = arith.constant dense<0.000000e+00> : vector<8x32xf32>
    %103 = tpu.matmul %101, %102, %cst_31 {dimension_numbers = #tpu.dot_dimension_numbers<[1], [0], [0], [1], [0, 0, 1, 1], [], []>} : vector<8x8xbf16>, vector<8x32xbf16>, vector<8x32xf32> -> vector<8x32xf32>
    %104 = vector.extract_strided_slice %31 {offsets = [0, 96], sizes = [8, 32], strides = [1, 1]} : vector<8x384xf32> to vector<8x32xf32>
    %105 = vector.extract_strided_slice %31 {offsets = [0, 224], sizes = [8, 32], strides = [1, 1]} : vector<8x384xf32> to vector<8x32xf32>
    %106 = vector.extract_strided_slice %31 {offsets = [0, 352], sizes = [8, 32], strides = [1, 1]} : vector<8x384xf32> to vector<8x32xf32>
    %107 = arith.truncf %104 : vector<8x32xf32> to vector<8x32xbf16>
    %108 = arith.truncf %105 : vector<8x32xf32> to vector<8x32xbf16>
    %cst_32 = arith.constant dense<0.000000e+00> : vector<8x8xf32>
    %109 = tpu.matmul %107, %108, %cst_32 {dimension_numbers = #tpu.dot_dimension_numbers<[1], [1], [0], [0], [0, 0, 1, 0], [], []>} : vector<8x32xbf16>, vector<8x32xbf16>, vector<8x8xf32> -> vector<8x8xf32>
    %cst_33 = arith.constant 0.176776692 : f32
    %110 = vector.broadcast %cst_33 : f32 to vector<8x8xf32>
    %111 = arith.mulf %109, %110 : vector<8x8xf32>
    %112 = arith.addf %111, %37 : vector<8x8xf32>
    %cst_34 = arith.constant dense<0xFF800000> : vector<8xf32>
    %113 = vector.multi_reduction <maximumf>, %112, %cst_34 [1] : vector<8x8xf32> to vector<8xf32>
    %114 = vector.shape_cast %113 : vector<8xf32> to vector<8x1xf32>
    %115 = vector.broadcast %114 : vector<8x1xf32> to vector<8x8xf32>
    %116 = arith.subf %112, %115 : vector<8x8xf32>
    %117 = math.exp %116 : vector<8x8xf32>
    %cst_35 = arith.constant dense<0.000000e+00> : vector<8xf32>
    %118 = vector.multi_reduction <add>, %117, %cst_35 [1] : vector<8x8xf32> to vector<8xf32>
    %119 = vector.shape_cast %118 : vector<8xf32> to vector<8x1xf32>
    %120 = tpu.reciprocal %119 {approx = true} : vector<8x1xf32> -> vector<8x1xf32>
    %121 = vector.broadcast %120 : vector<8x1xf32> to vector<8x8xf32>
    %122 = arith.mulf %117, %121 : vector<8x8xf32>
    %123 = arith.truncf %122 : vector<8x8xf32> to vector<8x8xbf16>
    %124 = arith.truncf %106 : vector<8x32xf32> to vector<8x32xbf16>
    %cst_36 = arith.constant dense<0.000000e+00> : vector<8x32xf32>
    %125 = tpu.matmul %123, %124, %cst_36 {dimension_numbers = #tpu.dot_dimension_numbers<[1], [0], [0], [1], [0, 0, 1, 1], [], []>} : vector<8x8xbf16>, vector<8x32xbf16>, vector<8x32xf32> -> vector<8x32xf32>
    %126 = tpu.concatenate %59, %81, %103, %125 in 1 : vector<8x32xf32>, vector<8x32xf32>, vector<8x32xf32>, vector<8x32xf32> -> vector<8x128xf32>
    %127 = arith.truncf %126 : vector<8x128xf32> to vector<8x128xbf16>
    %c0_37 = arith.constant 0 : index
    %c0_38 = arith.constant 0 : index
    %128 = vector.load %arg6[%c0_37, %c0_38] : memref<128x128xbf16, #tpu.memory_space<vmem>>, vector<128x128xbf16>
    %cst_39 = arith.constant dense<0.000000e+00> : vector<8x128xf32>
    %129 = tpu.matmul %127, %128, %cst_39 {dimension_numbers = #tpu.dot_dimension_numbers<[1], [0], [0], [1], [0, 0, 1, 1], [], []>} : vector<8x128xbf16>, vector<128x128xbf16>, vector<8x128xf32> -> vector<8x128xf32>
    %c0_40 = arith.constant 0 : index
    %c0_41 = arith.constant 0 : index
    %130 = vector.load %arg7[%c0_40, %c0_41] : memref<1x128xf32, #tpu.memory_space<vmem>>, vector<1x128xf32>
    %131 = vector.broadcast %130 : vector<1x128xf32> to vector<8x128xf32>
    %132 = arith.addf %129, %131 : vector<8x128xf32>
    %133 = arith.addf %1, %132 : vector<8x128xf32>
    %c0_42 = arith.constant 0 : index
    %c0_43 = arith.constant 0 : index
    %c0_44 = arith.constant 0 : index
    %134 = vector.load %arg8[%c0_42, %c0_43, %c0_44] : memref<1x8x128xf32, #tpu.memory_space<vmem>>, vector<1x8x128xf32>
    %135 = vector.shape_cast %134 : vector<1x8x128xf32> to vector<8x128xf32>
    %136 = vector.shape_cast %133 : vector<8x128xf32> to vector<1x8x128xf32>
    tpu.vector_store %arg8[%c0_42, %c0_43, %c0_44], %136 {strides = array<i32>} : memref<1x8x128xf32, #tpu.memory_space<vmem>>, vector<1x8x128xf32>,
    return
  }
  func.func @transform_0(%arg0: i32) -> (i32, i32, i32) {
    %c0_i32 = arith.constant 0 : i32
    %c0_i32_0 = arith.constant 0 : i32
    %c0_i32_1 = arith.constant 0 : i32
    return %arg0, %c0_i32, %c0_i32_0 : i32, i32, i32
  }
  func.func @transform_1(%arg0: i32) -> (i32, i32) {
    %c0_i32 = arith.constant 0 : i32
    %c0_i32_0 = arith.constant 0 : i32
    %c0_i32_1 = arith.constant 0 : i32
    return %c0_i32, %c0_i32_0 : i32, i32
  }
  func.func @transform_2(%arg0: i32) -> (i32, i32) {
    %c0_i32 = arith.constant 0 : i32
    %c0_i32_0 = arith.constant 0 : i32
    %c0_i32_1 = arith.constant 0 : i32
    return %c0_i32, %c0_i32_0 : i32, i32
  }
  func.func @transform_3(%arg0: i32) -> (i32, i32) {
    %c0_i32 = arith.constant 0 : i32
    %c0_i32_0 = arith.constant 0 : i32
    %c0_i32_1 = arith.constant 0 : i32
    return %c0_i32, %c0_i32_0 : i32, i32
  }
  func.func @transform_4(%arg0: i32) -> (i32, i32) {
    %c0_i32 = arith.constant 0 : i32
    %c0_i32_0 = arith.constant 0 : i32
    %c0_i32_1 = arith.constant 0 : i32
    return %c0_i32, %c0_i32_0 : i32, i32
  }
  func.func @transform_5(%arg0: i32) -> (i32, i32) {
    %c0_i32 = arith.constant 0 : i32
    %c0_i32_0 = arith.constant 0 : i32
    %c0_i32_1 = arith.constant 0 : i32
    return %c0_i32, %c0_i32_0 : i32, i32
  }
  func.func @transform_6(%arg0: i32) -> (i32, i32) {
    %c0_i32 = arith.constant 0 : i32
    %c0_i32_0 = arith.constant 0 : i32
    %c0_i32_1 = arith.constant 0 : i32
    return %c0_i32, %c0_i32_0 : i32, i32
  }
  func.func @transform_7(%arg0: i32) -> (i32, i32, i32) {
    %c0_i32 = arith.constant 0 : i32
    %c0_i32_0 = arith.constant 0 : i32
    %c0_i32_1 = arith.constant 0 : i32
    return %arg0, %c0_i32, %c0_i32_0 : i32, i32, i32
  }
}

module attributes {stable_mosaic.version = 11 : i64} {
  func.func @_mlp_block_kernel(%arg0: i32, %arg1: memref<16x128xf32, #tpu.memory_space<vmem>>, %arg2: memref<1x128xf32, #tpu.memory_space<vmem>>, %arg3: memref<1x128xf32, #tpu.memory_space<vmem>>, %arg4: memref<128x512xbf16, #tpu.memory_space<vmem>>, %arg5: memref<1x512xf32, #tpu.memory_space<vmem>>, %arg6: memref<512x128xbf16, #tpu.memory_space<vmem>>, %arg7: memref<1x128xf32, #tpu.memory_space<vmem>>, %arg8: memref<16x128xf32, #tpu.memory_space<vmem>>) attributes {dimension_semantics = [#tpu.dimension_semantics<parallel>], iteration_bounds = array<i64: 1>, scalar_prefetch = 0 : i64, scratch_operands = 0 : i64, tpu.core_type = #tpu.core_type<tc>, window_params = [{transform_indices = @transform_0, window_bounds = array<i64: 16, 128>}, {pipeline_mode = #tpu.pipeline_mode<synchronous>, transform_indices = @transform_1, window_bounds = array<i64: 1, 128>}, {pipeline_mode = #tpu.pipeline_mode<synchronous>, transform_indices = @transform_2, window_bounds = array<i64: 1, 128>}, {pipeline_mode = #tpu.pipeline_mode<synchronous>, transform_indices = @transform_3, window_bounds = array<i64: 128, 512>}, {pipeline_mode = #tpu.pipeline_mode<synchronous>, transform_indices = @transform_4, window_bounds = array<i64: 1, 512>}, {pipeline_mode = #tpu.pipeline_mode<synchronous>, transform_indices = @transform_5, window_bounds = array<i64: 512, 128>}, {pipeline_mode = #tpu.pipeline_mode<synchronous>, transform_indices = @transform_6, window_bounds = array<i64: 1, 128>}, {transform_indices = @transform_7, window_bounds = array<i64: 16, 128>}]} {
    %c0 = arith.constant 0 : index
    %c0_0 = arith.constant 0 : index
    %0 = vector.load %arg1[%c0, %c0_0] : memref<16x128xf32, #tpu.memory_space<vmem>>, vector<16x128xf32>
    %c0_1 = arith.constant 0 : index
    %c0_2 = arith.constant 0 : index
    %1 = vector.load %arg2[%c0_1, %c0_2] : memref<1x128xf32, #tpu.memory_space<vmem>>, vector<1x128xf32>
    %c0_3 = arith.constant 0 : index
    %c0_4 = arith.constant 0 : index
    %2 = vector.load %arg3[%c0_3, %c0_4] : memref<1x128xf32, #tpu.memory_space<vmem>>, vector<1x128xf32>
    %cst = arith.constant dense<0.000000e+00> : vector<16xf32>
    %3 = vector.multi_reduction <add>, %0, %cst [1] : vector<16x128xf32> to vector<16xf32>
    %4 = vector.shape_cast %3 : vector<16xf32> to vector<16x1xf32>
    %cst_5 = arith.constant 1.280000e+02 : f32
    %5 = vector.broadcast %cst_5 : f32 to vector<16x1xf32>
    %6 = arith.divf %4, %5 : vector<16x1xf32>
    %7 = vector.broadcast %6 : vector<16x1xf32> to vector<16x128xf32>
    %8 = arith.subf %0, %7 : vector<16x128xf32>
    %9 = arith.mulf %8, %8 : vector<16x128xf32>
    %cst_6 = arith.constant dense<0.000000e+00> : vector<16xf32>
    %10 = vector.multi_reduction <add>, %9, %cst_6 [1] : vector<16x128xf32> to vector<16xf32>
    %11 = vector.shape_cast %10 : vector<16xf32> to vector<16x1xf32>
    %cst_7 = arith.constant 1.280000e+02 : f32
    %12 = vector.broadcast %cst_7 : f32 to vector<16x1xf32>
    %13 = arith.divf %11, %12 : vector<16x1xf32>
    %14 = vector.broadcast %6 : vector<16x1xf32> to vector<16x128xf32>
    %15 = arith.subf %0, %14 : vector<16x128xf32>
    %cst_8 = arith.constant 9.99999974E-6 : f32
    %16 = vector.broadcast %cst_8 : f32 to vector<16x1xf32>
    %17 = arith.addf %13, %16 : vector<16x1xf32>
    %18 = math.rsqrt %17 : vector<16x1xf32>
    %19 = vector.broadcast %18 : vector<16x1xf32> to vector<16x128xf32>
    %20 = arith.mulf %15, %19 : vector<16x128xf32>
    %21 = vector.broadcast %1 : vector<1x128xf32> to vector<16x128xf32>
    %22 = arith.mulf %20, %21 : vector<16x128xf32>
    %23 = vector.broadcast %2 : vector<1x128xf32> to vector<16x128xf32>
    %24 = arith.addf %22, %23 : vector<16x128xf32>
    %25 = arith.truncf %24 : vector<16x128xf32> to vector<16x128xbf16>
    %c0_9 = arith.constant 0 : index
    %c0_10 = arith.constant 0 : index
    %26 = vector.load %arg4[%c0_9, %c0_10] : memref<128x512xbf16, #tpu.memory_space<vmem>>, vector<128x512xbf16>
    %cst_11 = arith.constant dense<0.000000e+00> : vector<16x512xf32>
    %27 = tpu.matmul %25, %26, %cst_11 {dimension_numbers = #tpu.dot_dimension_numbers<[1], [0], [0], [1], [0, 0, 1, 1], [], []>} : vector<16x128xbf16>, vector<128x512xbf16>, vector<16x512xf32> -> vector<16x512xf32>
    %c0_12 = arith.constant 0 : index
    %c0_13 = arith.constant 0 : index
    %28 = vector.load %arg5[%c0_12, %c0_13] : memref<1x512xf32, #tpu.memory_space<vmem>>, vector<1x512xf32>
    %29 = vector.broadcast %28 : vector<1x512xf32> to vector<16x512xf32>
    %30 = arith.addf %27, %29 : vector<16x512xf32>
    %cst_14 = arith.constant 1.702000e+00 : f32
    %31 = vector.broadcast %cst_14 : f32 to vector<16x512xf32>
    %32 = arith.mulf %31, %30 : vector<16x512xf32>
    %33 = arith.negf %32 : vector<16x512xf32>
    %34 = math.exp %33 : vector<16x512xf32>
    %cst_15 = arith.constant 1.000000e+00 : f32
    %35 = vector.broadcast %cst_15 : f32 to vector<16x512xf32>
    %36 = arith.addf %35, %34 : vector<16x512xf32>
    %37 = arith.divf %35, %36 : vector<16x512xf32>
    %38 = arith.mulf %30, %37 : vector<16x512xf32>
    %39 = arith.truncf %38 : vector<16x512xf32> to vector<16x512xbf16>
    %c0_16 = arith.constant 0 : index
    %c0_17 = arith.constant 0 : index
    %40 = vector.load %arg6[%c0_16, %c0_17] : memref<512x128xbf16, #tpu.memory_space<vmem>>, vector<512x128xbf16>
    %cst_18 = arith.constant dense<0.000000e+00> : vector<16x128xf32>
    %41 = tpu.matmul %39, %40, %cst_18 {dimension_numbers = #tpu.dot_dimension_numbers<[1], [0], [0], [1], [0, 0, 1, 1], [], []>} : vector<16x512xbf16>, vector<512x128xbf16>, vector<16x128xf32> -> vector<16x128xf32>
    %c0_19 = arith.constant 0 : index
    %c0_20 = arith.constant 0 : index
    %42 = vector.load %arg7[%c0_19, %c0_20] : memref<1x128xf32, #tpu.memory_space<vmem>>, vector<1x128xf32>
    %43 = vector.broadcast %42 : vector<1x128xf32> to vector<16x128xf32>
    %44 = arith.addf %41, %43 : vector<16x128xf32>
    %45 = arith.addf %0, %44 : vector<16x128xf32>
    %c0_21 = arith.constant 0 : index
    %c0_22 = arith.constant 0 : index
    %46 = vector.load %arg8[%c0_21, %c0_22] : memref<16x128xf32, #tpu.memory_space<vmem>>, vector<16x128xf32>
    tpu.vector_store %arg8[%c0_21, %c0_22], %45 {strides = array<i32>} : memref<16x128xf32, #tpu.memory_space<vmem>>, vector<16x128xf32>,
    return
  }
  func.func @transform_0(%arg0: i32) -> (i32, i32) {
    %c0_i32 = arith.constant 0 : i32
    %c0_i32_0 = arith.constant 0 : i32
    return %arg0, %c0_i32 : i32, i32
  }
  func.func @transform_1(%arg0: i32) -> (i32, i32) {
    %c0_i32 = arith.constant 0 : i32
    %c0_i32_0 = arith.constant 0 : i32
    %c0_i32_1 = arith.constant 0 : i32
    return %c0_i32, %c0_i32_0 : i32, i32
  }
  func.func @transform_2(%arg0: i32) -> (i32, i32) {
    %c0_i32 = arith.constant 0 : i32
    %c0_i32_0 = arith.constant 0 : i32
    %c0_i32_1 = arith.constant 0 : i32
    return %c0_i32, %c0_i32_0 : i32, i32
  }
  func.func @transform_3(%arg0: i32) -> (i32, i32) {
    %c0_i32 = arith.constant 0 : i32
    %c0_i32_0 = arith.constant 0 : i32
    %c0_i32_1 = arith.constant 0 : i32
    return %c0_i32, %c0_i32_0 : i32, i32
  }
  func.func @transform_4(%arg0: i32) -> (i32, i32) {
    %c0_i32 = arith.constant 0 : i32
    %c0_i32_0 = arith.constant 0 : i32
    %c0_i32_1 = arith.constant 0 : i32
    return %c0_i32, %c0_i32_0 : i32, i32
  }
  func.func @transform_5(%arg0: i32) -> (i32, i32) {
    %c0_i32 = arith.constant 0 : i32
    %c0_i32_0 = arith.constant 0 : i32
    %c0_i32_1 = arith.constant 0 : i32
    return %c0_i32, %c0_i32_0 : i32, i32
  }
  func.func @transform_6(%arg0: i32) -> (i32, i32) {
    %c0_i32 = arith.constant 0 : i32
    %c0_i32_0 = arith.constant 0 : i32
    %c0_i32_1 = arith.constant 0 : i32
    return %c0_i32, %c0_i32_0 : i32, i32
  }
  func.func @transform_7(%arg0: i32) -> (i32, i32) {
    %c0_i32 = arith.constant 0 : i32
    %c0_i32_0 = arith.constant 0 : i32
    return %arg0, %c0_i32 : i32, i32
  }
}

module attributes {stable_mosaic.version = 11 : i64} {
  func.func @_ln_linear_kernel(%arg0: i32, %arg1: i32, %arg2: memref<2x128xf32, #tpu.memory_space<vmem>>, %arg3: memref<1x128xf32, #tpu.memory_space<vmem>>, %arg4: memref<1x128xf32, #tpu.memory_space<vmem>>, %arg5: memref<128x128xbf16, #tpu.memory_space<vmem>>, %arg6: memref<1x128xf32, #tpu.memory_space<vmem>>, %arg7: memref<2x128xf32, #tpu.memory_space<vmem>>) attributes {dimension_semantics = [#tpu.dimension_semantics<parallel>, #tpu.dimension_semantics<parallel>], iteration_bounds = array<i64: 1, 1>, scalar_prefetch = 0 : i64, scratch_operands = 0 : i64, tpu.core_type = #tpu.core_type<tc>, window_params = [{transform_indices = @transform_0, window_bounds = array<i64: 2, 128>}, {pipeline_mode = #tpu.pipeline_mode<synchronous>, transform_indices = @transform_1, window_bounds = array<i64: 1, 128>}, {pipeline_mode = #tpu.pipeline_mode<synchronous>, transform_indices = @transform_2, window_bounds = array<i64: 1, 128>}, {transform_indices = @transform_3, window_bounds = array<i64: 128, 128>}, {transform_indices = @transform_4, window_bounds = array<i64: 1, 128>}, {transform_indices = @transform_5, window_bounds = array<i64: 2, 128>}]} {
    %c0 = arith.constant 0 : index
    %c0_0 = arith.constant 0 : index
    %0 = vector.load %arg2[%c0, %c0_0] : memref<2x128xf32, #tpu.memory_space<vmem>>, vector<2x128xf32>
    %c0_1 = arith.constant 0 : index
    %c0_2 = arith.constant 0 : index
    %1 = vector.load %arg3[%c0_1, %c0_2] : memref<1x128xf32, #tpu.memory_space<vmem>>, vector<1x128xf32>
    %c0_3 = arith.constant 0 : index
    %c0_4 = arith.constant 0 : index
    %2 = vector.load %arg4[%c0_3, %c0_4] : memref<1x128xf32, #tpu.memory_space<vmem>>, vector<1x128xf32>
    %cst = arith.constant dense<0.000000e+00> : vector<2xf32>
    %3 = vector.multi_reduction <add>, %0, %cst [1] : vector<2x128xf32> to vector<2xf32>
    %4 = vector.shape_cast %3 : vector<2xf32> to vector<2x1xf32>
    %cst_5 = arith.constant 1.280000e+02 : f32
    %5 = vector.broadcast %cst_5 : f32 to vector<2x1xf32>
    %6 = arith.divf %4, %5 : vector<2x1xf32>
    %7 = vector.broadcast %6 : vector<2x1xf32> to vector<2x128xf32>
    %8 = arith.subf %0, %7 : vector<2x128xf32>
    %9 = arith.mulf %8, %8 : vector<2x128xf32>
    %cst_6 = arith.constant dense<0.000000e+00> : vector<2xf32>
    %10 = vector.multi_reduction <add>, %9, %cst_6 [1] : vector<2x128xf32> to vector<2xf32>
    %11 = vector.shape_cast %10 : vector<2xf32> to vector<2x1xf32>
    %cst_7 = arith.constant 1.280000e+02 : f32
    %12 = vector.broadcast %cst_7 : f32 to vector<2x1xf32>
    %13 = arith.divf %11, %12 : vector<2x1xf32>
    %14 = vector.broadcast %6 : vector<2x1xf32> to vector<2x128xf32>
    %15 = arith.subf %0, %14 : vector<2x128xf32>
    %cst_8 = arith.constant 9.99999974E-6 : f32
    %16 = vector.broadcast %cst_8 : f32 to vector<2x1xf32>
    %17 = arith.addf %13, %16 : vector<2x1xf32>
    %18 = math.rsqrt %17 : vector<2x1xf32>
    %19 = vector.broadcast %18 : vector<2x1xf32> to vector<2x128xf32>
    %20 = arith.mulf %15, %19 : vector<2x128xf32>
    %21 = vector.broadcast %1 : vector<1x128xf32> to vector<2x128xf32>
    %22 = arith.mulf %20, %21 : vector<2x128xf32>
    %23 = vector.broadcast %2 : vector<1x128xf32> to vector<2x128xf32>
    %24 = arith.addf %22, %23 : vector<2x128xf32>
    %25 = arith.truncf %24 : vector<2x128xf32> to vector<2x128xbf16>
    %c0_9 = arith.constant 0 : index
    %c0_10 = arith.constant 0 : index
    %26 = vector.load %arg5[%c0_9, %c0_10] : memref<128x128xbf16, #tpu.memory_space<vmem>>, vector<128x128xbf16>
    %cst_11 = arith.constant dense<0.000000e+00> : vector<2x128xf32>
    %27 = tpu.matmul %25, %26, %cst_11 {dimension_numbers = #tpu.dot_dimension_numbers<[1], [0], [0], [1], [0, 0, 1, 1], [], []>} : vector<2x128xbf16>, vector<128x128xbf16>, vector<2x128xf32> -> vector<2x128xf32>
    %c0_12 = arith.constant 0 : index
    %c0_13 = arith.constant 0 : index
    %28 = vector.load %arg6[%c0_12, %c0_13] : memref<1x128xf32, #tpu.memory_space<vmem>>, vector<1x128xf32>
    %29 = vector.broadcast %28 : vector<1x128xf32> to vector<2x128xf32>
    %30 = arith.addf %27, %29 : vector<2x128xf32>
    %c0_14 = arith.constant 0 : index
    %c0_15 = arith.constant 0 : index
    %31 = vector.load %arg7[%c0_14, %c0_15] : memref<2x128xf32, #tpu.memory_space<vmem>>, vector<2x128xf32>
    tpu.vector_store %arg7[%c0_14, %c0_15], %30 {strides = array<i32>} : memref<2x128xf32, #tpu.memory_space<vmem>>, vector<2x128xf32>,
    return
  }
  func.func @transform_0(%arg0: i32, %arg1: i32) -> (i32, i32) {
    %c0_i32 = arith.constant 0 : i32
    %c0_i32_0 = arith.constant 0 : i32
    return %arg0, %c0_i32 : i32, i32
  }
  func.func @transform_1(%arg0: i32, %arg1: i32) -> (i32, i32) {
    %c0_i32 = arith.constant 0 : i32
    %c0_i32_0 = arith.constant 0 : i32
    %c0_i32_1 = arith.constant 0 : i32
    return %c0_i32, %c0_i32_0 : i32, i32
  }
  func.func @transform_2(%arg0: i32, %arg1: i32) -> (i32, i32) {
    %c0_i32 = arith.constant 0 : i32
    %c0_i32_0 = arith.constant 0 : i32
    %c0_i32_1 = arith.constant 0 : i32
    return %c0_i32, %c0_i32_0 : i32, i32
  }
  func.func @transform_3(%arg0: i32, %arg1: i32) -> (i32, i32) {
    %c0_i32 = arith.constant 0 : i32
    %c0_i32_0 = arith.constant 0 : i32
    return %c0_i32, %arg1 : i32, i32
  }
  func.func @transform_4(%arg0: i32, %arg1: i32) -> (i32, i32) {
    %c0_i32 = arith.constant 0 : i32
    %c0_i32_0 = arith.constant 0 : i32
    return %c0_i32, %arg1 : i32, i32
  }
  func.func @transform_5(%arg0: i32, %arg1: i32) -> (i32, i32) {
    %c0_i32 = arith.constant 0 : i32
    return %arg0, %arg1 : i32, i32
  }
}

</mosaic_0001>

<bundles_post_ra>
// kernel: text_encoder_forward.5
= control target key start
LH: loop header
LB: loop body
LE: loop exit
PB: predicated region body
PF: predicated region fallthrough
CT: control target
= control target key end

     0   :  { %13 = vsyncpa [#allocation3], 0  ;;  %s1493_s0 = inlined_call_operand.vmem [shape: f32[2,8,128], index: 0, kind: input, shape index: {}]   ;;  %s1494_s1 = inlined_call_operand.vmem [shape: f32[1,8,128], index: 1, kind: input, shape index: {}]   ;;  %s1495_s2 = inlined_call_operand.vmem [shape: f32[1,128], index: 2, kind: input, shape index: {}]   ;;  %s1496_s3 = inlined_call_operand.vmem [shape: f32[1,128], index: 3, kind: input, shape index: {}]   ;;  %s1497_s4 = inlined_call_operand.hbm [shape: bf16[128,384], index: 4, kind: input, shape index: {}]   ;;  %s1498_s5 = inlined_call_operand.vmem [shape: f32[1,384], index: 5, kind: input, shape index: {}]   ;;  %s1499_s6 = inlined_call_operand.hbm [shape: bf16[128,128], index: 6, kind: input, shape index: {}]   ;;  %s1500_s7 = inlined_call_operand.vmem [shape: f32[1,128], index: 7, kind: input, shape index: {}]   ;;  %s1501_s8 = inlined_call_operand.vmem [shape: f32[2,8,128], index: 8, kind: output, shape index: {}]  }
   0x1   :  { %14 = vsyncpa [#allocation5], 0  ;;  %s1375_s27 = smov 0  }
   0x2 LB: > { %s244_s30 = sshll.u32 %s1497_s4, 4  ;;  %s1001_s9 = sadd.s32 4294967295, %s1317_s27   ;;  %s1317_s27 = sphi %s1375_s27, %s20_s27   ;;  %s245_s30 = int_to_ptr.hbm [resolvable:$true] %s244_s30 }
   0x3   : > { %p1003_p0 = scmp.ge.s32.totalorder %s1317_s27, 1  ;;  %p224_p1 = scmp.lt.s32.totalorder %s1317_s27, 3 }
   0x4   : > { %p1197_p2 = scmp.eq.s32.totalorder %s1001_s9, 0  ;;  %s1319_s11 = smov [#allocation2]  }
   0x5   : > { %p1386_p3 = pnand %p1003_p0, %p224_p1  ;;  %s246_s12 = sshll.u32 %s1319_s11, 4  ;;  %s247_s12 = int_to_ptr.vmem [resolvable:$true] %s246_s12 }
   0x6   : > { %s261_s15 = sshll.u32 %s1499_s6, 4  ;;  %s1320_s16 = smov [#allocation4]   ;;  %s262_s15 = int_to_ptr.hbm [resolvable:$true] %s261_s15 }
   0x7   : > { %p1190_p4 = pneg %p1386_p3  ;;  %s263_s17 = sshll.u32 %s1320_s16, 4  ;;  %s264_s17 = int_to_ptr.vmem [resolvable:$true] %s263_s17 }
   0x8   : > { %s1321_s18 = smov 192   ;;  %s1322_s19 = smov 12  }
   0x9   : > { %p1191_p5 = pnand %p1197_p2, %p1190_p4  ;;  %s1323_s20 = smov 64  }
   0xa   : > { %s1324_s21 = smov 4   ;;  %289 = sbr.rel (%p1386_p3) target bundleno = 1619 (0x653), region = 52 }
   0xb   : > { %1193 = dma.hbm_to_vmem [thread:$0]  (!%p1191_p5), %s245_s30, 3072, %s247_s12, [#allocation3], %s1321_s18, %s1321_s18, %s1322_s19  }
   0xc   : > { %1196 = dma.hbm_to_vmem [thread:$0]  (!%p1191_p5), %s262_s15, 1024, %s264_s17, [#allocation5], %s1323_s20, %s1323_s20, %s1324_s21  }
   0xf   : > { %1308 = dma.done.wait (%p1197_p2), [#allocation3], 3072  }
  0x10   : > { %1310 = vsyncadd (%p1197_p2), [#allocation3], 4294964224 }
  0x11   : > { %1312 = dma.done.wait (%p1197_p2), [#allocation5], 1024  }
  0x12   : > { %1314 = vsyncadd (%p1197_p2), [#allocation5], 4294966272  ;;  %p327_p6 = scmp.lt.s32.totalorder %s1001_s9, 1  ;;  %v337_v1 = vld [vmem:[%s1494_s1] sm:$0xff]  ;;  %v1325_v3 = vmov 128.0   ;;  %vm592_vm4 = vcmask 261120  }
  0x13   : > { %1223 = vrcp.f32 %v1325_v3  ;;  %v1098_v4 = vld [vmem:[#allocation2 + $0xa8] sm:$0xf]  ;;  %v1172_v5 = vld [vmem:[#allocation2 + $0xb0] sm:$0xf0]  ;;  %v1171_v6 = vld [vmem:[#allocation2 + $0xac] sm:$0xf] }
  0x14   : > { %s1504_s9 = smov (!%p327_p6, %s1001_s9), 1  ;;  %v1099_v7 = vor.u32 %v1172_v5, %v1098_v4  ;;  %v1100_v8 = vld [vmem:[#allocation2 + $0xb4] sm:$0xf0]  ;;  %v1106_v9 = vld [vmem:[#allocation2 + $0xb0] sm:$0xf]  ;;  %s1326_s14 = smov 64  }
  0x15   : > { %s1010_s22 = sshll.u32 %s1504_s9, 3  ;;  %v1173_v10 = vld [vmem:[#allocation2 + $0xb8] sm:$0xf0]  ;;  %v1103_v11 = vor.u32 %v1171_v6, %v1100_v8  ;;  %v1086_v23 = vld [vmem:[#allocation2 + $0x90] sm:$0xf]  ;;  %s1327_s15 = smov 96  }
  0x16   : > { %s330_s25 = scalar_lea.vmem %s1493_s0, %s1010_s22  ;;  %v1107_v12 = vor.u32 %v1173_v10, %v1106_v9  ;;  %545 = vmatpush.bf16.msra.mxu0 %v1099_v7  ;;  %v1169_v24 = vld [vmem:[#allocation2 + $0x98] sm:$0xf0]  ;;  %v1168_v25 = vld [vmem:[#allocation2 + $0x94] sm:$0xf]  ;;  %v1088_v27 = vld [vmem:[#allocation2 + $0x9c] sm:$0xf0]  ;;  %s334_s21 = scalar_lea.vmem %s1501_s8, %s1010_s22 }
  0x17   : > { %v336_v0 = vld [vmem:[%s330_s25] sm:$0xff]  ;;  %558 = vmatpush.bf16.msra.mxu1 %v1103_v11  ;;  %v1087_v26 = vor.u32 %v1169_v24, %v1086_v23  ;;  %v1094_v28 = vld [vmem:[#allocation2 + $0x98] sm:$0xf]  ;;  %v1091_v30 = vor.u32 %v1168_v25, %v1088_v27  ;;  %v1165_v34 = vld [vmem:[#allocation2 + $0x7c] sm:$0xf]  ;;  %vm631_vm5 = vcmask 1043456  }
  0x18   : > { %v1413_v2 = vadd.f32 %v337_v1, %v336_v0  ;;  %571 = vmatpush.bf16.msra.mxu2 %v1107_v12  ;;  %v1170_v29 = vld [vmem:[#allocation2 + $0xa0] sm:$0xf0]  ;;  %v1074_v32 = vld [vmem:[#allocation2 + $0x78] sm:$0xf]  ;;  %v1076_v36 = vld [vmem:[#allocation2 + $0x84] sm:$0xf0] }
  0x19   : > { %v1224_v13 = vpop.eup %1223  ;;  %v1095_v31 = vor.u32 %v1170_v29, %v1094_v28  ;;  %v1166_v33 = vld [vmem:[#allocation2 + $0x80] sm:$0xf0]  ;;  %v1082_v37 = vld [vmem:[#allocation2 + $0x80] sm:$0xf]  ;;  %v1167_v38 = vld [vmem:[#allocation2 + $0x88] sm:$0xf0]  ;;  %v1079_v39 = vor.u32 %v1165_v34, %v1076_v36 }
  0x1a   : > { %341 = vadd.xlane.f32.xlu0 %v1413_v2  ;;  %v344_v14 = vmul.f32 128.0, %v1224_v13  ;;  %vm348_vm0 = vweird.f32 %v1224_v13  ;;  %546 = vmatpush.bf16.msra.mxu0 %v1087_v26  ;;  %v1075_v35 = vor.u32 %v1166_v33, %v1074_v32  ;;  %v1083_v40 = vor.u32 %v1167_v38, %v1082_v37  ;;  %v1062_v41 = vld [vmem:[#allocation2 + $0x60] sm:$0xf]  ;;  %v1163_v42 = vld [vmem:[#allocation2 + $0x68] sm:$0xf0]  ;;  %s1328_s16 = smov 32  }
  0x1b   : > { %559 = vmatpush.bf16.msra.mxu1 %v1091_v30  ;;  %v1162_v43 = vld [vmem:[#allocation2 + $0x64] sm:$0xf]  ;;  %v1063_v44 = vor.u32 %v1163_v42, %v1062_v41  ;;  %v1064_v45 = vld [vmem:[#allocation2 + $0x6c] sm:$0xf0]  ;;  %v1070_v46 = vld [vmem:[#allocation2 + $0x68] sm:$0xf] }
  0x1c   : > { %v345_v15 = vsub.f32 1.0, %v344_v14  ;;  %572 = vmatpush.bf16.msra.mxu2 %v1095_v31  ;;  %v1164_v47 = vld [vmem:[#allocation2 + $0x70] sm:$0xf0]  ;;  %v1067_v48 = vor.u32 %v1162_v43, %v1064_v45  ;;  %v1050_v50 = vld [vmem:[#allocation2 + $0x48] sm:$0xf]  ;;  %vm614_vm7 = vcmask 64512  }
  0x1d   : > { %v1071_v49 = vor.u32 %v1164_v47, %v1070_v46  ;;  %v1160_v51 = vld [vmem:[#allocation2 + $0x50] sm:$0xf0]  ;;  %v1159_v52 = vld [vmem:[#allocation2 + $0x4c] sm:$0xf]  ;;  %v1052_v54 = vld [vmem:[#allocation2 + $0x54] sm:$0xf0] }
  0x1e   : > { %v346_v16 = vmul.f32 %v1224_v13, %v345_v15  ;;  %547 = vmatpush.bf16.msra.mxu0 %v1075_v35  ;;  %v1051_v53 = vor.u32 %v1160_v51, %v1050_v50  ;;  %v1058_v55 = vld [vmem:[#allocation2 + $0x50] sm:$0xf]  ;;  %v1161_v56 = vld [vmem:[#allocation2 + $0x58] sm:$0xf0]  ;;  %v1055_v57 = vor.u32 %v1159_v52, %v1052_v54  ;;  %v1156_v61 = vld [vmem:[#allocation2 + $0x34] sm:$0xf] }
  0x1f   : > { %560 = vmatpush.bf16.msra.mxu1 %v1079_v39  ;;  %v1059_v58 = vor.u32 %v1161_v56, %v1058_v55  ;;  %v1038_v59 = vld [vmem:[#allocation2 + $0x30] sm:$0xf]  ;;  %v1157_v60 = vld [vmem:[#allocation2 + $0x38] sm:$0xf0]  ;;  %v1040_v63 = vld [vmem:[#allocation2 + $0x3c] sm:$0xf0] }
  0x20   : > { %v347_v17 = vadd.f32 %v1224_v13, %v346_v16  ;;  %573 = vmatpush.bf16.msra.mxu2 %v1083_v40  ;;  %v1039_v62 = vor.u32 %v1157_v60, %v1038_v59  ;;  %v1046_v0 = vld [vmem:[#allocation2 + $0x38] sm:$0xf]  ;;  %v1158_v1 = vld [vmem:[#allocation2 + $0x40] sm:$0xf0]  ;;  %v1043_v3 = vor.u32 %v1156_v61, %v1040_v63  ;;  %v1153_v7 = vld [vmem:[#allocation2 + $0x1c] sm:$0xf]  ;;  %v584_v63 = vlaneseq }
  0x21   : > { %v1047_v4 = vor.u32 %v1158_v1, %v1046_v0  ;;  %v1026_v5 = vld [vmem:[#allocation2 + $0x18] sm:$0xf]  ;;  %v1154_v6 = vld [vmem:[#allocation2 + $0x20] sm:$0xf0]  ;;  %v1028_v9 = vld [vmem:[#allocation2 + $0x24] sm:$0xf0] }
  0x22   : > { %v1416_v18 = vsel %vm348_vm0, %v1224_v13, %v347_v17  ;;  %548 = vmatpush.bf16.msra.mxu0 %v1063_v44  ;;  %v1027_v8 = vor.u32 %v1154_v6, %v1026_v5  ;;  %v1034_v10 = vld [vmem:[#allocation2 + $0x20] sm:$0xf]  ;;  %v1155_v11 = vld [vmem:[#allocation2 + $0x28] sm:$0xf0]  ;;  %v1031_v12 = vor.u32 %v1153_v7, %v1028_v9  ;;  %v1150_v16 = vld [vmem:[#allocation2 + $0x4] sm:$0xf] }
  0x23   : > { %561 = vmatpush.bf16.msra.mxu1 %v1067_v48  ;;  %v1035_v13 = vor.u32 %v1155_v11, %v1034_v10  ;;  %v1014_v14 = vld [vmem:[#allocation2] sm:$0xf]  ;;  %v1151_v15 = vld [vmem:[#allocation2 + $0x8] sm:$0xf0]  ;;  %v585_v0 = vshrl.u32 %v584_v63, 7  ;;  %v587_v1 = vand.u32 127, %v584_v63 }
  0x24   : > { %574 = vmatpush.bf16.msra.mxu2 %v1071_v49  ;;  %v1015_v17 = vor.u32 %v1151_v15, %v1014_v14  ;;  %v1220_v34 = vld [vmem:[%s1495_s2] ss:$0 sm:$0xff]  ;;  %vm838_vm8 = vcmask 523264   ;;  %vm840_vm9 = vcmask 785408  }
  0x25   : > { %v409_v40 = vld [vmem:[%s1498_s5] sm:$0x7]  ;;  %vm588_vm6 = vcmp.gt.s32.totalorder %v587_v1, %v585_v0 }
  0x26   : > { %549 = vmatpush.bf16.msra.mxu0 %v1051_v53  ;;  %v412_v41 = vperm.slane %v409_v40, 1  ;;  %v413_v46 = vperm.slane %v409_v40, 2 }
  0x27   : > { %562 = vmatpush.bf16.msra.mxu1 %v1055_v57 }
  0x28   : > { %575 = vmatpush.bf16.msra.mxu2 %v1059_v58 }
  0x2a   : > { %550 = vmatpush.bf16.msra.mxu0 %v1039_v62 }
  0x2b   : > { %563 = vmatpush.bf16.msra.mxu1 %v1043_v3 }
  0x2c   : > { %576 = vmatpush.bf16.msra.mxu2 %v1047_v4  ;;  %v1329_v4 = vmov 0.0  }
  0x2d   : > { %v589_v5 = vsel %vm588_vm6, -1e+09, %v1329_v4 }
  0x2e   : > { %551 = vmatpush.bf16.msra.mxu0 %v1027_v8 }
  0x2f   : > { %564 = vmatpush.bf16.msra.mxu1 %v1031_v12 }
  0x30   : > { %577 = vmatpush.bf16.msra.mxu2 %v1035_v13 }
  0x32   : > { %552 = vmatpush.bf16.msra.mxu0 %v1015_v17 }
  0x8d   : > { %v342_v19 = vpop.xlane.xlu0 %341 }
  0x8e   : > { %v350_v20 = vmul.f32 %v1416_v18, %v342_v19  ;;  %v1016_v19 = vld [vmem:[#allocation2 + $0xc] sm:$0xf0] }
  0x8f   : > { %v1019_v23 = vor.u32 %v1150_v16, %v1016_v19 }
  0x90   : > { %v1420_v21 = vsub.f32 %v1413_v2, %v350_v20  ;;  %v1022_v20 = vld [vmem:[#allocation2 + $0x8] sm:$0xf] }
  0x91   : > { %565 = vmatpush.bf16.msra.mxu1 %v1019_v23 }
  0x92   : > { %v352_v22 = vmul.f32 %v1420_v21, %v1420_v21 }
  0x94   : > { %353 = vadd.xlane.f32.xlu0 %v352_v22  ;;  %v1152_v22 = vld [vmem:[#allocation2 + $0x10] sm:$0xf0] }
  0x95   : > { %v1023_v24 = vor.u32 %v1152_v22, %v1022_v20 }
  0x97   : > { %578 = vmatpush.bf16.msra.mxu2 %v1023_v24 }
 0x107   : > { %v354_v25 = vpop.xlane.xlu0 %353 }
 0x108   : > { %v355_v26 = vmul.f32 %v354_v25, %v1416_v18  ;;  %v1221_v18 = vld [vmem:[%s1496_s3] ss:$0 sm:$0xff] }
 0x10a   : > { %v356_v27 = vadd.f32 1e-05, %v355_v26 }
 0x10c   : > { %1225 = vrsqrt.f32 %v356_v27  ;;  %vm363_vm2 = vweird.f32 %v356_v27 }
 0x112   : > { %v1226_v28 = vpop.eup %1225 }
 0x113   : > { %v358_v29 = vmul.f32 %v1226_v28, %v356_v27  ;;  %vm364_vm1 = vweird.f32 %v1226_v28 }
 0x114   : > { %vm365_vm3 = vmor %vm363_vm2, %vm364_vm1 }
 0x115   : > { %v359_v30 = vmul.f32 %v1226_v28, %v358_v29 }
 0x117   : > { %v360_v31 = vmul.f32 0.5, %v359_v30 }
 0x119   : > { %v361_v32 = vsub.f32 1.5, %v360_v31 }
 0x11b   : > { %v362_v33 = vmul.f32 %v1226_v28, %v361_v32 }
 0x11d   : > { %v366_v35 = vsel %vm365_vm3, %v1226_v28, %v362_v33 }
 0x11e   : > { %v367_v36 = vmul.f32 %v366_v35, %v1420_v21  ;;  %v411_v21 = vperm.slane %v409_v40, 0 }
 0x120   : > { %v371_v37 = vmul.f32 %v1220_v34, %v367_v36 }
 0x122   : > { %v375_v38 = vadd.f32 %v1221_v18, %v371_v37 }
 0x124   : > { %v376_v39 = vpack.c.bf16 %v375_v38, %v375_v38 }
 0x126   : > { %553 = vmatmul.bf16.vlgmr.msra.gmra.mxu0 %v376_v39  ;;  %566 = vmatmul.bf16.vlgmr.msra.gmra.mxu1 %v376_v39 }
 0x127   : > { %579 = vmatmul.bf16.vlgmr.msra.gmra.mxu2 %v376_v39 }
 0x1a3   : > { %v554_v42 = vpop.f32.mrf.mxu0  ;;  %v567_v43 = vpop.f32.mrf.mxu1 }
 0x1a4   : > { %v568_v44 = vadd.f32 %v567_v43, %v412_v41  ;;  %v555_v48 = vadd.f32 %v554_v42, %v411_v21 }
 0x1a6   : > { %v591_v45 = vpack.c.bf16 %v568_v44, %v568_v44  ;;  %v590_v54 = vpack.c.bf16 %v555_v48, %v555_v48 }
 0x1a8   : > { %711 = vrot.lane.b32.xlu0 %v591_v45, %s1326_s14  ;;  %652 = vrot.lane.b32.xlu2 %v591_v45, %s1327_s15  ;;  %v597_v47 = vsel %vm592_vm4, %v591_v45, 0 }
 0x1a9   : > { %606 = vmatpush.bf16.xpose.msra.mxu3 %v597_v47 }
 0x1aa   : > { %v580_v49 = vpop.f32.mrf.mxu2 }
 0x1ab   : > { %v581_v50 = vadd.f32 %v580_v49, %v413_v46  ;;  %v556_v51 = vpop.f32.mrf.mxu0  ;;  %v569_v52 = vpop.f32.mrf.mxu1 }
 0x1ad   : > { %v1438_v53 = vpack.c.bf16 %v581_v50, %v581_v50 }
 0x1af   : > { %v633_v55 = vsel %vm631_vm5, %v1438_v53, 0 }
 0x1b0   : > { %649 = vrot.lane.b32.xlu2 %v590_v54, %s1327_s15  ;;  %1108 = vmatmul.msk.bf16.vlgmr.msra.gmra.mxu3 %vm592_vm4, %v590_v54 }
 0x1b1   : > { %642 = vmatpush.bf16.msrb.mxu3 %v633_v55 }
 0x1b2   : > { %v582_v56 = vpop.f32.mrf.mxu2 }
 0x1b8   : > { %709 = vrot.lane.b32.xlu2 %v590_v54, %s1326_s14 }
 0x1c0   : > { %767 = vrot.lane.b32.xlu2 %v590_v54, %s1328_s16 }
 0x202   : > { %v653_v57 = vpop.permute.xlu2 %652 }
 0x203   : > { %v658_v58 = vsel %vm592_vm4, %v653_v57, 0 }
 0x204   : > { %667 = vmatpush.bf16.xpose.msra.mxu3 %v658_v58 }
 0x20a   : > { %v650_v59 = vpop.permute.xlu2 %649 }
 0x212   : > { %v710_v62 = vpop.permute.xlu2 %709 }
 0x21a   : > { %v712_v60 = vpop.permute.xlu0 %711  ;;  %v768_v31 = vpop.permute.xlu2 %767 }
 0x21b   : > { %v717_v61 = vsel %vm592_vm4, %v712_v60, 0 }
 0x21c   : > { %726 = vmatpush.bf16.xpose.msrb.mxu2 %v717_v61 }
 0x223   : > { %1112 = vmatmul.msk.bf16.vlgmr.msrb.gmra.mxu2 %vm592_vm4, %v710_v62 }
 0x233   : > { %v608_v3 = vpop.f32.mrf.mxu3 }
 0x234   : > { %v612_v6 = vmul.f32 0.17677669, %v608_v3 }
 0x236   : > { %v613_v7 = vadd.f32 %v612_v6, %v589_v5 }
 0x238   : > { %v615_v8 = vsel %vm614_vm7, %v613_v7, -inf }
 0x239   : > { %616 = vmax.xlane.f32.xlu1 %v615_v8 }
 0x23b   : > { %v610_v9 = vpop.f32.mrf.mxu3 }
 0x2a6   : > { %v728_v10 = vpop.f32.mrf.mxu2 }
 0x2a7   : > { %v732_v11 = vmul.f32 0.17677669, %v728_v10 }
 0x2a9   : > { %v733_v12 = vadd.f32 %v732_v11, %v589_v5 }
 0x2ab   : > { %v734_v13 = vsel %vm614_vm7, %v733_v12, -inf }
 0x2ac   : > { %735 = vmax.xlane.f32.xlu0 %v734_v13  ;;  %v617_v14 = vpop.xlane.xlu1 %616  ;;  %v1180_v13 = vld [vmem:[#allocation4 + $0x30] sm:$0xff] }
 0x2ad   : > { %v618_v15 = vsub.f32 %v613_v7, %v617_v14 }
 0x2ae   : > { %v730_v16 = vpop.f32.mrf.mxu2 }
 0x2af   : > { %v619_v17 = vmul.f32 1.442695, %v618_v15  ;;  %v1179_v15 = vld [vmem:[#allocation4 + $0x28] sm:$0xff]  ;;  %v1178_v16 = vld [vmem:[#allocation4 + $0x20] sm:$0xff] }
 0x2b1   : > { %1227 = vpow2.f32 %v619_v17  ;;  %v1177_v17 = vld [vmem:[#allocation4 + $0x18] sm:$0xff] }
 0x2b7   : > { %v1228_v19 = vpop.eup %1227 }
 0x2b8   : > { %v621_v20 = vsel %vm614_vm7, %v1228_v19, 0.0 }
 0x2b9   : > { %622 = vadd.xlane.f32.xlu1 %v621_v20 }
 0x2c0   : > { %688 = vrot.lane.b32.xlu0 %v1438_v53, %s1327_s15 }
 0x2d2   : > { %769 = vrot.lane.b32.xlu1 %v591_v45, %s1328_s16 }
 0x31f   : > { %v736_v22 = vpop.xlane.xlu0 %735 }
 0x320   : > { %v737_v34 = vsub.f32 %v733_v12, %v736_v22  ;;  %v1181_v12 = vld [vmem:[#allocation4 + $0x38] sm:$0xff]  ;;  %v1176_v22 = vld [vmem:[#allocation4 + $0x10] sm:$0xff] }
 0x321   : > { %911 = vmatpush.bf16.msrb.mxu1 %v1181_v12 }
 0x322   : > { %v738_v35 = vmul.f32 1.442695, %v737_v34 }
 0x325   : > { %912 = vmatpush.bf16.msrb.mxu1 %v1180_v13 }
 0x329   : > { %913 = vmatpush.bf16.msrb.mxu1 %v1179_v15 }
 0x32c   : > { %v623_v23 = vpop.xlane.xlu1 %622 }
 0x32d   : > { %1229 = vrcp.f32 %v623_v23  ;;  %914 = vmatpush.bf16.msrb.mxu1 %v1178_v16  ;;  %v1175_v23 = vld [vmem:[#allocation4 + $0x8] sm:$0xff] }
 0x32e   : > { %1231 = vpow2.f32 %v738_v35 }
 0x331   : > { %915 = vmatpush.bf16.msrb.mxu1 %v1177_v17 }
 0x332   : > { %v689_v24 = vpop.permute.xlu0 %688 }
 0x333   : > { %v694_v25 = vsel %vm631_vm5, %v689_v24, 0  ;;  %v1230_v26 = vpop.eup %1229  ;;  %v1174_v24 = vld [vmem:[#allocation4] sm:$0xff] }
 0x334   : > { %703 = vmatpush.bf16.msrb.mxu0 %v694_v25  ;;  %v625_v27 = vmul.f32 %v1230_v26, %v1228_v19  ;;  %v1232_v40 = vpop.eup %1231 }
 0x335   : > { %v740_v41 = vsel %vm614_vm7, %v1232_v40, 0.0  ;;  %916 = vmatpush.bf16.msrb.mxu1 %v1176_v22 }
 0x336   : > { %v626_v28 = vpack.c.bf16 %v625_v27, %v625_v27 }
 0x338   : > { %1109 = vmatmul.msk.bf16.vlgmr.msrb.gmra.mxu3 %vm614_vm7, %v626_v28 }
 0x339   : > { %917 = vmatpush.bf16.msrb.mxu1 %v1175_v23 }
 0x33d   : > { %918 = vmatpush.bf16.msrb.mxu1 %v1174_v24 }
 0x344   : > { %v770_v29 = vpop.permute.xlu1 %769 }
 0x345   : > { %v775_v30 = vsel %vm592_vm4, %v770_v29, 0 }
 0x346   : > { %784 = vmatpush.bf16.xpose.msrb.mxu3 %v775_v30 }
 0x348   : > { %1110 = vmatmul.msk.bf16.vlgmr.msra.gmra.mxu3 %vm592_vm4, %v650_v59 }
 0x358   : > { %1114 = vmatmul.msk.bf16.vlgmr.msrb.gmra.mxu3 %vm592_vm4, %v768_v31 }
 0x3bb   : > { %v1460_v32 = vpop.f32.mrf.mxu3 }
 0x3c3   : > { %v646_v33 = vpop.f32.mrf.mxu3 }
 0x3c4   : > { %v1222_v33 = vld [vmem:[%s1500_s7] ss:$0 sm:$0xff] }
 0x3cb   : > { %v669_v36 = vpop.f32.mrf.mxu3 }
 0x3cc   : > { %v673_v18 = vmul.f32 0.17677669, %v669_v36 }
 0x3ce   : > { %v674_v37 = vadd.f32 %v673_v18, %v589_v5 }
 0x3d0   : > { %v675_v38 = vsel %vm614_vm7, %v674_v37, -inf }
 0x3d1   : > { %676 = vmax.xlane.f32.xlu2 %v675_v38 }
 0x3d3   : > { %v671_v39 = vpop.f32.mrf.mxu3 }
 0x3d9   : > { %741 = vadd.xlane.f32.xlu2 %v740_v41 }
 0x3db   : > { %v786_v42 = vpop.f32.mrf.mxu3 }
 0x3dc   : > { %v790_v43 = vmul.f32 0.17677669, %v786_v42 }
 0x3de   : > { %v791_v44 = vadd.f32 %v790_v43, %v589_v5 }
 0x3e0   : > { %v792_v21 = vsel %vm614_vm7, %v791_v44, -inf }
 0x3e1   : > { %793 = vmax.xlane.f32.xlu1 %v792_v21 }
 0x3e3   : > { %v788_v45 = vpop.f32.mrf.mxu3 }
 0x444   : > { %v677_v46 = vpop.xlane.xlu2 %676 }
 0x445   : > { %v678_v47 = vsub.f32 %v674_v37, %v677_v46 }
 0x447   : > { %v679_v48 = vmul.f32 1.442695, %v678_v47 }
 0x449   : > { %1233 = vpow2.f32 %v679_v48 }
 0x44c   : > { %v742_v57 = vpop.xlane.xlu2 %741 }
 0x44f   : > { %v1234_v49 = vpop.eup %1233 }
 0x450   : > { %v681_v50 = vsel %vm614_vm7, %v1234_v49, 0.0 }
 0x451   : > { %682 = vadd.xlane.f32.xlu2 %v681_v50 }
 0x454   : > { %v794_v51 = vpop.xlane.xlu1 %793 }
 0x455   : > { %v795_v52 = vsub.f32 %v791_v44, %v794_v51 }
 0x457   : > { %v796_v54 = vmul.f32 1.442695, %v795_v52 }
 0x459   : > { %1235 = vpow2.f32 %v796_v54 }
 0x45a   : > { %1237 = vrcp.f32 %v742_v57 }
 0x45f   : > { %v1236_v55 = vpop.eup %1235 }
 0x460   : > { %v798_v56 = vsel %vm614_vm7, %v1236_v55, 0.0  ;;  %v1238_v59 = vpop.eup %1237 }
 0x461   : > { %799 = vadd.xlane.f32.xlu1 %v798_v56  ;;  %v744_v61 = vmul.f32 %v1238_v59, %v1232_v40 }
 0x463   : > { %v745_v3 = vpack.c.bf16 %v744_v61, %v744_v61 }
 0x469   : > { %746 = vrot.lane.b32.xlu2 %v1438_v53, %s1326_s14 }
 0x47a   : > { %804 = vrot.lane.b32.xlu1 %v1438_v53, %s1328_s16 }
 0x4c4   : > { %v683_v58 = vpop.xlane.xlu2 %682 }
 0x4c5   : > { %1239 = vrcp.f32 %v683_v58 }
 0x4cb   : > { %v1240_v60 = vpop.eup %1239 }
 0x4cc   : > { %v685_v62 = vmul.f32 %v1240_v60, %v1234_v49  ;;  %v747_v63 = vpop.permute.xlu2 %746 }
 0x4cd   : > { %v752_v0 = vsel %vm631_vm5, %v747_v63, 0 }
 0x4ce   : > { %761 = vmatpush.bf16.msra.mxu2 %v752_v0  ;;  %v686_v1 = vpack.c.bf16 %v685_v62, %v685_v62 }
 0x4d0   : > { %1111 = vmatmul.msk.bf16.vlgmr.msrb.gmra.mxu0 %vm614_vm7, %v686_v1 }
 0x4d1   : > { %1113 = vmatmul.msk.bf16.vlgmr.msra.gmra.mxu2 %vm614_vm7, %v745_v3 }
 0x4d4   : > { %v800_v4 = vpop.xlane.xlu1 %799 }
 0x4d5   : > { %1241 = vrcp.f32 %v800_v4 }
 0x4db   : > { %v1242_v53 = vpop.eup %1241 }
 0x4dc   : > { %v802_v5 = vmul.f32 %v1242_v53, %v1236_v55 }
 0x4de   : > { %v803_v8 = vpack.c.bf16 %v802_v5, %v802_v5 }
 0x4ec   : > { %v805_v6 = vpop.permute.xlu1 %804 }
 0x4ed   : > { %v810_v7 = vsel %vm631_vm5, %v805_v6, 0 }
 0x4ee   : > { %819 = vmatpush.bf16.msra.mxu0 %v810_v7 }
 0x4f1   : > { %1115 = vmatmul.msk.bf16.vlgmr.msra.gmra.mxu0 %vm614_vm7, %v803_v8 }
 0x54d   : > { %v705_v9 = vpop.f32.mrf.mxu0 }
 0x54e   : > { %826 = vrot.lane.b32.xlu0 %v705_v9, %s1328_s16 }
 0x554   : > { %v763_v10 = vpop.f32.mrf.mxu2 }
 0x555   : > { %v707_v11 = vpop.f32.mrf.mxu0 }
 0x556   : > { %830 = vrot.lane.b32.xlu0 %v763_v10, %s1326_s14 }
 0x55c   : > { %v765_v14 = vpop.f32.mrf.mxu2 }
 0x56e   : > { %v821_v19 = vpop.f32.mrf.mxu0 }
 0x56f   : > { %834 = vrot.lane.b32.xlu2 %v821_v19, %s1327_s15 }
 0x576   : > { %v823_v20 = vpop.f32.mrf.mxu0 }
 0x5c0   : > { %v827_v25 = vpop.permute.xlu0 %826 }
 0x5c1   : > { %v837_v26 = vsel %vm592_vm4, %v1460_v32, %v827_v25 }
 0x5c8   : > { %v831_v27 = vpop.permute.xlu0 %830 }
 0x5c9   : > { %v839_v28 = vsel %vm838_vm8, %v837_v26, %v831_v27  ;;  %v835_v29 = vpop.permute.xlu2 %834 }
 0x5ca   : > { %v841_v30 = vsel %vm840_vm9, %v839_v28, %v835_v29 }
 0x5cb   : > { %v842_v31 = vpack.c.bf16 %v841_v30, %v841_v30 }
 0x5cd   : > { %919 = vmatmul.bf16.vlgmr.msrb.gmra.mxu1 %v842_v31 }
 0x64a   : > { %v920_v34 = vpop.f32.mrf.mxu1 }
 0x64b   : > { %v921_v35 = vadd.f32 %v1222_v33, %v920_v34 }
 0x64d   : > { %v924_v36 = vadd.f32 %v921_v35, %v1413_v2 }
 0x64f   : > { %925 = vst [vmem:[%s334_s21] sm:$0xff] %v924_v36 }
 0x652   : > { %v922_v32 = vpop.f32.mrf.mxu1 }
 0x653 PF: > { %s20_s27 = sadd.s32 1, %s1317_s27  }
 0x654   : > { %p17_p7 = scmp.ge.s32.totalorder %s20_s27, 4  }
 0x656   :  { %19 = sbr.rel (!%p17_p7) target bundleno = 2 (0x2), region = 91 }
 0x65b   :  { %945 = vsyncpa [#allocation3], 1 }
 0x65c   :  { %947 = vsyncpa [#allocation3 + $0x1], 1 }
 0x65d   :  { %948 = vsyncpa [#allocation5], 1 }

// kernel: text_encoder_forward.7
= control target key start
LH: loop header
LB: loop body
LE: loop exit
PB: predicated region body
PF: predicated region fallthrough
CT: control target
= control target key end

     0   :  { %12 = vsyncpa [#allocation3], 0  ;;  %s1456_s0 = inlined_call_operand.vmem [shape: f32[2,8,128], index: 0, kind: input, shape index: {}]   ;;  %s1457_s1 = inlined_call_operand.vmem [shape: f32[1,128], index: 1, kind: input, shape index: {}]   ;;  %s1458_s2 = inlined_call_operand.vmem [shape: f32[1,128], index: 2, kind: input, shape index: {}]   ;;  %s1459_s3 = inlined_call_operand.hbm [shape: bf16[128,384], index: 3, kind: input, shape index: {}]   ;;  %s1460_s4 = inlined_call_operand.vmem [shape: f32[1,384], index: 4, kind: input, shape index: {}]   ;;  %s1461_s5 = inlined_call_operand.hbm [shape: bf16[128,128], index: 5, kind: input, shape index: {}]   ;;  %s1462_s6 = inlined_call_operand.vmem [shape: f32[1,128], index: 6, kind: input, shape index: {}]   ;;  %s1463_s7 = inlined_call_operand.vmem [shape: f32[2,8,128], index: 7, kind: output, shape index: {}]  }
   0x1   :  { %13 = vsyncpa [#allocation5], 0  ;;  %s1341_s24 = smov 0  }
   0x2 LB: > { %s219_s27 = sshll.u32 %s1459_s3, 4  ;;  %s972_s28 = sadd.s32 4294967295, %s1288_s24   ;;  %s1288_s24 = sphi %s1341_s24, %s19_s24   ;;  %s220_s27 = int_to_ptr.hbm [resolvable:$true] %s219_s27 }
   0x3   : > { %p974_p0 = scmp.ge.s32.totalorder %s1288_s24, 1  ;;  %p202_p1 = scmp.lt.s32.totalorder %s1288_s24, 3 }
   0x4   : > { %p1168_p2 = scmp.eq.s32.totalorder %s972_s28, 0  ;;  %s1290_s30 = smov [#allocation2]  }
   0x5   : > { %p1352_p3 = pnand %p974_p0, %p202_p1  ;;  %s221_s8 = sshll.u32 %s1290_s30, 4  ;;  %s222_s8 = int_to_ptr.vmem [resolvable:$true] %s221_s8 }
   0x6   : > { %s236_s11 = sshll.u32 %s1461_s5, 4  ;;  %s1291_s12 = smov [#allocation4]   ;;  %s237_s11 = int_to_ptr.hbm [resolvable:$true] %s236_s11 }
   0x7   : > { %p1161_p4 = pneg %p1352_p3  ;;  %s238_s13 = sshll.u32 %s1291_s12, 4  ;;  %s239_s13 = int_to_ptr.vmem [resolvable:$true] %s238_s13 }
   0x8   : > { %s1292_s14 = smov 192   ;;  %s1293_s15 = smov 12  }
   0x9   : > { %p1162_p5 = pnand %p1168_p2, %p1161_p4  ;;  %s1294_s16 = smov 64  }
   0xa   : > { %s1295_s17 = smov 4   ;;  %264 = sbr.rel (%p1352_p3) target bundleno = 1617 (0x651), region = 48 }
   0xb   : > { %1164 = dma.hbm_to_vmem [thread:$0]  (!%p1162_p5), %s220_s27, 3072, %s222_s8, [#allocation3], %s1292_s14, %s1292_s14, %s1293_s15  }
   0xc   : > { %1167 = dma.hbm_to_vmem [thread:$0]  (!%p1162_p5), %s237_s11, 1024, %s239_s13, [#allocation5], %s1294_s16, %s1294_s16, %s1295_s17  }
   0xf   : > { %1279 = dma.done.wait (%p1168_p2), [#allocation3], 3072  }
  0x10   : > { %1281 = vsyncadd (%p1168_p2), [#allocation3], 4294964224 }
  0x11   : > { %1283 = dma.done.wait (%p1168_p2), [#allocation5], 1024  }
  0x12   : > { %1285 = vsyncadd (%p1168_p2), [#allocation5], 4294966272  ;;  %p300_p6 = scmp.lt.s32.totalorder %s972_s28, 1  ;;  %v1296_v1 = vmov 128.0   ;;  %v1069_v2 = vld [vmem:[#allocation2 + $0xa8] sm:$0xf] }
  0x13   : > { %1194 = vrcp.f32 %v1296_v1  ;;  %v1143_v3 = vld [vmem:[#allocation2 + $0xb0] sm:$0xf0]  ;;  %v1142_v4 = vld [vmem:[#allocation2 + $0xac] sm:$0xf]  ;;  %v1071_v6 = vld [vmem:[#allocation2 + $0xb4] sm:$0xf0] }
  0x14   : > { %s1466_s28 = smov (!%p300_p6, %s972_s28), 1  ;;  %v1070_v5 = vor.u32 %v1143_v3, %v1069_v2  ;;  %v1077_v7 = vld [vmem:[#allocation2 + $0xb0] sm:$0xf]  ;;  %v1144_v8 = vld [vmem:[#allocation2 + $0xb8] sm:$0xf0]  ;;  %v1074_v9 = vor.u32 %v1142_v4, %v1071_v6  ;;  %vm563_vm4 = vcmask 261120  }
  0x15   : > { %s981_s18 = sshll.u32 %s1466_s28, 3  ;;  %v1078_v10 = vor.u32 %v1144_v8, %v1077_v7  ;;  %v1057_v21 = vld [vmem:[#allocation2 + $0x90] sm:$0xf]  ;;  %v1140_v22 = vld [vmem:[#allocation2 + $0x98] sm:$0xf0]  ;;  %s1297_s30 = smov 64  }
  0x16   : > { %s303_s21 = scalar_lea.vmem %s1456_s0, %s981_s18  ;;  %516 = vmatpush.bf16.msra.mxu0 %v1070_v5  ;;  %529 = vmatpush.bf16.msra.mxu1 %v1074_v9  ;;  %v1139_v23 = vld [vmem:[#allocation2 + $0x94] sm:$0xf]  ;;  %v1058_v24 = vor.u32 %v1140_v22, %v1057_v21  ;;  %v1059_v25 = vld [vmem:[#allocation2 + $0x9c] sm:$0xf0]  ;;  %v1065_v26 = vld [vmem:[#allocation2 + $0x98] sm:$0xf]  ;;  %s307_s14 = scalar_lea.vmem %s1463_s7, %s981_s18 }
  0x17   : > { %v1376_v0 = vld [vmem:[%s303_s21] sm:$0xff]  ;;  %542 = vmatpush.bf16.msra.mxu2 %v1078_v10  ;;  %v1062_v28 = vor.u32 %v1139_v23, %v1059_v25  ;;  %v1045_v30 = vld [vmem:[#allocation2 + $0x78] sm:$0xf]  ;;  %v1136_v32 = vld [vmem:[#allocation2 + $0x7c] sm:$0xf]  ;;  %s1298_s8 = smov 96  }
  0x18   : > { %312 = vadd.xlane.f32.xlu0 %v1376_v0  ;;  %v1141_v27 = vld [vmem:[#allocation2 + $0xa0] sm:$0xf0]  ;;  %v1047_v34 = vld [vmem:[#allocation2 + $0x84] sm:$0xf0]  ;;  %v1053_v35 = vld [vmem:[#allocation2 + $0x80] sm:$0xf] }
  0x19   : > { %v1195_v11 = vpop.eup %1194  ;;  %v1066_v29 = vor.u32 %v1141_v27, %v1065_v26  ;;  %v1137_v31 = vld [vmem:[#allocation2 + $0x80] sm:$0xf0]  ;;  %v1138_v36 = vld [vmem:[#allocation2 + $0x88] sm:$0xf0]  ;;  %v1050_v37 = vor.u32 %v1136_v32, %v1047_v34  ;;  %v1033_v39 = vld [vmem:[#allocation2 + $0x60] sm:$0xf] }
  0x1a   : > { %v315_v12 = vmul.f32 128.0, %v1195_v11  ;;  %vm319_vm0 = vweird.f32 %v1195_v11  ;;  %517 = vmatpush.bf16.msra.mxu0 %v1058_v24  ;;  %530 = vmatpush.bf16.msra.mxu1 %v1062_v28  ;;  %v1046_v33 = vor.u32 %v1137_v31, %v1045_v30  ;;  %v1054_v38 = vor.u32 %v1138_v36, %v1053_v35  ;;  %v1134_v40 = vld [vmem:[#allocation2 + $0x68] sm:$0xf0]  ;;  %v1133_v41 = vld [vmem:[#allocation2 + $0x64] sm:$0xf]  ;;  %s1299_s9 = smov 32  }
  0x1b   : > { %543 = vmatpush.bf16.msra.mxu2 %v1066_v29  ;;  %v1034_v42 = vor.u32 %v1134_v40, %v1033_v39  ;;  %v1035_v43 = vld [vmem:[#allocation2 + $0x6c] sm:$0xf0]  ;;  %v1041_v44 = vld [vmem:[#allocation2 + $0x68] sm:$0xf]  ;;  %v1135_v45 = vld [vmem:[#allocation2 + $0x70] sm:$0xf0] }
  0x1c   : > { %v316_v13 = vsub.f32 1.0, %v315_v12  ;;  %v1038_v46 = vor.u32 %v1133_v41, %v1035_v43  ;;  %v1042_v47 = vor.u32 %v1135_v45, %v1041_v44  ;;  %v1021_v48 = vld [vmem:[#allocation2 + $0x48] sm:$0xf]  ;;  %v1131_v49 = vld [vmem:[#allocation2 + $0x50] sm:$0xf0]  ;;  %vm602_vm5 = vcmask 1043456  }
  0x1d   : > { %v1130_v50 = vld [vmem:[#allocation2 + $0x4c] sm:$0xf]  ;;  %v1022_v51 = vor.u32 %v1131_v49, %v1021_v48  ;;  %v1023_v52 = vld [vmem:[#allocation2 + $0x54] sm:$0xf0]  ;;  %v1029_v53 = vld [vmem:[#allocation2 + $0x50] sm:$0xf] }
  0x1e   : > { %v317_v14 = vmul.f32 %v1195_v11, %v316_v13  ;;  %518 = vmatpush.bf16.msra.mxu0 %v1046_v33  ;;  %531 = vmatpush.bf16.msra.mxu1 %v1050_v37  ;;  %v1132_v54 = vld [vmem:[#allocation2 + $0x58] sm:$0xf0]  ;;  %v1026_v55 = vor.u32 %v1130_v50, %v1023_v52  ;;  %v1009_v57 = vld [vmem:[#allocation2 + $0x30] sm:$0xf]  ;;  %v1127_v59 = vld [vmem:[#allocation2 + $0x34] sm:$0xf] }
  0x1f   : > { %544 = vmatpush.bf16.msra.mxu2 %v1054_v38  ;;  %v1030_v56 = vor.u32 %v1132_v54, %v1029_v53  ;;  %v1128_v58 = vld [vmem:[#allocation2 + $0x38] sm:$0xf0]  ;;  %v1011_v61 = vld [vmem:[#allocation2 + $0x3c] sm:$0xf0]  ;;  %v1017_v62 = vld [vmem:[#allocation2 + $0x38] sm:$0xf] }
  0x20   : > { %v318_v15 = vadd.f32 %v1195_v11, %v317_v14  ;;  %v1010_v60 = vor.u32 %v1128_v58, %v1009_v57  ;;  %v1129_v63 = vld [vmem:[#allocation2 + $0x40] sm:$0xf0]  ;;  %v1014_v1 = vor.u32 %v1127_v59, %v1011_v61  ;;  %v997_v3 = vld [vmem:[#allocation2 + $0x18] sm:$0xf]  ;;  %v1124_v5 = vld [vmem:[#allocation2 + $0x1c] sm:$0xf]  ;;  %v555_v61 = vlaneseq }
  0x21   : > { %v1018_v2 = vor.u32 %v1129_v63, %v1017_v62  ;;  %v1125_v4 = vld [vmem:[#allocation2 + $0x20] sm:$0xf0]  ;;  %v999_v7 = vld [vmem:[#allocation2 + $0x24] sm:$0xf0]  ;;  %v1005_v8 = vld [vmem:[#allocation2 + $0x20] sm:$0xf] }
  0x22   : > { %v1379_v16 = vsel %vm319_vm0, %v1195_v11, %v318_v15  ;;  %519 = vmatpush.bf16.msra.mxu0 %v1034_v42  ;;  %532 = vmatpush.bf16.msra.mxu1 %v1038_v46  ;;  %v998_v6 = vor.u32 %v1125_v4, %v997_v3  ;;  %v1126_v9 = vld [vmem:[#allocation2 + $0x28] sm:$0xf0]  ;;  %v1002_v10 = vor.u32 %v1124_v5, %v999_v7  ;;  %v985_v12 = vld [vmem:[#allocation2] sm:$0xf]  ;;  %v1121_v14 = vld [vmem:[#allocation2 + $0x4] sm:$0xf] }
  0x23   : > { %545 = vmatpush.bf16.msra.mxu2 %v1042_v47  ;;  %v1006_v11 = vor.u32 %v1126_v9, %v1005_v8  ;;  %v1122_v13 = vld [vmem:[#allocation2 + $0x8] sm:$0xf0]  ;;  %v1191_v32 = vld [vmem:[%s1457_s1] ss:$0 sm:$0xff]  ;;  %v556_v62 = vshrl.u32 %v555_v61, 7  ;;  %v558_v63 = vand.u32 127, %v555_v61 }
  0x24   : > { %v986_v15 = vor.u32 %v1122_v13, %v985_v12  ;;  %v380_v38 = vld [vmem:[%s1460_s4] sm:$0x7]  ;;  %vm585_vm7 = vcmask 64512   ;;  %vm809_vm8 = vcmask 523264   ;;  %vm811_vm9 = vcmask 785408  }
  0x25   : > { %v383_v39 = vperm.slane %v380_v38, 1  ;;  %v384_v44 = vperm.slane %v380_v38, 2  ;;  %vm559_vm6 = vcmp.gt.s32.totalorder %v558_v63, %v556_v62 }
  0x26   : > { %520 = vmatpush.bf16.msra.mxu0 %v1022_v51  ;;  %533 = vmatpush.bf16.msra.mxu1 %v1026_v55 }
  0x27   : > { %546 = vmatpush.bf16.msra.mxu2 %v1030_v56 }
  0x2a   : > { %521 = vmatpush.bf16.msra.mxu0 %v1010_v60  ;;  %534 = vmatpush.bf16.msra.mxu1 %v1014_v1 }
  0x2b   : > { %547 = vmatpush.bf16.msra.mxu2 %v1018_v2  ;;  %v1300_v2 = vmov 0.0  }
  0x2c   : > { %v560_v3 = vsel %vm559_vm6, -1e+09, %v1300_v2 }
  0x2e   : > { %522 = vmatpush.bf16.msra.mxu0 %v998_v6  ;;  %535 = vmatpush.bf16.msra.mxu1 %v1002_v10 }
  0x2f   : > { %548 = vmatpush.bf16.msra.mxu2 %v1006_v11 }
  0x32   : > { %523 = vmatpush.bf16.msra.mxu0 %v986_v15 }
  0x8b   : > { %v313_v17 = vpop.xlane.xlu0 %312 }
  0x8c   : > { %v321_v18 = vmul.f32 %v1379_v16, %v313_v17  ;;  %v987_v17 = vld [vmem:[#allocation2 + $0xc] sm:$0xf0] }
  0x8d   : > { %v990_v21 = vor.u32 %v1121_v14, %v987_v17 }
  0x8e   : > { %v1383_v19 = vsub.f32 %v1376_v0, %v321_v18  ;;  %v993_v18 = vld [vmem:[#allocation2 + $0x8] sm:$0xf] }
  0x8f   : > { %536 = vmatpush.bf16.msra.mxu1 %v990_v21 }
  0x90   : > { %v323_v20 = vmul.f32 %v1383_v19, %v1383_v19 }
  0x92   : > { %324 = vadd.xlane.f32.xlu0 %v323_v20  ;;  %v1123_v20 = vld [vmem:[#allocation2 + $0x10] sm:$0xf0] }
  0x93   : > { %v994_v22 = vor.u32 %v1123_v20, %v993_v18 }
  0x95   : > { %549 = vmatpush.bf16.msra.mxu2 %v994_v22 }
 0x105   : > { %v325_v23 = vpop.xlane.xlu0 %324 }
 0x106   : > { %v326_v24 = vmul.f32 %v325_v23, %v1379_v16  ;;  %v1192_v16 = vld [vmem:[%s1458_s2] ss:$0 sm:$0xff] }
 0x108   : > { %v327_v25 = vadd.f32 1e-05, %v326_v24 }
 0x10a   : > { %1196 = vrsqrt.f32 %v327_v25  ;;  %vm334_vm2 = vweird.f32 %v327_v25 }
 0x110   : > { %v1197_v26 = vpop.eup %1196 }
 0x111   : > { %v329_v27 = vmul.f32 %v1197_v26, %v327_v25  ;;  %vm335_vm1 = vweird.f32 %v1197_v26 }
 0x112   : > { %vm336_vm3 = vmor %vm334_vm2, %vm335_vm1 }
 0x113   : > { %v330_v28 = vmul.f32 %v1197_v26, %v329_v27 }
 0x115   : > { %v331_v29 = vmul.f32 0.5, %v330_v28 }
 0x117   : > { %v332_v30 = vsub.f32 1.5, %v331_v29 }
 0x119   : > { %v333_v31 = vmul.f32 %v1197_v26, %v332_v30 }
 0x11b   : > { %v337_v33 = vsel %vm336_vm3, %v1197_v26, %v333_v31 }
 0x11c   : > { %v338_v34 = vmul.f32 %v337_v33, %v1383_v19  ;;  %v382_v19 = vperm.slane %v380_v38, 0 }
 0x11e   : > { %v342_v35 = vmul.f32 %v1191_v32, %v338_v34 }
 0x120   : > { %v346_v36 = vadd.f32 %v1192_v16, %v342_v35 }
 0x122   : > { %v347_v37 = vpack.c.bf16 %v346_v36, %v346_v36 }
 0x124   : > { %524 = vmatmul.bf16.vlgmr.msra.gmra.mxu0 %v347_v37  ;;  %537 = vmatmul.bf16.vlgmr.msra.gmra.mxu1 %v347_v37 }
 0x125   : > { %550 = vmatmul.bf16.vlgmr.msra.gmra.mxu2 %v347_v37 }
 0x1a1   : > { %v525_v40 = vpop.f32.mrf.mxu0  ;;  %v538_v41 = vpop.f32.mrf.mxu1 }
 0x1a2   : > { %v539_v42 = vadd.f32 %v538_v41, %v383_v39  ;;  %v526_v46 = vadd.f32 %v525_v40, %v382_v19 }
 0x1a4   : > { %v562_v43 = vpack.c.bf16 %v539_v42, %v539_v42  ;;  %v561_v52 = vpack.c.bf16 %v526_v46, %v526_v46 }
 0x1a6   : > { %682 = vrot.lane.b32.xlu0 %v562_v43, %s1297_s30  ;;  %623 = vrot.lane.b32.xlu2 %v562_v43, %s1298_s8  ;;  %v568_v45 = vsel %vm563_vm4, %v562_v43, 0 }
 0x1a7   : > { %577 = vmatpush.bf16.xpose.msra.mxu3 %v568_v45 }
 0x1a8   : > { %v551_v47 = vpop.f32.mrf.mxu2 }
 0x1a9   : > { %v552_v48 = vadd.f32 %v551_v47, %v384_v44  ;;  %v527_v49 = vpop.f32.mrf.mxu0  ;;  %v540_v50 = vpop.f32.mrf.mxu1 }
 0x1ab   : > { %v1401_v51 = vpack.c.bf16 %v552_v48, %v552_v48 }
 0x1ad   : > { %v604_v53 = vsel %vm602_vm5, %v1401_v51, 0 }
 0x1ae   : > { %620 = vrot.lane.b32.xlu2 %v561_v52, %s1298_s8  ;;  %1079 = vmatmul.msk.bf16.vlgmr.msra.gmra.mxu3 %vm563_vm4, %v561_v52 }
 0x1af   : > { %613 = vmatpush.bf16.msrb.mxu3 %v604_v53 }
 0x1b0   : > { %v553_v54 = vpop.f32.mrf.mxu2 }
 0x1b6   : > { %680 = vrot.lane.b32.xlu2 %v561_v52, %s1297_s30 }
 0x1be   : > { %738 = vrot.lane.b32.xlu2 %v561_v52, %s1299_s9 }
 0x200   : > { %v624_v55 = vpop.permute.xlu2 %623 }
 0x201   : > { %v629_v56 = vsel %vm563_vm4, %v624_v55, 0 }
 0x202   : > { %638 = vmatpush.bf16.xpose.msra.mxu3 %v629_v56 }
 0x208   : > { %v621_v57 = vpop.permute.xlu2 %620 }
 0x210   : > { %v681_v60 = vpop.permute.xlu2 %680 }
 0x218   : > { %v683_v58 = vpop.permute.xlu0 %682  ;;  %v739_v29 = vpop.permute.xlu2 %738 }
 0x219   : > { %v688_v59 = vsel %vm563_vm4, %v683_v58, 0 }
 0x21a   : > { %697 = vmatpush.bf16.xpose.msrb.mxu2 %v688_v59 }
 0x221   : > { %1083 = vmatmul.msk.bf16.vlgmr.msrb.gmra.mxu2 %vm563_vm4, %v681_v60 }
 0x231   : > { %v579_v1 = vpop.f32.mrf.mxu3 }
 0x232   : > { %v583_v4 = vmul.f32 0.17677669, %v579_v1 }
 0x234   : > { %v584_v5 = vadd.f32 %v583_v4, %v560_v3 }
 0x236   : > { %v586_v6 = vsel %vm585_vm7, %v584_v5, -inf }
 0x237   : > { %587 = vmax.xlane.f32.xlu1 %v586_v6 }
 0x239   : > { %v581_v7 = vpop.f32.mrf.mxu3 }
 0x2a4   : > { %v699_v8 = vpop.f32.mrf.mxu2 }
 0x2a5   : > { %v703_v9 = vmul.f32 0.17677669, %v699_v8 }
 0x2a7   : > { %v704_v10 = vadd.f32 %v703_v9, %v560_v3 }
 0x2a9   : > { %v705_v11 = vsel %vm585_vm7, %v704_v10, -inf }
 0x2aa   : > { %706 = vmax.xlane.f32.xlu0 %v705_v11  ;;  %v588_v12 = vpop.xlane.xlu1 %587  ;;  %v1151_v11 = vld [vmem:[#allocation4 + $0x30] sm:$0xff] }
 0x2ab   : > { %v589_v13 = vsub.f32 %v584_v5, %v588_v12 }
 0x2ac   : > { %v701_v14 = vpop.f32.mrf.mxu2 }
 0x2ad   : > { %v590_v15 = vmul.f32 1.442695, %v589_v13  ;;  %v1150_v13 = vld [vmem:[#allocation4 + $0x28] sm:$0xff]  ;;  %v1149_v14 = vld [vmem:[#allocation4 + $0x20] sm:$0xff] }
 0x2af   : > { %1198 = vpow2.f32 %v590_v15  ;;  %v1148_v15 = vld [vmem:[#allocation4 + $0x18] sm:$0xff] }
 0x2b5   : > { %v1199_v17 = vpop.eup %1198 }
 0x2b6   : > { %v592_v18 = vsel %vm585_vm7, %v1199_v17, 0.0 }
 0x2b7   : > { %593 = vadd.xlane.f32.xlu1 %v592_v18 }
 0x2be   : > { %659 = vrot.lane.b32.xlu0 %v1401_v51, %s1298_s8 }
 0x2d0   : > { %740 = vrot.lane.b32.xlu1 %v562_v43, %s1299_s9 }
 0x31d   : > { %v707_v20 = vpop.xlane.xlu0 %706 }
 0x31e   : > { %v708_v32 = vsub.f32 %v704_v10, %v707_v20  ;;  %v1152_v10 = vld [vmem:[#allocation4 + $0x38] sm:$0xff]  ;;  %v1147_v20 = vld [vmem:[#allocation4 + $0x10] sm:$0xff] }
 0x31f   : > { %882 = vmatpush.bf16.msrb.mxu1 %v1152_v10 }
 0x320   : > { %v709_v33 = vmul.f32 1.442695, %v708_v32 }
 0x323   : > { %883 = vmatpush.bf16.msrb.mxu1 %v1151_v11 }
 0x327   : > { %884 = vmatpush.bf16.msrb.mxu1 %v1150_v13 }
 0x32a   : > { %v594_v21 = vpop.xlane.xlu1 %593 }
 0x32b   : > { %1200 = vrcp.f32 %v594_v21  ;;  %885 = vmatpush.bf16.msrb.mxu1 %v1149_v14  ;;  %v1146_v21 = vld [vmem:[#allocation4 + $0x8] sm:$0xff] }
 0x32c   : > { %1202 = vpow2.f32 %v709_v33 }
 0x32f   : > { %886 = vmatpush.bf16.msrb.mxu1 %v1148_v15 }
 0x330   : > { %v660_v22 = vpop.permute.xlu0 %659 }
 0x331   : > { %v665_v23 = vsel %vm602_vm5, %v660_v22, 0  ;;  %v1201_v24 = vpop.eup %1200  ;;  %v1145_v22 = vld [vmem:[#allocation4] sm:$0xff] }
 0x332   : > { %674 = vmatpush.bf16.msrb.mxu0 %v665_v23  ;;  %v596_v25 = vmul.f32 %v1201_v24, %v1199_v17  ;;  %v1203_v38 = vpop.eup %1202 }
 0x333   : > { %v711_v39 = vsel %vm585_vm7, %v1203_v38, 0.0  ;;  %887 = vmatpush.bf16.msrb.mxu1 %v1147_v20 }
 0x334   : > { %v597_v26 = vpack.c.bf16 %v596_v25, %v596_v25 }
 0x336   : > { %1080 = vmatmul.msk.bf16.vlgmr.msrb.gmra.mxu3 %vm585_vm7, %v597_v26 }
 0x337   : > { %888 = vmatpush.bf16.msrb.mxu1 %v1146_v21 }
 0x33b   : > { %889 = vmatpush.bf16.msrb.mxu1 %v1145_v22 }
 0x342   : > { %v741_v27 = vpop.permute.xlu1 %740 }
 0x343   : > { %v746_v28 = vsel %vm563_vm4, %v741_v27, 0 }
 0x344   : > { %755 = vmatpush.bf16.xpose.msrb.mxu3 %v746_v28 }
 0x346   : > { %1081 = vmatmul.msk.bf16.vlgmr.msra.gmra.mxu3 %vm563_vm4, %v621_v57 }
 0x356   : > { %1085 = vmatmul.msk.bf16.vlgmr.msrb.gmra.mxu3 %vm563_vm4, %v739_v29 }
 0x3b9   : > { %v1423_v30 = vpop.f32.mrf.mxu3 }
 0x3c1   : > { %v617_v31 = vpop.f32.mrf.mxu3 }
 0x3c2   : > { %v1193_v31 = vld [vmem:[%s1462_s6] ss:$0 sm:$0xff] }
 0x3c9   : > { %v640_v34 = vpop.f32.mrf.mxu3 }
 0x3ca   : > { %v644_v16 = vmul.f32 0.17677669, %v640_v34 }
 0x3cc   : > { %v645_v35 = vadd.f32 %v644_v16, %v560_v3 }
 0x3ce   : > { %v646_v36 = vsel %vm585_vm7, %v645_v35, -inf }
 0x3cf   : > { %647 = vmax.xlane.f32.xlu2 %v646_v36 }
 0x3d1   : > { %v642_v37 = vpop.f32.mrf.mxu3 }
 0x3d7   : > { %712 = vadd.xlane.f32.xlu2 %v711_v39 }
 0x3d9   : > { %v757_v40 = vpop.f32.mrf.mxu3 }
 0x3da   : > { %v761_v41 = vmul.f32 0.17677669, %v757_v40 }
 0x3dc   : > { %v762_v42 = vadd.f32 %v761_v41, %v560_v3 }
 0x3de   : > { %v763_v19 = vsel %vm585_vm7, %v762_v42, -inf }
 0x3df   : > { %764 = vmax.xlane.f32.xlu1 %v763_v19 }
 0x3e1   : > { %v759_v43 = vpop.f32.mrf.mxu3 }
 0x442   : > { %v648_v44 = vpop.xlane.xlu2 %647 }
 0x443   : > { %v649_v45 = vsub.f32 %v645_v35, %v648_v44 }
 0x445   : > { %v650_v46 = vmul.f32 1.442695, %v649_v45 }
 0x447   : > { %1204 = vpow2.f32 %v650_v46 }
 0x44a   : > { %v713_v55 = vpop.xlane.xlu2 %712 }
 0x44d   : > { %v1205_v47 = vpop.eup %1204 }
 0x44e   : > { %v652_v48 = vsel %vm585_vm7, %v1205_v47, 0.0 }
 0x44f   : > { %653 = vadd.xlane.f32.xlu2 %v652_v48 }
 0x452   : > { %v765_v49 = vpop.xlane.xlu1 %764 }
 0x453   : > { %v766_v50 = vsub.f32 %v762_v42, %v765_v49 }
 0x455   : > { %v767_v52 = vmul.f32 1.442695, %v766_v50 }
 0x457   : > { %1206 = vpow2.f32 %v767_v52 }
 0x458   : > { %1208 = vrcp.f32 %v713_v55 }
 0x45d   : > { %v1207_v53 = vpop.eup %1206 }
 0x45e   : > { %v769_v54 = vsel %vm585_vm7, %v1207_v53, 0.0  ;;  %v1209_v57 = vpop.eup %1208 }
 0x45f   : > { %770 = vadd.xlane.f32.xlu1 %v769_v54  ;;  %v715_v59 = vmul.f32 %v1209_v57, %v1203_v38 }
 0x461   : > { %v716_v1 = vpack.c.bf16 %v715_v59, %v715_v59 }
 0x467   : > { %717 = vrot.lane.b32.xlu2 %v1401_v51, %s1297_s30 }
 0x478   : > { %775 = vrot.lane.b32.xlu1 %v1401_v51, %s1299_s9 }
 0x4c2   : > { %v654_v56 = vpop.xlane.xlu2 %653 }
 0x4c3   : > { %1210 = vrcp.f32 %v654_v56 }
 0x4c9   : > { %v1211_v58 = vpop.eup %1210 }
 0x4ca   : > { %v656_v60 = vmul.f32 %v1211_v58, %v1205_v47  ;;  %v718_v61 = vpop.permute.xlu2 %717 }
 0x4cb   : > { %v723_v62 = vsel %vm602_vm5, %v718_v61, 0 }
 0x4cc   : > { %732 = vmatpush.bf16.msra.mxu2 %v723_v62  ;;  %v657_v63 = vpack.c.bf16 %v656_v60, %v656_v60 }
 0x4ce   : > { %1082 = vmatmul.msk.bf16.vlgmr.msrb.gmra.mxu0 %vm585_vm7, %v657_v63 }
 0x4cf   : > { %1084 = vmatmul.msk.bf16.vlgmr.msra.gmra.mxu2 %vm585_vm7, %v716_v1 }
 0x4d2   : > { %v771_v2 = vpop.xlane.xlu1 %770 }
 0x4d3   : > { %1212 = vrcp.f32 %v771_v2 }
 0x4d9   : > { %v1213_v51 = vpop.eup %1212 }
 0x4da   : > { %v773_v3 = vmul.f32 %v1213_v51, %v1207_v53 }
 0x4dc   : > { %v774_v6 = vpack.c.bf16 %v773_v3, %v773_v3 }
 0x4ea   : > { %v776_v4 = vpop.permute.xlu1 %775 }
 0x4eb   : > { %v781_v5 = vsel %vm602_vm5, %v776_v4, 0 }
 0x4ec   : > { %790 = vmatpush.bf16.msra.mxu0 %v781_v5 }
 0x4ef   : > { %1086 = vmatmul.msk.bf16.vlgmr.msra.gmra.mxu0 %vm585_vm7, %v774_v6 }
 0x54b   : > { %v676_v7 = vpop.f32.mrf.mxu0 }
 0x54c   : > { %797 = vrot.lane.b32.xlu0 %v676_v7, %s1299_s9 }
 0x552   : > { %v734_v8 = vpop.f32.mrf.mxu2 }
 0x553   : > { %v678_v9 = vpop.f32.mrf.mxu0 }
 0x554   : > { %801 = vrot.lane.b32.xlu0 %v734_v8, %s1297_s30 }
 0x55a   : > { %v736_v12 = vpop.f32.mrf.mxu2 }
 0x56c   : > { %v792_v17 = vpop.f32.mrf.mxu0 }
 0x56d   : > { %805 = vrot.lane.b32.xlu2 %v792_v17, %s1298_s8 }
 0x574   : > { %v794_v18 = vpop.f32.mrf.mxu0 }
 0x5be   : > { %v798_v23 = vpop.permute.xlu0 %797 }
 0x5bf   : > { %v808_v24 = vsel %vm563_vm4, %v1423_v30, %v798_v23 }
 0x5c6   : > { %v802_v25 = vpop.permute.xlu0 %801 }
 0x5c7   : > { %v810_v26 = vsel %vm809_vm8, %v808_v24, %v802_v25  ;;  %v806_v27 = vpop.permute.xlu2 %805 }
 0x5c8   : > { %v812_v28 = vsel %vm811_vm9, %v810_v26, %v806_v27 }
 0x5c9   : > { %v813_v29 = vpack.c.bf16 %v812_v28, %v812_v28 }
 0x5cb   : > { %890 = vmatmul.bf16.vlgmr.msrb.gmra.mxu1 %v813_v29 }
 0x648   : > { %v891_v32 = vpop.f32.mrf.mxu1 }
 0x649   : > { %v892_v33 = vadd.f32 %v1193_v31, %v891_v32 }
 0x64b   : > { %v895_v34 = vadd.f32 %v892_v33, %v1376_v0 }
 0x64d   : > { %896 = vst [vmem:[%s307_s14] sm:$0xff] %v895_v34 }
 0x650   : > { %v893_v30 = vpop.f32.mrf.mxu1 }
 0x651 PF: > { %s19_s24 = sadd.s32 1, %s1288_s24  }
 0x652   : > { %p16_p7 = scmp.ge.s32.totalorder %s19_s24, 4  }
 0x654   :  { %18 = sbr.rel (!%p16_p7) target bundleno = 2 (0x2), region = 87 }
 0x659   :  { %916 = vsyncpa [#allocation3], 1 }
 0x65a   :  { %918 = vsyncpa [#allocation3 + $0x1], 1 }
 0x65b   :  { %919 = vsyncpa [#allocation5], 1 }

// kernel: text_encoder_forward.6
= control target key start
LH: loop header
LB: loop body
LE: loop exit
PB: predicated region body
PF: predicated region fallthrough
CT: control target
= control target key end

     0   :  { %12 = vsyncpa [#allocation3], 0  ;;  %s1704_s0 = inlined_call_operand.vmem [shape: f32[16,128], index: 0, kind: input, shape index: {}]   ;;  %s1705_s1 = inlined_call_operand.hbm [shape: f32[1,128], index: 1, kind: input, shape index: {}]   ;;  %s1706_s2 = inlined_call_operand.hbm [shape: f32[1,128], index: 2, kind: input, shape index: {}]   ;;  %s1707_s3 = inlined_call_operand.hbm [shape: bf16[128,512], index: 3, kind: input, shape index: {}]   ;;  %s1708_s4 = inlined_call_operand.vmem [shape: f32[1,512], index: 4, kind: input, shape index: {}]   ;;  %s1709_s5 = inlined_call_operand.hbm [shape: bf16[512,128], index: 5, kind: input, shape index: {}]   ;;  %s1710_s6 = inlined_call_operand.hbm [shape: f32[1,128], index: 6, kind: input, shape index: {}]   ;;  %s1711_s7 = inlined_call_operand.vmem [shape: f32[16,128], index: 7, kind: output, shape index: {}]  }
   0x1   :  { %13 = vsyncpa [#allocation5], 0  ;;  %s33_s26 = sshll.u32 %s1706_s2, 4  ;;  %s34_s26 = int_to_ptr.hbm [resolvable:$true] %s33_s26 }
   0x2   :  { %14 = vsyncpa [#allocation8], 0  ;;  %s1422_s27 = smov [#allocation4]   ;;  %s58_s8 = sshll.u32 %s1709_s5, 4  ;;  %s59_s8 = int_to_ptr.hbm [resolvable:$true] %s58_s8 }
   0x3   :  { %s35_s28 = sshll.u32 %s1422_s27, 4  ;;  %s1423_s9 = smov [#allocation7]   ;;  %s36_s28 = int_to_ptr.vmem [resolvable:$true] %s35_s28 }
   0x4   :  { %38 = dma.hbm_to_vmem [thread:$0]  %s34_s26, 16, %s36_s28, [#allocation5]  }
   0x5   :  { %s60_s10 = sshll.u32 %s1423_s9, 4  ;;  %s1424_s11 = smov 64   ;;  %s61_s10 = int_to_ptr.vmem [resolvable:$true] %s60_s10 }
   0x6   :  { %s1425_s12 = smov 4   ;;  %s22_s2 = sshll.u32 %s1705_s1, 4  ;;  %s23_s2 = int_to_ptr.hbm [resolvable:$true] %s22_s2 }
   0x7   :  { %66 = dma.hbm_to_vmem [thread:$0]  %s59_s8, 4096, %s61_s10, [#allocation8], %s1424_s11, %s1424_s11, %s1425_s12  }
   0x8   :  { %s1426_s15 = smov [#allocation2]   ;;  %s43_s5 = sshll.u32 %s1707_s3, 4  ;;  %s44_s5 = int_to_ptr.hbm [resolvable:$true] %s43_s5 }
   0x9   :  { %s24_s16 = sshll.u32 %s1426_s15, 4  ;;  %s1427_s19 = smov [#allocation6]   ;;  %s25_s16 = int_to_ptr.vmem [resolvable:$true] %s24_s16 }
   0xa   :  { %27 = dma.hbm_to_vmem [thread:$0]  %s23_s2, 16, %s25_s16, [#allocation3]  }
   0xb   :  { %s45_s20 = sshll.u32 %s1427_s19, 4  ;;  %s1428_s21 = smov 256   ;;  %s46_s20 = int_to_ptr.vmem [resolvable:$true] %s45_s20 }
   0xc   :  { %s1429_s22 = smov 16   ;;  %s72_s1 = sshll.u32 %s1710_s6, 4  ;;  %s73_s1 = int_to_ptr.hbm [resolvable:$true] %s72_s1 }
   0xd   :  { %51 = dma.hbm_to_vmem [thread:$0]  %s44_s5, 4096, %s46_s20, [#allocation5], %s1428_s21, %s1428_s21, %s1429_s22  }
   0xe   :  { %s1430_s25 = smov [#allocation9]  }
   0xf   :  { %s74_s26 = sshll.u32 %s1430_s25, 4  ;;  %s75_s26 = int_to_ptr.vmem [resolvable:$true] %s74_s26 }
  0x10   :  { %77 = dma.hbm_to_vmem [thread:$0]  %s73_s1, 16, %s75_s26, [#allocation8]  }
  0x11   :  { %1416 = dma.done.wait [#allocation3], 16  }
  0x12   :  { %1417 = vsyncadd [#allocation3], 4294967280 }
  0x13   :  { %1418 = dma.done.wait [#allocation5], 4112  }
  0x14   :  { %1419 = vsyncadd [#allocation5], 4294963184 }
  0x15   :  { %1420 = dma.done.wait [#allocation8], 4112  }
  0x16   :  { %1421 = vsyncadd [#allocation8], 4294963184  ;;  %v1490_v0 = vld [vmem:[%s1704_s0] sm:$0xff]  ;;  %v1496_v1 = vld [vmem:[%s1704_s0 + $0x8] sm:$0xff]  ;;  %v1431_v2 = vmov 128.0  }
  0x17   :  { %102 = vadd.xlane.f32.xlu0 %v1490_v0  ;;  %1258 = vrcp.f32 %v1431_v2  ;;  %v1031_v17 = vld [vmem:[#allocation6 + $0xe0] sm:$0xf]  ;;  %v1211_v18 = vld [vmem:[#allocation6 + $0xec] sm:$0xf0]  ;;  %v1209_v19 = vld [vmem:[#allocation6 + $0xe4] sm:$0xf] }
  0x18   :  { %v1032_v20 = vor.u32 %v1211_v18, %v1031_v17  ;;  %v1033_v21 = vld [vmem:[#allocation6 + $0xf0] sm:$0xf0]  ;;  %v1039_v22 = vld [vmem:[#allocation6 + $0xe8] sm:$0xf]  ;;  %v1212_v23 = vld [vmem:[#allocation6 + $0xf4] sm:$0xf0] }
  0x19   :  { %v1036_v24 = vor.u32 %v1209_v19, %v1033_v21  ;;  %v1040_v25 = vor.u32 %v1212_v23, %v1039_v22  ;;  %v1210_v26 = vld [vmem:[#allocation6 + $0xec] sm:$0xf]  ;;  %v1041_v27 = vld [vmem:[#allocation6 + $0xf8] sm:$0xf0]  ;;  %v1015_v29 = vld [vmem:[#allocation6 + $0xc0] sm:$0xf] }
  0x1a   :  { %362 = vmatpush.bf16.msra.mxu0 %v1032_v20  ;;  %v1044_v28 = vor.u32 %v1210_v26, %v1041_v27  ;;  %v1207_v30 = vld [vmem:[#allocation6 + $0xcc] sm:$0xf0]  ;;  %v1205_v31 = vld [vmem:[#allocation6 + $0xc4] sm:$0xf]  ;;  %v1017_v33 = vld [vmem:[#allocation6 + $0xd0] sm:$0xf0] }
  0x1b   :  { %376 = vmatpush.bf16.msra.mxu1 %v1036_v24  ;;  %390 = vmatpush.bf16.msra.mxu2 %v1040_v25  ;;  %v1016_v32 = vor.u32 %v1207_v30, %v1015_v29  ;;  %v1023_v34 = vld [vmem:[#allocation6 + $0xc8] sm:$0xf]  ;;  %v1208_v35 = vld [vmem:[#allocation6 + $0xd4] sm:$0xf0]  ;;  %v1020_v36 = vor.u32 %v1205_v31, %v1017_v33  ;;  %v1206_v38 = vld [vmem:[#allocation6 + $0xcc] sm:$0xf] }
  0x1c   :  { %404 = vmatpush.bf16.msra.mxu3 %v1044_v28  ;;  %v1024_v37 = vor.u32 %v1208_v35, %v1023_v34  ;;  %v1025_v39 = vld [vmem:[#allocation6 + $0xd8] sm:$0xf0]  ;;  %v999_v41 = vld [vmem:[#allocation6 + $0xa0] sm:$0xf]  ;;  %v1203_v42 = vld [vmem:[#allocation6 + $0xac] sm:$0xf0] }
  0x1d   :  { %v1259_v3 = vpop.eup %1258  ;;  %v1028_v40 = vor.u32 %v1206_v38, %v1025_v39  ;;  %v1201_v43 = vld [vmem:[#allocation6 + $0xa4] sm:$0xf]  ;;  %v1000_v44 = vor.u32 %v1203_v42, %v999_v41  ;;  %v1001_v45 = vld [vmem:[#allocation6 + $0xb0] sm:$0xf0]  ;;  %v1007_v46 = vld [vmem:[#allocation6 + $0xa8] sm:$0xf] }
  0x1e   :  { %v107_v4 = vmul.f32 128.0, %v1259_v3  ;;  %vm111_vm0 = vweird.f32 %v1259_v3  ;;  %363 = vmatpush.bf16.msra.mxu0 %v1016_v32  ;;  %v1204_v47 = vld [vmem:[#allocation6 + $0xb4] sm:$0xf0]  ;;  %v1004_v48 = vor.u32 %v1201_v43, %v1001_v45  ;;  %v1202_v50 = vld [vmem:[#allocation6 + $0xac] sm:$0xf] }
  0x1f   :  { %104 = vadd.xlane.f32.xlu0 %v1496_v1  ;;  %377 = vmatpush.bf16.msra.mxu1 %v1020_v36  ;;  %v1008_v49 = vor.u32 %v1204_v47, %v1007_v46  ;;  %v1009_v51 = vld [vmem:[#allocation6 + $0xb8] sm:$0xf0]  ;;  %v983_v53 = vld [vmem:[#allocation6 + $0x80] sm:$0xf]  ;;  %v1199_v54 = vld [vmem:[#allocation6 + $0x8c] sm:$0xf0] }
  0x20   :  { %v108_v5 = vsub.f32 1.0, %v107_v4  ;;  %391 = vmatpush.bf16.msra.mxu2 %v1024_v37  ;;  %405 = vmatpush.bf16.msra.mxu3 %v1028_v40  ;;  %v1012_v52 = vor.u32 %v1202_v50, %v1009_v51  ;;  %v1197_v55 = vld [vmem:[#allocation6 + $0x84] sm:$0xf]  ;;  %v984_v56 = vor.u32 %v1199_v54, %v983_v53  ;;  %v985_v57 = vld [vmem:[#allocation6 + $0x90] sm:$0xf0] }
  0x21   :  { %v991_v58 = vld [vmem:[#allocation6 + $0x88] sm:$0xf]  ;;  %v1200_v59 = vld [vmem:[#allocation6 + $0x94] sm:$0xf0]  ;;  %v988_v60 = vor.u32 %v1197_v55, %v985_v57  ;;  %v1198_v62 = vld [vmem:[#allocation6 + $0x8c] sm:$0xf] }
  0x22   :  { %v109_v6 = vmul.f32 %v1259_v3, %v108_v5  ;;  %364 = vmatpush.bf16.msra.mxu0 %v1000_v44  ;;  %v992_v61 = vor.u32 %v1200_v59, %v991_v58  ;;  %v993_v63 = vld [vmem:[#allocation6 + $0x98] sm:$0xf0]  ;;  %v1195_v4 = vld [vmem:[#allocation6 + $0x6c] sm:$0xf0]  ;;  %v1193_v5 = vld [vmem:[#allocation6 + $0x64] sm:$0xf] }
  0x23   :  { %378 = vmatpush.bf16.msra.mxu1 %v1004_v48  ;;  %v996_v2 = vor.u32 %v1198_v62, %v993_v63  ;;  %v951_v18 = vld [vmem:[#allocation6 + $0x40] sm:$0xf]  ;;  %v1191_v19 = vld [vmem:[#allocation6 + $0x4c] sm:$0xf0]  ;;  %v1189_v20 = vld [vmem:[#allocation6 + $0x44] sm:$0xf] }
  0x24   :  { %v110_v7 = vadd.f32 %v1259_v3, %v109_v6  ;;  %392 = vmatpush.bf16.msra.mxu2 %v1008_v49  ;;  %406 = vmatpush.bf16.msra.mxu3 %v1012_v52  ;;  %v952_v21 = vor.u32 %v1191_v19, %v951_v18  ;;  %v953_v22 = vld [vmem:[#allocation6 + $0x50] sm:$0xf0]  ;;  %v959_v23 = vld [vmem:[#allocation6 + $0x48] sm:$0xf]  ;;  %v1192_v24 = vld [vmem:[#allocation6 + $0x54] sm:$0xf0] }
  0x25   :  { %v956_v25 = vor.u32 %v1189_v20, %v953_v22  ;;  %v960_v26 = vor.u32 %v1192_v24, %v959_v23  ;;  %v1190_v27 = vld [vmem:[#allocation6 + $0x4c] sm:$0xf]  ;;  %v961_v28 = vld [vmem:[#allocation6 + $0x58] sm:$0xf0]  ;;  %v935_v30 = vld [vmem:[#allocation6 + $0x20] sm:$0xf] }
  0x26   :  { %v1499_v8 = vsel %vm111_vm0, %v1259_v3, %v110_v7  ;;  %365 = vmatpush.bf16.msra.mxu0 %v984_v56  ;;  %v967_v3 = vld [vmem:[#allocation6 + $0x60] sm:$0xf]  ;;  %v969_v7 = vld [vmem:[#allocation6 + $0x70] sm:$0xf0]  ;;  %v964_v29 = vor.u32 %v1190_v27, %v961_v28  ;;  %v1187_v31 = vld [vmem:[#allocation6 + $0x2c] sm:$0xf0] }
  0x27   :  { %379 = vmatpush.bf16.msra.mxu1 %v988_v60  ;;  %v968_v6 = vor.u32 %v1195_v4, %v967_v3  ;;  %v1185_v32 = vld [vmem:[#allocation6 + $0x24] sm:$0xf]  ;;  %v936_v33 = vor.u32 %v1187_v31, %v935_v30  ;;  %v937_v34 = vld [vmem:[#allocation6 + $0x30] sm:$0xf0]  ;;  %v943_v35 = vld [vmem:[#allocation6 + $0x28] sm:$0xf] }
  0x28   :  { %393 = vmatpush.bf16.msra.mxu2 %v992_v61  ;;  %407 = vmatpush.bf16.msra.mxu3 %v996_v2  ;;  %v1188_v36 = vld [vmem:[#allocation6 + $0x34] sm:$0xf0]  ;;  %v940_v37 = vor.u32 %v1185_v32, %v937_v34  ;;  %v1186_v39 = vld [vmem:[#allocation6 + $0x2c] sm:$0xf]  ;;  %v945_v40 = vld [vmem:[#allocation6 + $0x38] sm:$0xf0] }
  0x29   :  { %v944_v38 = vor.u32 %v1188_v36, %v943_v35  ;;  %v919_v41 = vld [vmem:[#allocation6] sm:$0xf]  ;;  %v948_v43 = vor.u32 %v1186_v39, %v945_v40  ;;  %v1183_v44 = vld [vmem:[#allocation6 + $0xc] sm:$0xf0]  ;;  %v1181_v45 = vld [vmem:[#allocation6 + $0x4] sm:$0xf] }
  0x2a   :  { %366 = vmatpush.bf16.msra.mxu0 %v968_v6  ;;  %v921_v46 = vld [vmem:[#allocation6 + $0x10] sm:$0xf0]  ;;  %v920_v48 = vor.u32 %v1183_v44, %v919_v41  ;;  %v927_v50 = vld [vmem:[#allocation6 + $0x8] sm:$0xf]  ;;  %v1184_v51 = vld [vmem:[#allocation6 + $0x14] sm:$0xf0] }
  0x2b   :  { %v924_v49 = vor.u32 %v1181_v45, %v921_v46  ;;  %v1182_v52 = vld [vmem:[#allocation6 + $0xc] sm:$0xf]  ;;  %v928_v53 = vor.u32 %v1184_v51, %v927_v50  ;;  %v929_v54 = vld [vmem:[#allocation6 + $0x18] sm:$0xf0]  ;;  %v1219_v28 = vld [vmem:[#allocation7 + $0x30] sm:$0xff] }
  0x2c   :  { %v932_v56 = vor.u32 %v1182_v52, %v929_v54  ;;  %v1256_v18 = vld [vmem:[#allocation4] ss:$0 sm:$0xff]  ;;  %v1226_v39 = vld [vmem:[#allocation7 + $0x68] sm:$0xff]  ;;  %v1217_v50 = vld [vmem:[#allocation7 + $0x20] sm:$0xff] }
  0x2d   :  { %v1220_v23 = vld [vmem:[#allocation7 + $0x38] sm:$0xff]  ;;  %v1225_v51 = vld [vmem:[#allocation7 + $0x60] sm:$0xff] }
  0x2e   :  { %367 = vmatpush.bf16.msra.mxu0 %v952_v21  ;;  %v1228_v24 = vld [vmem:[#allocation7 + $0x78] sm:$0xff] }
  0x2f   :  { %v1236_v32 = vld [vmem:[#allocation7 + $0xb8] sm:$0xff] }
  0x32   :  { %368 = vmatpush.bf16.msra.mxu0 %v936_v33  ;;  %v1244_v33 = vld [vmem:[#allocation7 + $0xf8] sm:$0xff] }
  0x36   :  { %369 = vmatpush.bf16.msra.mxu0 %v920_v48 }
  0x3a   :  { %850 = vmatpush.bf16.msrb.mxu0 %v1220_v23 }
  0x3e   :  { %851 = vmatpush.bf16.msrb.mxu0 %v1219_v28 }
  0x8a   :  { %v103_v9 = vpop.xlane.xlu0 %102 }
  0x8b   :  { %v113_v10 = vmul.f32 %v1499_v8, %v103_v9  ;;  %v975_v9 = vld [vmem:[#allocation6 + $0x68] sm:$0xf] }
  0x8d   :  { %v1503_v11 = vsub.f32 %v1490_v0, %v113_v10  ;;  %v1196_v10 = vld [vmem:[#allocation6 + $0x74] sm:$0xf0] }
  0x8f   :  { %v117_v12 = vmul.f32 %v1503_v11, %v1503_v11 }
  0x91   :  { %119 = vadd.xlane.f32.xlu1 %v117_v12  ;;  %v972_v12 = vor.u32 %v1193_v5, %v969_v7 }
  0x92   :  { %v105_v13 = vpop.xlane.xlu0 %104 }
  0x93   :  { %v114_v14 = vmul.f32 %v1499_v8, %v105_v13  ;;  %v976_v13 = vor.u32 %v1196_v10, %v975_v9  ;;  %380 = vmatpush.bf16.msra.mxu1 %v972_v12  ;;  %v1255_v12 = vld [vmem:[#allocation2] ss:$0 sm:$0xff] }
  0x95   :  { %v1509_v15 = vsub.f32 %v1496_v1, %v114_v14  ;;  %v1194_v14 = vld [vmem:[#allocation6 + $0x6c] sm:$0xf]  ;;  %394 = vmatpush.bf16.msra.mxu2 %v976_v13 }
  0x97   :  { %v118_v16 = vmul.f32 %v1509_v15, %v1509_v15  ;;  %381 = vmatpush.bf16.msra.mxu1 %v956_v25 }
  0x99   :  { %121 = vadd.xlane.f32.xlu1 %v118_v16  ;;  %v977_v16 = vld [vmem:[#allocation6 + $0x78] sm:$0xf0]  ;;  %395 = vmatpush.bf16.msra.mxu2 %v960_v26 }
  0x9a   :  { %v980_v17 = vor.u32 %v1194_v14, %v977_v16 }
  0x9b   :  { %382 = vmatpush.bf16.msra.mxu1 %v940_v37 }
  0x9c   :  { %408 = vmatpush.bf16.msra.mxu3 %v980_v17 }
  0x9d   :  { %396 = vmatpush.bf16.msra.mxu2 %v944_v38  ;;  %v1218_v38 = vld [vmem:[#allocation7 + $0x28] sm:$0xff] }
  0x9e   :  { %852 = vmatpush.bf16.msrb.mxu0 %v1218_v38  ;;  %v1221_v38 = vld [vmem:[#allocation7 + $0x40] sm:$0xff] }
  0x9f   :  { %383 = vmatpush.bf16.msra.mxu1 %v924_v49 }
  0xa0   :  { %409 = vmatpush.bf16.msra.mxu3 %v964_v29  ;;  %v1227_v29 = vld [vmem:[#allocation7 + $0x70] sm:$0xff] }
  0xa1   :  { %397 = vmatpush.bf16.msra.mxu2 %v928_v53 }
  0xa2   :  { %853 = vmatpush.bf16.msrb.mxu0 %v1217_v50 }
  0xa3   :  { %864 = vmatpush.bf16.msrb.mxu1 %v1228_v24 }
  0xa4   :  { %410 = vmatpush.bf16.msra.mxu3 %v948_v43  ;;  %v1243_v43 = vld [vmem:[#allocation7 + $0xf0] sm:$0xff] }
  0xa5   :  { %878 = vmatpush.bf16.msrb.mxu2 %v1236_v32 }
  0xa7   :  { %865 = vmatpush.bf16.msrb.mxu1 %v1227_v29 }
  0xa8   :  { %411 = vmatpush.bf16.msra.mxu3 %v932_v56  ;;  %v1234_v56 = vld [vmem:[#allocation7 + $0xa8] sm:$0xff] }
  0xab   :  { %866 = vmatpush.bf16.msrb.mxu1 %v1226_v39 }
  0xac   :  { %892 = vmatpush.bf16.msrb.mxu3 %v1244_v33 }
  0xaf   :  { %867 = vmatpush.bf16.msrb.mxu1 %v1225_v51 }
  0xb0   :  { %893 = vmatpush.bf16.msrb.mxu3 %v1243_v43  ;;  %v1238_v43 = vld [vmem:[#allocation7 + $0xc8] sm:$0xff] }
 0x104   :  { %v120_v42 = vpop.xlane.xlu1 %119 }
 0x105   :  { %v123_v47 = vmul.f32 %v120_v42, %v1499_v8  ;;  %v1235_v42 = vld [vmem:[#allocation7 + $0xb0] sm:$0xff] }
 0x106   :  { %879 = vmatpush.bf16.msrb.mxu2 %v1235_v42  ;;  %v1230_v42 = vld [vmem:[#allocation7 + $0x88] sm:$0xff] }
 0x107   :  { %v125_v55 = vadd.f32 1e-05, %v123_v47 }
 0x109   :  { %1260 = vrsqrt.f32 %v125_v55  ;;  %vm133_vm2 = vweird.f32 %v125_v55 }
 0x10a   :  { %880 = vmatpush.bf16.msrb.mxu2 %v1234_v56 }
 0x10c   :  { %v122_v57 = vpop.xlane.xlu1 %121 }
 0x10d   :  { %v124_v58 = vmul.f32 %v122_v57, %v1499_v8  ;;  %v1242_v57 = vld [vmem:[#allocation7 + $0xe8] sm:$0xff] }
 0x10e   :  { %894 = vmatpush.bf16.msrb.mxu3 %v1242_v57 }
 0x10f   :  { %v1261_v59 = vpop.eup %1260  ;;  %v126_v60 = vadd.f32 1e-05, %v124_v58 }
 0x110   :  { %v128_v61 = vmul.f32 %v1261_v59, %v125_v55  ;;  %vm134_vm1 = vweird.f32 %v1261_v59 }
 0x111   :  { %1262 = vrsqrt.f32 %v126_v60  ;;  %vm135_vm3 = vmor %vm133_vm2, %vm134_vm1  ;;  %vm143_vm5 = vweird.f32 %v126_v60 }
 0x112   :  { %v129_v62 = vmul.f32 %v1261_v59, %v128_v61 }
 0x114   :  { %v130_v63 = vmul.f32 0.5, %v129_v62  ;;  %v1216_v62 = vld [vmem:[#allocation7 + $0x18] sm:$0xff] }
 0x115   :  { %854 = vmatpush.bf16.msrb.mxu0 %v1216_v62 }
 0x116   :  { %v131_v2 = vsub.f32 1.5, %v130_v63  ;;  %v1224_v63 = vld [vmem:[#allocation7 + $0x58] sm:$0xff] }
 0x117   :  { %v1263_v3 = vpop.eup %1262  ;;  %868 = vmatpush.bf16.msrb.mxu1 %v1224_v63 }
 0x118   :  { %v132_v4 = vmul.f32 %v1261_v59, %v131_v2  ;;  %v138_v5 = vmul.f32 %v1263_v3, %v126_v60  ;;  %vm144_vm4 = vweird.f32 %v1263_v3 }
 0x119   :  { %vm145_vm6 = vmor %vm143_vm5, %vm144_vm4 }
 0x11a   :  { %v139_v6 = vmul.f32 %v1263_v3, %v138_v5  ;;  %v136_v7 = vsel %vm135_vm3, %v1261_v59, %v132_v4 }
 0x11b   :  { %v147_v8 = vmul.f32 %v136_v7, %v1503_v11  ;;  %v1520_v11 = vld [vmem:[%s1708_s4] sm:$0xf]  ;;  %v1241_v7 = vld [vmem:[#allocation7 + $0xe0] sm:$0xff] }
 0x11c   :  { %v140_v9 = vmul.f32 0.5, %v139_v6  ;;  %v194_v25 = vperm.slane %v1520_v11, 0  ;;  %v196_v36 = vperm.slane %v1520_v11, 2  ;;  %v197_v37 = vperm.slane %v1520_v11, 3  ;;  %v1233_v6 = vld [vmem:[#allocation7 + $0xa0] sm:$0xff]  ;;  %895 = vmatpush.bf16.msrb.mxu3 %v1241_v7 }
 0x11d   :  { %v152_v17 = vmul.f32 %v1255_v12, %v147_v8  ;;  %881 = vmatpush.bf16.msrb.mxu2 %v1233_v6 }
 0x11e   :  { %v141_v10 = vsub.f32 1.5, %v140_v9 }
 0x11f   :  { %v157_v20 = vadd.f32 %v1256_v18, %v152_v17  ;;  %v1240_v17 = vld [vmem:[#allocation7 + $0xd8] sm:$0xff] }
 0x120   :  { %v142_v13 = vmul.f32 %v1263_v3, %v141_v10  ;;  %896 = vmatpush.bf16.msrb.mxu3 %v1240_v17 }
 0x122   :  { %v146_v14 = vsel %vm145_vm6, %v1263_v3, %v142_v13  ;;  %v1223_v13 = vld [vmem:[#allocation7 + $0x50] sm:$0xff] }
 0x123   :  { %v148_v16 = vmul.f32 %v146_v14, %v1509_v15  ;;  %v195_v15 = vperm.slane %v1520_v11, 1  ;;  %869 = vmatpush.bf16.msrb.mxu1 %v1223_v13 }
 0x125   :  { %v153_v19 = vmul.f32 %v1255_v12, %v148_v16  ;;  %v1215_v12 = vld [vmem:[#allocation7 + $0x10] sm:$0xff]  ;;  %v1232_v16 = vld [vmem:[#allocation7 + $0x98] sm:$0xff] }
 0x126   :  { %855 = vmatpush.bf16.msrb.mxu0 %v1215_v12  ;;  %882 = vmatpush.bf16.msrb.mxu2 %v1232_v16 }
 0x127   :  { %v158_v21 = vadd.f32 %v1256_v18, %v153_v19 }
 0x129   :  { %v159_v22 = vpack.c.bf16 %v158_v21, %v157_v20  ;;  %v1214_v21 = vld [vmem:[#allocation7 + $0x8] sm:$0xff] }
 0x12a   :  { %856 = vmatpush.bf16.msrb.mxu0 %v1214_v21 }
 0x12b   :  { %370 = vmatmul.bf16.vlgmr.msra.gmra.mxu0 %v159_v22  ;;  %384 = vmatmul.bf16.vlgmr.msra.gmra.mxu1 %v159_v22 }
 0x12c   :  { %398 = vmatmul.bf16.vlgmr.msra.gmra.mxu2 %v159_v22  ;;  %412 = vmatmul.bf16.vlgmr.msra.gmra.mxu3 %v159_v22  ;;  %v1222_v22 = vld [vmem:[#allocation7 + $0x48] sm:$0xff] }
 0x12d   :  { %870 = vmatpush.bf16.msrb.mxu1 %v1222_v22 }
 0x131   :  { %871 = vmatpush.bf16.msrb.mxu1 %v1221_v38 }
 0x1a8   :  { %v371_v26 = vpop.f32.mrf.mxu0  ;;  %v385_v27 = vpop.f32.mrf.mxu1 }
 0x1a9   :  { %v1524_v30 = vadd.f32 %v371_v26, %v194_v25  ;;  %v1526_v31 = vadd.f32 %v385_v27, %v195_v15  ;;  %v1239_v26 = vld [vmem:[#allocation7 + $0xd0] sm:$0xff] }
 0x1aa   :  { %897 = vmatpush.bf16.msrb.mxu3 %v1239_v26 }
 0x1ab   :  { %v1045_v34 = vmul.f32 -1.702, %v1524_v30  ;;  %v1046_v35 = vmul.f32 -1.702, %v1526_v31 }
 0x1ad   :  { %v434_v40 = vmul.f32 1.442695, %v1045_v34  ;;  %v436_v41 = vmul.f32 1.442695, %v1046_v35 }
 0x1ae   :  { %898 = vmatpush.bf16.msrb.mxu3 %v1238_v43 }
 0x1af   :  { %1264 = vpow2.f32 %v434_v40  ;;  %v399_v44 = vpop.f32.mrf.mxu2  ;;  %v413_v45 = vpop.f32.mrf.mxu3 }
 0x1b0   :  { %1266 = vpow2.f32 %v436_v41  ;;  %v1532_v46 = vadd.f32 %v399_v44, %v196_v36  ;;  %v1536_v47 = vadd.f32 %v413_v45, %v197_v37  ;;  %v373_v48 = vpop.f32.mrf.mxu0  ;;  %v387_v49 = vpop.f32.mrf.mxu1 }
 0x1b1   :  { %v1538_v52 = vadd.f32 %v373_v48, %v194_v25  ;;  %v1540_v53 = vadd.f32 %v387_v49, %v195_v15  ;;  %v1231_v15 = vld [vmem:[#allocation7 + $0x90] sm:$0xff] }
 0x1b2   :  { %v1047_v54 = vmul.f32 -1.702, %v1532_v46  ;;  %v1048_v55 = vmul.f32 -1.702, %v1536_v47  ;;  %883 = vmatpush.bf16.msrb.mxu2 %v1231_v15 }
 0x1b3   :  { %v1049_v58 = vmul.f32 -1.702, %v1538_v52  ;;  %v1050_v59 = vmul.f32 -1.702, %v1540_v53 }
 0x1b4   :  { %v438_v60 = vmul.f32 1.442695, %v1047_v54  ;;  %v440_v61 = vmul.f32 1.442695, %v1048_v55  ;;  %v1229_v54 = vld [vmem:[#allocation7 + $0x80] sm:$0xff] }
 0x1b5   :  { %v1265_v2 = vpop.eup %1264  ;;  %v442_v5 = vmul.f32 1.442695, %v1049_v58  ;;  %v444_v10 = vmul.f32 1.442695, %v1050_v59  ;;  %v1237_v55 = vld [vmem:[#allocation7 + $0xc0] sm:$0xff] }
 0x1b6   :  { %v1267_v3 = vpop.eup %1266  ;;  %v1546_v4 = vadd.f32 1.0, %v1265_v2  ;;  %1268 = vpow2.f32 %v438_v60  ;;  %884 = vmatpush.bf16.msrb.mxu2 %v1230_v42  ;;  %899 = vmatpush.bf16.msrb.mxu3 %v1237_v55 }
 0x1b7   :  { %v1548_v9 = vadd.f32 1.0, %v1267_v3  ;;  %1270 = vpow2.f32 %v440_v61  ;;  %v401_v8 = vpop.f32.mrf.mxu2  ;;  %v415_v20 = vpop.f32.mrf.mxu3 }
 0x1b8   :  { %1272 = vrcp.f32 %v1546_v4  ;;  %v1552_v14 = vadd.f32 %v401_v8, %v196_v36  ;;  %v1568_v32 = vadd.f32 %v415_v20, %v197_v37  ;;  %v1213_v36 = vld [vmem:[#allocation7] sm:$0xff]  ;;  %v467_v49 = vand.u32 2147483647, %v1546_v4 }
 0x1b9   :  { %1274 = vrcp.f32 %v1548_v9  ;;  %857 = vmatpush.bf16.msrb.mxu0 %v1213_v36  ;;  %v469_v50 = vand.u32 2147483648, %v1546_v4  ;;  %v482_v58 = vand.u32 2147483647, %v1548_v9  ;;  %v484_v59 = vand.u32 2147483648, %v1548_v9 }
 0x1ba   :  { %1276 = vpow2.f32 %v442_v5  ;;  %v1051_v19 = vmul.f32 -1.702, %v1552_v14  ;;  %v1052_v44 = vmul.f32 -1.702, %v1568_v32  ;;  %885 = vmatpush.bf16.msrb.mxu2 %v1229_v54  ;;  %vm463_vm7 = vweird.f32 %v1546_v4 }
 0x1bb   :  { %1278 = vpow2.f32 %v444_v10  ;;  %vm478_vm9 = vweird.f32 %v1548_v9  ;;  %vm1596_vm10 = vcmp.eq.f32.partialorder %v467_v49, 8.507059e+37  ;;  %v470_v2 = vor.u32 1.1754944e-38, %v469_v50 }
 0x1bc   :  { %v1269_v18 = vpop.eup %1268  ;;  %v446_v35 = vmul.f32 1.442695, %v1051_v19  ;;  %v448_v57 = vmul.f32 1.442695, %v1052_v44  ;;  %vm1609_vm13 = vcmp.eq.f32.partialorder %v482_v58, 8.507059e+37  ;;  %v485_v12 = vor.u32 1.1754944e-38, %v484_v59 }
 0x1bd   :  { %v1271_v23 = vpop.eup %1270  ;;  %v1555_v24 = vadd.f32 1.0, %v1269_v18 }
 0x1be   :  { %v1557_v25 = vpop.eup %1272  ;;  %v1564_v29 = vadd.f32 1.0, %v1271_v23 }
 0x1bf   :  { %v1559_v27 = vpop.eup %1274  ;;  %v459_v28 = vmul.f32 %v1557_v25, %v1546_v4  ;;  %1280 = vrcp.f32 %v1555_v24  ;;  %vm464_vm8 = vweird.f32 %v1557_v25  ;;  %v497_v13 = vand.u32 2147483647, %v1555_v24 }
 0x1c0   :  { %v1277_v33 = vpop.eup %1276  ;;  %v474_v34 = vmul.f32 %v1559_v27, %v1548_v9  ;;  %1282 = vrcp.f32 %v1564_v29  ;;  %vm479_vm11 = vweird.f32 %v1559_v27  ;;  %vm1605_vm12 = vmor %vm463_vm7, %vm464_vm8  ;;  %vm493_vm15 = vweird.f32 %v1555_v24 }
 0x1c1   :  { %v1279_v39 = vpop.eup %1278  ;;  %v460_v40 = vsub.f32 1.0, %v459_v28  ;;  %v1573_v11 = vadd.f32 1.0, %v1277_v33  ;;  %1284 = vpow2.f32 %v446_v35  ;;  %vm1620_vm14 = vmor %vm478_vm9, %vm479_vm11  ;;  %v499_v20 = vand.u32 2147483648, %v1555_v24 }
 0x1c2   :  { %v475_v41 = vsub.f32 1.0, %v474_v34  ;;  %v1575_v37 = vadd.f32 1.0, %v1279_v39  ;;  %vm498_vm11 = vcmp.eq.f32.partialorder %v497_v13, 8.507059e+37  ;;  %v514_v13 = vand.u32 2147483648, %v1564_v29 }
 0x1c3   :  { %v461_v48 = vmul.f32 %v1557_v25, %v460_v40  ;;  %1286 = vrcp.f32 %v1573_v11  ;;  %v527_v7 = vand.u32 2147483647, %v1573_v11  ;;  %vm523_vm0 = vweird.f32 %v1573_v11 }
 0x1c4   :  { %v476_v51 = vmul.f32 %v1559_v27, %v475_v41  ;;  %1288 = vrcp.f32 %v1575_v37  ;;  %v529_v26 = vand.u32 2147483648, %v1573_v11  ;;  %v542_v38 = vand.u32 2147483647, %v1575_v37 }
 0x1c5   :  { %v1578_v45 = vpop.eup %1280  ;;  %v462_v61 = vadd.f32 %v1557_v25, %v461_v48  ;;  %1290 = vpow2.f32 %v448_v57  ;;  %vm1636_vm2 = vcmp.eq.f32.partialorder %v527_v7, 8.507059e+37  ;;  %v544_v39 = vand.u32 2147483648, %v1575_v37 }
 0x1c6   :  { %v489_v56 = vmul.f32 %v1578_v45, %v1555_v24  ;;  %v1590_v60 = vpop.eup %1282  ;;  %v477_v3 = vadd.f32 %v1559_v27, %v476_v51  ;;  %vm494_vm1 = vweird.f32 %v1578_v45  ;;  %v530_v49 = vor.u32 1.1754944e-38, %v529_v26 }
 0x1c7   :  { %v1285_v62 = vpop.eup %1284  ;;  %v466_v18 = vsel %vm1605_vm12, %v1557_v25, %v462_v61  ;;  %v504_v21 = vmul.f32 %v1590_v60, %v1564_v29  ;;  %vm538_vm6 = vweird.f32 %v1575_v37  ;;  %vm1664_vm8 = vmor %vm493_vm15, %vm494_vm1  ;;  %vm543_vm9 = vcmp.eq.f32.partialorder %v542_v38, 8.507059e+37 }
 0x1c8   :  { %v490_v6 = vsub.f32 1.0, %v489_v56  ;;  %v1603_v10 = vadd.f32 1.0, %v1285_v62  ;;  %v481_v22 = vsel %vm1620_vm14, %v1559_v27, %v477_v3  ;;  %v471_v28 = vsel %vm1596_vm10, %v470_v2, %v466_v18 }
 0x1c9   :  { %v1287_v5 = vpop.eup %1286  ;;  %v486_v35 = vsel %vm1609_vm13, %v485_v12, %v481_v22  ;;  %v505_v36 = vsub.f32 1.0, %v504_v21  ;;  %v578_v44 = vmul.f32 %v471_v28, %v1524_v30  ;;  %v545_v30 = vor.u32 1.1754944e-38, %v544_v39 }
 0x1ca   :  { %v519_v16 = vmul.f32 %v1287_v5, %v1573_v11  ;;  %v1289_v17 = vpop.eup %1288  ;;  %1292 = vrcp.f32 %v1603_v10  ;;  %v491_v25 = vmul.f32 %v1578_v45, %v490_v6  ;;  %vm524_vm3 = vweird.f32 %v1287_v5 }
 0x1cb   :  { %v534_v9 = vmul.f32 %v1289_v17, %v1575_v37  ;;  %v1291_v34 = vpop.eup %1290  ;;  %vm539_vm4 = vweird.f32 %v1289_v17  ;;  %vm525_vm5 = vmor %vm523_vm0, %vm524_vm3  ;;  %v579_v50 = vmul.f32 %v486_v35, %v1526_v31  ;;  %v506_v56 = vmul.f32 %v1590_v60, %v505_v36  ;;  %v1257_v35 = vld [vmem:[#allocation9] ss:$0 sm:$0xff] }
 0x1cc   :  { %v520_v23 = vsub.f32 1.0, %v519_v16  ;;  %v1647_v42 = vadd.f32 1.0, %v1291_v34  ;;  %v492_v48 = vadd.f32 %v1578_v45, %v491_v25  ;;  %vm540_vm7 = vmor %vm538_vm6, %vm539_vm4  ;;  %v557_v62 = vand.u32 2147483647, %v1603_v10 }
 0x1cd   :  { %v535_v27 = vsub.f32 1.0, %v534_v9  ;;  %v559_v63 = vand.u32 2147483648, %v1603_v10  ;;  %vm553_vm12 = vweird.f32 %v1603_v10  ;;  %vm509_vm13 = vweird.f32 %v1590_v60 }
 0x1ce   :  { %v521_v33 = vmul.f32 %v1287_v5, %v520_v23  ;;  %1294 = vrcp.f32 %v1647_v42  ;;  %v496_v59 = vsel %vm1664_vm8, %v1578_v45, %v492_v48  ;;  %v507_v45 = vadd.f32 %v1590_v60, %v506_v56 }
 0x1cf   :  { %v536_v41 = vmul.f32 %v1289_v17, %v535_v27  ;;  %v560_v8 = vor.u32 1.1754944e-38, %v559_v63  ;;  %vm558_vm15 = vcmp.eq.f32.partialorder %v557_v62, 8.507059e+37  ;;  %vm508_vm0 = vweird.f32 %v1564_v29 }
 0x1d0   :  { %v522_v40 = vadd.f32 %v1287_v5, %v521_v33  ;;  %v1293_v43 = vpop.eup %1292  ;;  %vm1682_vm1 = vmor %vm508_vm0, %vm509_vm13  ;;  %v512_v18 = vand.u32 2147483647, %v1564_v29  ;;  %v574_v22 = vand.u32 2147483648, %v1647_v42  ;;  %v572_v9 = vand.u32 2147483647, %v1647_v42 }
 0x1d1   :  { %v537_v54 = vadd.f32 %v1289_v17, %v536_v41  ;;  %v549_v55 = vmul.f32 %v1293_v43, %v1603_v10  ;;  %vm554_vm10 = vweird.f32 %v1293_v43  ;;  %v511_v21 = vsel %vm1682_vm1, %v1590_v60, %v507_v45 }
 0x1d2   :  { %v526_v51 = vsel %vm525_vm5, %v1287_v5, %v522_v40  ;;  %v500_v5 = vor.u32 1.1754944e-38, %v499_v20  ;;  %vm555_vm14 = vmor %vm553_vm12, %vm554_vm10  ;;  %v515_v25 = vor.u32 1.1754944e-38, %v514_v13  ;;  %vm513_vm3 = vcmp.eq.f32.partialorder %v512_v18, 8.507059e+37 }
 0x1d3   :  { %v531_v57 = vsel %vm1636_vm2, %v530_v49, %v526_v51  ;;  %v541_v37 = vsel %vm540_vm7, %v1289_v17, %v537_v54  ;;  %v550_v58 = vsub.f32 1.0, %v549_v55  ;;  %vm568_vm4 = vweird.f32 %v1647_v42 }
 0x1d4   :  { %v582_v31 = vmul.f32 %v531_v57, %v1538_v52  ;;  %v546_v61 = vsel %vm543_vm9, %v545_v30, %v541_v37  ;;  %v1295_v7 = vpop.eup %1294  ;;  %v501_v4 = vsel %vm498_vm11, %v500_v5, %v496_v59  ;;  %v516_v29 = vsel %vm513_vm3, %v515_v25, %v511_v21 }
 0x1d5   :  { %v583_v24 = vmul.f32 %v546_v61, %v1540_v53  ;;  %v551_v2 = vmul.f32 %v1293_v43, %v550_v58  ;;  %v564_v53 = vmul.f32 %v1295_v7, %v1647_v42  ;;  %v580_v16 = vmul.f32 %v501_v4, %v1532_v46 }
 0x1d6   :  { %v586_v3 = vpack.c.bf16 %v582_v31, %v578_v44  ;;  %vm569_vm2 = vweird.f32 %v1295_v7  ;;  %vm573_vm6 = vcmp.eq.f32.partialorder %v572_v9, 8.507059e+37  ;;  %v581_v60 = vmul.f32 %v516_v29, %v1536_v47 }
 0x1d7   :  { %v552_v52 = vadd.f32 %v1293_v43, %v551_v2  ;;  %v587_v6 = vpack.c.bf16 %v583_v24, %v579_v50  ;;  %v565_v20 = vsub.f32 1.0, %v564_v53  ;;  %vm570_vm5 = vmor %vm568_vm4, %vm569_vm2 }
 0x1d8   :  { %858 = vmatmul.bf16.vlgmr.msrb.gmra.mxu0 %v586_v3 }
 0x1d9   :  { %v556_v12 = vsel %vm555_vm14, %v1293_v43, %v552_v52  ;;  %872 = vmatmul.bf16.vlgmr.msrb.gmra.mxu1 %v587_v6  ;;  %v566_v23 = vmul.f32 %v1295_v7, %v565_v20 }
 0x1da   :  { %v561_v10 = vsel %vm558_vm15, %v560_v8, %v556_v12 }
 0x1db   :  { %v584_v19 = vmul.f32 %v561_v10, %v1552_v14  ;;  %v567_v15 = vadd.f32 %v1295_v7, %v566_v23  ;;  %v575_v14 = vor.u32 1.1754944e-38, %v574_v22 }
 0x1dd   :  { %v588_v46 = vpack.c.bf16 %v584_v19, %v580_v16  ;;  %v571_v26 = vsel %vm570_vm5, %v1295_v7, %v567_v15 }
 0x1de   :  { %v576_v28 = vsel %vm573_vm6, %v575_v14, %v571_v26 }
 0x1df   :  { %886 = vmatmul.bf16.vlgmr.msrb.gmra.mxu2 %v588_v46  ;;  %v585_v33 = vmul.f32 %v576_v28, %v1568_v32 }
 0x1e1   :  { %v589_v27 = vpack.c.bf16 %v585_v33, %v581_v60 }
 0x1e3   :  { %900 = vmatmul.bf16.vlgmr.msrb.gmra.mxu3 %v589_v27 }
 0x255   :  { %v859_v34 = vpop.f32.mrf.mxu0 }
 0x256   :  { %v860_v36 = vadd.f32 %v1257_v35, %v859_v34  ;;  %v873_v38 = vpop.f32.mrf.mxu1 }
 0x258   :  { %v874_v40 = vadd.f32 %v873_v38, %v860_v36 }
 0x25d   :  { %v861_v41 = vpop.f32.mrf.mxu0 }
 0x25e   :  { %v862_v43 = vadd.f32 %v1257_v35, %v861_v41  ;;  %v875_v49 = vpop.f32.mrf.mxu1 }
 0x260   :  { %v876_v51 = vadd.f32 %v875_v49, %v862_v43 }
 0x262   :  { %v887_v39 = vpop.f32.mrf.mxu2 }
 0x263   :  { %v888_v42 = vadd.f32 %v887_v39, %v874_v40 }
 0x266   :  { %v901_v44 = vpop.f32.mrf.mxu3 }
 0x267   :  { %v902_v48 = vadd.f32 %v901_v44, %v888_v42 }
 0x269   :  { %v906_v47 = vadd.f32 %v902_v48, %v1490_v0 }
 0x26a   :  { %v889_v50 = vpop.f32.mrf.mxu2 }
 0x26b   :  { %908 = vst [vmem:[%s1711_s7] sm:$0xff] %v906_v47  ;;  %v890_v32 = vadd.f32 %v889_v50, %v876_v51 }
 0x26e   :  { %v903_v54 = vpop.f32.mrf.mxu3 }
 0x26f   :  { %v904_v55 = vadd.f32 %v903_v54, %v890_v32 }
 0x271   :  { %v907_v56 = vadd.f32 %v904_v55, %v1496_v1 }
 0x273   :  { %909 = vst [vmem:[%s1711_s7 + $0x8] sm:$0xff] %v907_v56 }
 0x274   :  { %914 = vsyncpa [#allocation3], 1 }
 0x275   :  { %915 = vsyncpa [#allocation5], 1 }
 0x276   :  { %916 = vsyncpa [#allocation8], 1 }

// kernel: text_encoder_forward.8
= control target key start
LH: loop header
LB: loop body
LE: loop exit
PB: predicated region body
PF: predicated region fallthrough
CT: control target
= control target key end

     0   :  { %12 = vsyncpa [#allocation3], 0  ;;  %s1583_s0 = inlined_call_operand.vmem [shape: f32[16,128], index: 0, kind: input, shape index: {}]   ;;  %s1584_s1 = inlined_call_operand.vmem [shape: f32[1,128], index: 1, kind: input, shape index: {}]   ;;  %s1585_s2 = inlined_call_operand.vmem [shape: f32[1,128], index: 2, kind: input, shape index: {}]   ;;  %s1586_s3 = inlined_call_operand.hbm [shape: bf16[128,512], index: 3, kind: input, shape index: {}]   ;;  %s1587_s4 = inlined_call_operand.vmem [shape: f32[1,512], index: 4, kind: input, shape index: {}]   ;;  %s1588_s5 = inlined_call_operand.hbm [shape: bf16[512,128], index: 5, kind: input, shape index: {}]   ;;  %s1589_s6 = inlined_call_operand.vmem [shape: f32[1,128], index: 6, kind: input, shape index: {}]   ;;  %s1590_s7 = inlined_call_operand.vmem [shape: f32[16,128], index: 7, kind: output, shape index: {}]  }
   0x1   :  { %s24_s26 = sshll.u32 %s1586_s3, 4  ;;  %s25_s26 = int_to_ptr.hbm [resolvable:$true] %s24_s26 }
   0x2   :  { %13 = vsyncpa [#allocation5], 0  ;;  %s1304_s27 = smov [#allocation2]   ;;  %s39_s8 = sshll.u32 %s1588_s5, 4  ;;  %s40_s8 = int_to_ptr.hbm [resolvable:$true] %s39_s8 }
   0x3   :  { %s26_s28 = sshll.u32 %s1304_s27, 4  ;;  %s1305_s9 = smov 256   ;;  %s27_s28 = int_to_ptr.vmem [resolvable:$true] %s26_s28 }
   0x4   :  { %s1306_s10 = smov 16   ;;  %s1307_s11 = smov [#allocation4]  }
   0x5   :  { %32 = dma.hbm_to_vmem [thread:$0]  %s25_s26, 4096, %s27_s28, [#allocation3], %s1305_s9, %s1305_s9, %s1306_s10  }
   0x6   :  { %s41_s12 = sshll.u32 %s1307_s11, 4  ;;  %s1308_s13 = smov 64   ;;  %s42_s12 = int_to_ptr.vmem [resolvable:$true] %s41_s12 }
   0x7   :  { %s1309_s14 = smov 4  }
   0x8   :  { %47 = dma.hbm_to_vmem [thread:$0]  %s40_s8, 4096, %s42_s12, [#allocation5], %s1308_s13, %s1308_s13, %s1309_s14  }
   0x9   :  { %1300 = dma.done.wait [#allocation3], 4096  }
   0xa   :  { %1301 = vsyncadd [#allocation3], 4294963200 }
   0xb   :  { %1302 = dma.done.wait [#allocation5], 4096  }
   0xc   :  { %1303 = vsyncadd [#allocation5], 4294963200  ;;  %v1360_v0 = vld [vmem:[%s1583_s0] sm:$0xff]  ;;  %v1366_v1 = vld [vmem:[%s1583_s0 + $0x8] sm:$0xff]  ;;  %v1310_v2 = vmov 128.0  }
   0xd   :  { %62 = vadd.xlane.f32.xlu0 %v1360_v0  ;;  %1214 = vrcp.f32 %v1310_v2  ;;  %v990_v17 = vld [vmem:[#allocation2 + $0xe0] sm:$0xf]  ;;  %v1170_v18 = vld [vmem:[#allocation2 + $0xec] sm:$0xf0]  ;;  %v1168_v19 = vld [vmem:[#allocation2 + $0xe4] sm:$0xf] }
   0xe   :  { %v991_v20 = vor.u32 %v1170_v18, %v990_v17  ;;  %v992_v21 = vld [vmem:[#allocation2 + $0xf0] sm:$0xf0]  ;;  %v998_v22 = vld [vmem:[#allocation2 + $0xe8] sm:$0xf]  ;;  %v1171_v23 = vld [vmem:[#allocation2 + $0xf4] sm:$0xf0] }
   0xf   :  { %v995_v24 = vor.u32 %v1168_v19, %v992_v21  ;;  %v999_v25 = vor.u32 %v1171_v23, %v998_v22  ;;  %v1169_v26 = vld [vmem:[#allocation2 + $0xec] sm:$0xf]  ;;  %v1000_v27 = vld [vmem:[#allocation2 + $0xf8] sm:$0xf0]  ;;  %v974_v29 = vld [vmem:[#allocation2 + $0xc0] sm:$0xf] }
  0x10   :  { %322 = vmatpush.bf16.msra.mxu0 %v991_v20  ;;  %v1003_v28 = vor.u32 %v1169_v26, %v1000_v27  ;;  %v1166_v30 = vld [vmem:[#allocation2 + $0xcc] sm:$0xf0]  ;;  %v1164_v31 = vld [vmem:[#allocation2 + $0xc4] sm:$0xf]  ;;  %v976_v33 = vld [vmem:[#allocation2 + $0xd0] sm:$0xf0] }
  0x11   :  { %336 = vmatpush.bf16.msra.mxu1 %v995_v24  ;;  %350 = vmatpush.bf16.msra.mxu2 %v999_v25  ;;  %v975_v32 = vor.u32 %v1166_v30, %v974_v29  ;;  %v982_v34 = vld [vmem:[#allocation2 + $0xc8] sm:$0xf]  ;;  %v1167_v35 = vld [vmem:[#allocation2 + $0xd4] sm:$0xf0]  ;;  %v979_v36 = vor.u32 %v1164_v31, %v976_v33  ;;  %v1165_v38 = vld [vmem:[#allocation2 + $0xcc] sm:$0xf] }
  0x12   :  { %364 = vmatpush.bf16.msra.mxu3 %v1003_v28  ;;  %v983_v37 = vor.u32 %v1167_v35, %v982_v34  ;;  %v984_v39 = vld [vmem:[#allocation2 + $0xd8] sm:$0xf0]  ;;  %v958_v41 = vld [vmem:[#allocation2 + $0xa0] sm:$0xf]  ;;  %v1162_v42 = vld [vmem:[#allocation2 + $0xac] sm:$0xf0] }
  0x13   :  { %v1215_v3 = vpop.eup %1214  ;;  %v987_v40 = vor.u32 %v1165_v38, %v984_v39  ;;  %v1160_v43 = vld [vmem:[#allocation2 + $0xa4] sm:$0xf]  ;;  %v959_v44 = vor.u32 %v1162_v42, %v958_v41  ;;  %v960_v45 = vld [vmem:[#allocation2 + $0xb0] sm:$0xf0]  ;;  %v966_v46 = vld [vmem:[#allocation2 + $0xa8] sm:$0xf] }
  0x14   :  { %v67_v4 = vmul.f32 128.0, %v1215_v3  ;;  %vm71_vm0 = vweird.f32 %v1215_v3  ;;  %323 = vmatpush.bf16.msra.mxu0 %v975_v32  ;;  %v1163_v47 = vld [vmem:[#allocation2 + $0xb4] sm:$0xf0]  ;;  %v963_v48 = vor.u32 %v1160_v43, %v960_v45  ;;  %v1161_v50 = vld [vmem:[#allocation2 + $0xac] sm:$0xf] }
  0x15   :  { %64 = vadd.xlane.f32.xlu0 %v1366_v1  ;;  %337 = vmatpush.bf16.msra.mxu1 %v979_v36  ;;  %v967_v49 = vor.u32 %v1163_v47, %v966_v46  ;;  %v968_v51 = vld [vmem:[#allocation2 + $0xb8] sm:$0xf0]  ;;  %v942_v53 = vld [vmem:[#allocation2 + $0x80] sm:$0xf]  ;;  %v1158_v54 = vld [vmem:[#allocation2 + $0x8c] sm:$0xf0] }
  0x16   :  { %v68_v5 = vsub.f32 1.0, %v67_v4  ;;  %351 = vmatpush.bf16.msra.mxu2 %v983_v37  ;;  %365 = vmatpush.bf16.msra.mxu3 %v987_v40  ;;  %v971_v52 = vor.u32 %v1161_v50, %v968_v51  ;;  %v1156_v55 = vld [vmem:[#allocation2 + $0x84] sm:$0xf]  ;;  %v943_v56 = vor.u32 %v1158_v54, %v942_v53  ;;  %v944_v57 = vld [vmem:[#allocation2 + $0x90] sm:$0xf0] }
  0x17   :  { %v950_v58 = vld [vmem:[#allocation2 + $0x88] sm:$0xf]  ;;  %v1159_v59 = vld [vmem:[#allocation2 + $0x94] sm:$0xf0]  ;;  %v947_v60 = vor.u32 %v1156_v55, %v944_v57  ;;  %v1157_v62 = vld [vmem:[#allocation2 + $0x8c] sm:$0xf] }
  0x18   :  { %v69_v6 = vmul.f32 %v1215_v3, %v68_v5  ;;  %324 = vmatpush.bf16.msra.mxu0 %v959_v44  ;;  %v951_v61 = vor.u32 %v1159_v59, %v950_v58  ;;  %v952_v63 = vld [vmem:[#allocation2 + $0x98] sm:$0xf0]  ;;  %v1154_v4 = vld [vmem:[#allocation2 + $0x6c] sm:$0xf0]  ;;  %v1152_v5 = vld [vmem:[#allocation2 + $0x64] sm:$0xf] }
  0x19   :  { %338 = vmatpush.bf16.msra.mxu1 %v963_v48  ;;  %v955_v2 = vor.u32 %v1157_v62, %v952_v63  ;;  %v910_v18 = vld [vmem:[#allocation2 + $0x40] sm:$0xf]  ;;  %v1150_v19 = vld [vmem:[#allocation2 + $0x4c] sm:$0xf0]  ;;  %v1148_v20 = vld [vmem:[#allocation2 + $0x44] sm:$0xf] }
  0x1a   :  { %v70_v7 = vadd.f32 %v1215_v3, %v69_v6  ;;  %352 = vmatpush.bf16.msra.mxu2 %v967_v49  ;;  %366 = vmatpush.bf16.msra.mxu3 %v971_v52  ;;  %v911_v21 = vor.u32 %v1150_v19, %v910_v18  ;;  %v912_v22 = vld [vmem:[#allocation2 + $0x50] sm:$0xf0]  ;;  %v918_v23 = vld [vmem:[#allocation2 + $0x48] sm:$0xf]  ;;  %v1151_v24 = vld [vmem:[#allocation2 + $0x54] sm:$0xf0] }
  0x1b   :  { %v915_v25 = vor.u32 %v1148_v20, %v912_v22  ;;  %v919_v26 = vor.u32 %v1151_v24, %v918_v23  ;;  %v1149_v27 = vld [vmem:[#allocation2 + $0x4c] sm:$0xf]  ;;  %v920_v28 = vld [vmem:[#allocation2 + $0x58] sm:$0xf0]  ;;  %v894_v30 = vld [vmem:[#allocation2 + $0x20] sm:$0xf] }
  0x1c   :  { %v1369_v8 = vsel %vm71_vm0, %v1215_v3, %v70_v7  ;;  %325 = vmatpush.bf16.msra.mxu0 %v943_v56  ;;  %v926_v3 = vld [vmem:[#allocation2 + $0x60] sm:$0xf]  ;;  %v928_v7 = vld [vmem:[#allocation2 + $0x70] sm:$0xf0]  ;;  %v923_v29 = vor.u32 %v1149_v27, %v920_v28  ;;  %v1146_v31 = vld [vmem:[#allocation2 + $0x2c] sm:$0xf0] }
  0x1d   :  { %339 = vmatpush.bf16.msra.mxu1 %v947_v60  ;;  %v927_v6 = vor.u32 %v1154_v4, %v926_v3  ;;  %v1144_v32 = vld [vmem:[#allocation2 + $0x24] sm:$0xf]  ;;  %v895_v33 = vor.u32 %v1146_v31, %v894_v30  ;;  %v896_v34 = vld [vmem:[#allocation2 + $0x30] sm:$0xf0]  ;;  %v902_v35 = vld [vmem:[#allocation2 + $0x28] sm:$0xf] }
  0x1e   :  { %353 = vmatpush.bf16.msra.mxu2 %v951_v61  ;;  %367 = vmatpush.bf16.msra.mxu3 %v955_v2  ;;  %v1147_v36 = vld [vmem:[#allocation2 + $0x34] sm:$0xf0]  ;;  %v899_v37 = vor.u32 %v1144_v32, %v896_v34  ;;  %v1145_v39 = vld [vmem:[#allocation2 + $0x2c] sm:$0xf]  ;;  %v904_v40 = vld [vmem:[#allocation2 + $0x38] sm:$0xf0] }
  0x1f   :  { %v903_v38 = vor.u32 %v1147_v36, %v902_v35  ;;  %v878_v41 = vld [vmem:[#allocation2] sm:$0xf]  ;;  %v907_v43 = vor.u32 %v1145_v39, %v904_v40  ;;  %v1142_v44 = vld [vmem:[#allocation2 + $0xc] sm:$0xf0]  ;;  %v1140_v45 = vld [vmem:[#allocation2 + $0x4] sm:$0xf] }
  0x20   :  { %326 = vmatpush.bf16.msra.mxu0 %v927_v6  ;;  %v880_v46 = vld [vmem:[#allocation2 + $0x10] sm:$0xf0]  ;;  %v879_v48 = vor.u32 %v1142_v44, %v878_v41  ;;  %v886_v50 = vld [vmem:[#allocation2 + $0x8] sm:$0xf]  ;;  %v1143_v51 = vld [vmem:[#allocation2 + $0x14] sm:$0xf0] }
  0x21   :  { %v883_v49 = vor.u32 %v1140_v45, %v880_v46  ;;  %v1141_v52 = vld [vmem:[#allocation2 + $0xc] sm:$0xf]  ;;  %v887_v53 = vor.u32 %v1143_v51, %v886_v50  ;;  %v888_v54 = vld [vmem:[#allocation2 + $0x18] sm:$0xf0]  ;;  %v1212_v18 = vld [vmem:[%s1585_s2] ss:$0 sm:$0xff] }
  0x22   :  { %v891_v56 = vor.u32 %v1141_v52, %v888_v54  ;;  %v1179_v23 = vld [vmem:[#allocation4 + $0x38] sm:$0xff]  ;;  %v1178_v28 = vld [vmem:[#allocation4 + $0x30] sm:$0xff]  ;;  %v1185_v39 = vld [vmem:[#allocation4 + $0x68] sm:$0xff] }
  0x23   :  { %v1195_v32 = vld [vmem:[#allocation4 + $0xb8] sm:$0xff]  ;;  %v1176_v50 = vld [vmem:[#allocation4 + $0x20] sm:$0xff] }
  0x24   :  { %327 = vmatpush.bf16.msra.mxu0 %v911_v21  ;;  %v1184_v51 = vld [vmem:[#allocation4 + $0x60] sm:$0xff] }
  0x28   :  { %328 = vmatpush.bf16.msra.mxu0 %v895_v33  ;;  %v1203_v33 = vld [vmem:[#allocation4 + $0xf8] sm:$0xff] }
  0x2c   :  { %329 = vmatpush.bf16.msra.mxu0 %v879_v48 }
  0x30   :  { %810 = vmatpush.bf16.msrb.mxu0 %v1179_v23 }
  0x34   :  { %811 = vmatpush.bf16.msrb.mxu0 %v1178_v28 }
  0x80   :  { %v63_v9 = vpop.xlane.xlu0 %62 }
  0x81   :  { %v73_v10 = vmul.f32 %v1369_v8, %v63_v9  ;;  %v934_v9 = vld [vmem:[#allocation2 + $0x68] sm:$0xf] }
  0x83   :  { %v1373_v11 = vsub.f32 %v1360_v0, %v73_v10  ;;  %v1155_v10 = vld [vmem:[#allocation2 + $0x74] sm:$0xf0] }
  0x85   :  { %v77_v12 = vmul.f32 %v1373_v11, %v1373_v11 }
  0x87   :  { %79 = vadd.xlane.f32.xlu1 %v77_v12  ;;  %v931_v12 = vor.u32 %v1152_v5, %v928_v7 }
  0x88   :  { %v65_v13 = vpop.xlane.xlu0 %64 }
  0x89   :  { %v74_v14 = vmul.f32 %v1369_v8, %v65_v13  ;;  %v935_v13 = vor.u32 %v1155_v10, %v934_v9  ;;  %340 = vmatpush.bf16.msra.mxu1 %v931_v12  ;;  %v1211_v12 = vld [vmem:[%s1584_s1] ss:$0 sm:$0xff] }
  0x8b   :  { %v1379_v15 = vsub.f32 %v1366_v1, %v74_v14  ;;  %v1153_v14 = vld [vmem:[#allocation2 + $0x6c] sm:$0xf]  ;;  %354 = vmatpush.bf16.msra.mxu2 %v935_v13 }
  0x8d   :  { %v78_v16 = vmul.f32 %v1379_v15, %v1379_v15  ;;  %341 = vmatpush.bf16.msra.mxu1 %v915_v25 }
  0x8f   :  { %81 = vadd.xlane.f32.xlu1 %v78_v16  ;;  %v936_v16 = vld [vmem:[#allocation2 + $0x78] sm:$0xf0]  ;;  %355 = vmatpush.bf16.msra.mxu2 %v919_v26 }
  0x90   :  { %v939_v17 = vor.u32 %v1153_v14, %v936_v16 }
  0x91   :  { %342 = vmatpush.bf16.msra.mxu1 %v899_v37 }
  0x92   :  { %368 = vmatpush.bf16.msra.mxu3 %v939_v17 }
  0x93   :  { %356 = vmatpush.bf16.msra.mxu2 %v903_v38  ;;  %v1177_v38 = vld [vmem:[#allocation4 + $0x28] sm:$0xff] }
  0x94   :  { %812 = vmatpush.bf16.msrb.mxu0 %v1177_v38  ;;  %v1180_v38 = vld [vmem:[#allocation4 + $0x40] sm:$0xff] }
  0x95   :  { %343 = vmatpush.bf16.msra.mxu1 %v883_v49 }
  0x96   :  { %369 = vmatpush.bf16.msra.mxu3 %v923_v29  ;;  %v1186_v29 = vld [vmem:[#allocation4 + $0x70] sm:$0xff] }
  0x97   :  { %357 = vmatpush.bf16.msra.mxu2 %v887_v53 }
  0x98   :  { %813 = vmatpush.bf16.msrb.mxu0 %v1176_v50 }
  0x9a   :  { %370 = vmatpush.bf16.msra.mxu3 %v907_v43  ;;  %v1202_v43 = vld [vmem:[#allocation4 + $0xf0] sm:$0xff] }
  0x9b   :  { %838 = vmatpush.bf16.msrb.mxu2 %v1195_v32 }
  0x9e   :  { %371 = vmatpush.bf16.msra.mxu3 %v891_v56  ;;  %v1193_v56 = vld [vmem:[#allocation4 + $0xa8] sm:$0xff] }
  0xa2   :  { %852 = vmatpush.bf16.msrb.mxu3 %v1203_v33 }
  0xa6   :  { %853 = vmatpush.bf16.msrb.mxu3 %v1202_v43  ;;  %v1197_v43 = vld [vmem:[#allocation4 + $0xc8] sm:$0xff] }
  0xfa   :  { %v80_v42 = vpop.xlane.xlu1 %79 }
  0xfb   :  { %v83_v47 = vmul.f32 %v80_v42, %v1369_v8  ;;  %v1194_v42 = vld [vmem:[#allocation4 + $0xb0] sm:$0xff] }
  0xfc   :  { %839 = vmatpush.bf16.msrb.mxu2 %v1194_v42  ;;  %v1189_v42 = vld [vmem:[#allocation4 + $0x88] sm:$0xff] }
  0xfd   :  { %v85_v55 = vadd.f32 1e-05, %v83_v47 }
  0xff   :  { %1216 = vrsqrt.f32 %v85_v55  ;;  %vm93_vm2 = vweird.f32 %v85_v55 }
 0x100   :  { %840 = vmatpush.bf16.msrb.mxu2 %v1193_v56 }
 0x102   :  { %v82_v57 = vpop.xlane.xlu1 %81 }
 0x103   :  { %v84_v58 = vmul.f32 %v82_v57, %v1369_v8  ;;  %v1201_v57 = vld [vmem:[#allocation4 + $0xe8] sm:$0xff] }
 0x104   :  { %854 = vmatpush.bf16.msrb.mxu3 %v1201_v57 }
 0x105   :  { %v1217_v59 = vpop.eup %1216  ;;  %v86_v60 = vadd.f32 1e-05, %v84_v58 }
 0x106   :  { %v88_v61 = vmul.f32 %v1217_v59, %v85_v55  ;;  %vm94_vm1 = vweird.f32 %v1217_v59 }
 0x107   :  { %1218 = vrsqrt.f32 %v86_v60  ;;  %vm95_vm3 = vmor %vm93_vm2, %vm94_vm1  ;;  %vm103_vm5 = vweird.f32 %v86_v60 }
 0x108   :  { %v89_v62 = vmul.f32 %v1217_v59, %v88_v61 }
 0x10a   :  { %v90_v63 = vmul.f32 0.5, %v89_v62  ;;  %v1175_v62 = vld [vmem:[#allocation4 + $0x18] sm:$0xff] }
 0x10b   :  { %814 = vmatpush.bf16.msrb.mxu0 %v1175_v62 }
 0x10c   :  { %v91_v2 = vsub.f32 1.5, %v90_v63  ;;  %v1183_v63 = vld [vmem:[#allocation4 + $0x58] sm:$0xff] }
 0x10d   :  { %v1219_v3 = vpop.eup %1218 }
 0x10e   :  { %v92_v4 = vmul.f32 %v1217_v59, %v91_v2  ;;  %v98_v5 = vmul.f32 %v1219_v3, %v86_v60  ;;  %vm104_vm4 = vweird.f32 %v1219_v3 }
 0x10f   :  { %vm105_vm6 = vmor %vm103_vm5, %vm104_vm4 }
 0x110   :  { %v99_v6 = vmul.f32 %v1219_v3, %v98_v5  ;;  %v96_v7 = vsel %vm95_vm3, %v1217_v59, %v92_v4 }
 0x111   :  { %v107_v8 = vmul.f32 %v96_v7, %v1373_v11  ;;  %v1396_v11 = vld [vmem:[%s1587_s4] sm:$0xf] }
 0x112   :  { %v100_v9 = vmul.f32 0.5, %v99_v6  ;;  %v154_v24 = vperm.slane %v1396_v11, 0  ;;  %v155_v25 = vperm.slane %v1396_v11, 1  ;;  %v156_v36 = vperm.slane %v1396_v11, 2  ;;  %v1192_v6 = vld [vmem:[#allocation4 + $0xa0] sm:$0xff] }
 0x113   :  { %v112_v17 = vmul.f32 %v1211_v12, %v107_v8  ;;  %v157_v37 = vperm.slane %v1396_v11, 3  ;;  %v1200_v7 = vld [vmem:[#allocation4 + $0xe0] sm:$0xff]  ;;  %841 = vmatpush.bf16.msrb.mxu2 %v1192_v6 }
 0x114   :  { %v101_v10 = vsub.f32 1.5, %v100_v9  ;;  %855 = vmatpush.bf16.msrb.mxu3 %v1200_v7 }
 0x115   :  { %v117_v20 = vadd.f32 %v1212_v18, %v112_v17  ;;  %v1199_v17 = vld [vmem:[#allocation4 + $0xd8] sm:$0xff] }
 0x116   :  { %v102_v13 = vmul.f32 %v1219_v3, %v101_v10 }
 0x118   :  { %v106_v14 = vsel %vm105_vm6, %v1219_v3, %v102_v13  ;;  %v1182_v13 = vld [vmem:[#allocation4 + $0x50] sm:$0xff]  ;;  %856 = vmatpush.bf16.msrb.mxu3 %v1199_v17 }
 0x119   :  { %v108_v16 = vmul.f32 %v106_v14, %v1379_v15  ;;  %v1187_v15 = vld [vmem:[#allocation4 + $0x78] sm:$0xff] }
 0x11a   :  { %824 = vmatpush.bf16.msrb.mxu1 %v1187_v15 }
 0x11b   :  { %v113_v19 = vmul.f32 %v1211_v12, %v108_v16  ;;  %v1174_v12 = vld [vmem:[#allocation4 + $0x10] sm:$0xff]  ;;  %v1191_v16 = vld [vmem:[#allocation4 + $0x98] sm:$0xff] }
 0x11c   :  { %815 = vmatpush.bf16.msrb.mxu0 %v1174_v12  ;;  %842 = vmatpush.bf16.msrb.mxu2 %v1191_v16 }
 0x11d   :  { %v118_v21 = vadd.f32 %v1212_v18, %v113_v19 }
 0x11e   :  { %825 = vmatpush.bf16.msrb.mxu1 %v1186_v29 }
 0x11f   :  { %v119_v22 = vpack.c.bf16 %v118_v21, %v117_v20  ;;  %v1173_v21 = vld [vmem:[#allocation4 + $0x8] sm:$0xff] }
 0x120   :  { %816 = vmatpush.bf16.msrb.mxu0 %v1173_v21 }
 0x121   :  { %330 = vmatmul.bf16.vlgmr.msra.gmra.mxu0 %v119_v22  ;;  %344 = vmatmul.bf16.vlgmr.msra.gmra.mxu1 %v119_v22 }
 0x122   :  { %358 = vmatmul.bf16.vlgmr.msra.gmra.mxu2 %v119_v22  ;;  %372 = vmatmul.bf16.vlgmr.msra.gmra.mxu3 %v119_v22  ;;  %v1181_v22 = vld [vmem:[#allocation4 + $0x48] sm:$0xff] }
 0x123   :  { %826 = vmatpush.bf16.msrb.mxu1 %v1185_v39 }
 0x127   :  { %827 = vmatpush.bf16.msrb.mxu1 %v1184_v51 }
 0x12b   :  { %828 = vmatpush.bf16.msrb.mxu1 %v1183_v63 }
 0x12f   :  { %829 = vmatpush.bf16.msrb.mxu1 %v1182_v13 }
 0x133   :  { %830 = vmatpush.bf16.msrb.mxu1 %v1181_v22 }
 0x137   :  { %831 = vmatpush.bf16.msrb.mxu1 %v1180_v38 }
 0x19e   :  { %v331_v26 = vpop.f32.mrf.mxu0  ;;  %v345_v27 = vpop.f32.mrf.mxu1 }
 0x19f   :  { %v1400_v30 = vadd.f32 %v331_v26, %v154_v24  ;;  %v1402_v31 = vadd.f32 %v345_v27, %v155_v25  ;;  %v1198_v26 = vld [vmem:[#allocation4 + $0xd0] sm:$0xff] }
 0x1a0   :  { %857 = vmatpush.bf16.msrb.mxu3 %v1198_v26 }
 0x1a1   :  { %v1004_v34 = vmul.f32 -1.702, %v1400_v30  ;;  %v1005_v35 = vmul.f32 -1.702, %v1402_v31 }
 0x1a3   :  { %v394_v40 = vmul.f32 1.442695, %v1004_v34  ;;  %v396_v41 = vmul.f32 1.442695, %v1005_v35 }
 0x1a4   :  { %858 = vmatpush.bf16.msrb.mxu3 %v1197_v43 }
 0x1a5   :  { %1220 = vpow2.f32 %v394_v40  ;;  %v359_v44 = vpop.f32.mrf.mxu2  ;;  %v373_v45 = vpop.f32.mrf.mxu3 }
 0x1a6   :  { %1222 = vpow2.f32 %v396_v41  ;;  %v1408_v46 = vadd.f32 %v359_v44, %v156_v36  ;;  %v1412_v47 = vadd.f32 %v373_v45, %v157_v37  ;;  %v333_v48 = vpop.f32.mrf.mxu0  ;;  %v347_v49 = vpop.f32.mrf.mxu1 }
 0x1a7   :  { %v1414_v52 = vadd.f32 %v333_v48, %v154_v24  ;;  %v1416_v53 = vadd.f32 %v347_v49, %v155_v25  ;;  %v1190_v25 = vld [vmem:[#allocation4 + $0x90] sm:$0xff] }
 0x1a8   :  { %v1006_v54 = vmul.f32 -1.702, %v1408_v46  ;;  %v1007_v55 = vmul.f32 -1.702, %v1412_v47  ;;  %843 = vmatpush.bf16.msrb.mxu2 %v1190_v25 }
 0x1a9   :  { %v1008_v58 = vmul.f32 -1.702, %v1414_v52  ;;  %v1009_v59 = vmul.f32 -1.702, %v1416_v53 }
 0x1aa   :  { %v398_v60 = vmul.f32 1.442695, %v1006_v54  ;;  %v400_v61 = vmul.f32 1.442695, %v1007_v55  ;;  %v1188_v54 = vld [vmem:[#allocation4 + $0x80] sm:$0xff] }
 0x1ab   :  { %v1221_v2 = vpop.eup %1220  ;;  %v402_v5 = vmul.f32 1.442695, %v1008_v58  ;;  %v404_v10 = vmul.f32 1.442695, %v1009_v59  ;;  %v1196_v55 = vld [vmem:[#allocation4 + $0xc0] sm:$0xff] }
 0x1ac   :  { %v1223_v3 = vpop.eup %1222  ;;  %v1422_v4 = vadd.f32 1.0, %v1221_v2  ;;  %1224 = vpow2.f32 %v398_v60  ;;  %844 = vmatpush.bf16.msrb.mxu2 %v1189_v42  ;;  %859 = vmatpush.bf16.msrb.mxu3 %v1196_v55 }
 0x1ad   :  { %v1424_v9 = vadd.f32 1.0, %v1223_v3  ;;  %1226 = vpow2.f32 %v400_v61  ;;  %v361_v8 = vpop.f32.mrf.mxu2  ;;  %v375_v20 = vpop.f32.mrf.mxu3 }
 0x1ae   :  { %1228 = vrcp.f32 %v1422_v4  ;;  %v1428_v14 = vadd.f32 %v361_v8, %v156_v36  ;;  %v1444_v32 = vadd.f32 %v375_v20, %v157_v37  ;;  %v1172_v36 = vld [vmem:[#allocation4] sm:$0xff]  ;;  %v427_v49 = vand.u32 2147483647, %v1422_v4 }
 0x1af   :  { %1230 = vrcp.f32 %v1424_v9  ;;  %817 = vmatpush.bf16.msrb.mxu0 %v1172_v36  ;;  %v429_v50 = vand.u32 2147483648, %v1422_v4  ;;  %v442_v58 = vand.u32 2147483647, %v1424_v9  ;;  %v444_v59 = vand.u32 2147483648, %v1424_v9 }
 0x1b0   :  { %1232 = vpow2.f32 %v402_v5  ;;  %v1010_v19 = vmul.f32 -1.702, %v1428_v14  ;;  %v1011_v44 = vmul.f32 -1.702, %v1444_v32  ;;  %845 = vmatpush.bf16.msrb.mxu2 %v1188_v54  ;;  %vm423_vm7 = vweird.f32 %v1422_v4 }
 0x1b1   :  { %1234 = vpow2.f32 %v404_v10  ;;  %vm438_vm9 = vweird.f32 %v1424_v9  ;;  %vm1472_vm10 = vcmp.eq.f32.partialorder %v427_v49, 8.507059e+37  ;;  %v430_v2 = vor.u32 1.1754944e-38, %v429_v50 }
 0x1b2   :  { %v1225_v18 = vpop.eup %1224  ;;  %v406_v35 = vmul.f32 1.442695, %v1010_v19  ;;  %v408_v57 = vmul.f32 1.442695, %v1011_v44  ;;  %vm1485_vm13 = vcmp.eq.f32.partialorder %v442_v58, 8.507059e+37  ;;  %v445_v12 = vor.u32 1.1754944e-38, %v444_v59 }
 0x1b3   :  { %v1227_v23 = vpop.eup %1226  ;;  %v1431_v15 = vadd.f32 1.0, %v1225_v18 }
 0x1b4   :  { %v1433_v24 = vpop.eup %1228  ;;  %v1440_v29 = vadd.f32 1.0, %v1227_v23 }
 0x1b5   :  { %v1435_v27 = vpop.eup %1230  ;;  %v419_v28 = vmul.f32 %v1433_v24, %v1422_v4  ;;  %1236 = vrcp.f32 %v1431_v15  ;;  %vm424_vm8 = vweird.f32 %v1433_v24  ;;  %v457_v13 = vand.u32 2147483647, %v1431_v15 }
 0x1b6   :  { %v1233_v33 = vpop.eup %1232  ;;  %v434_v34 = vmul.f32 %v1435_v27, %v1424_v9  ;;  %1238 = vrcp.f32 %v1440_v29  ;;  %vm439_vm11 = vweird.f32 %v1435_v27  ;;  %vm1481_vm12 = vmor %vm423_vm7, %vm424_vm8  ;;  %vm453_vm15 = vweird.f32 %v1431_v15 }
 0x1b7   :  { %v1235_v39 = vpop.eup %1234  ;;  %v420_v40 = vsub.f32 1.0, %v419_v28  ;;  %v1449_v11 = vadd.f32 1.0, %v1233_v33  ;;  %1240 = vpow2.f32 %v406_v35  ;;  %vm1496_vm14 = vmor %vm438_vm9, %vm439_vm11  ;;  %v459_v20 = vand.u32 2147483648, %v1431_v15 }
 0x1b8   :  { %v435_v41 = vsub.f32 1.0, %v434_v34  ;;  %v1451_v37 = vadd.f32 1.0, %v1235_v39  ;;  %vm458_vm11 = vcmp.eq.f32.partialorder %v457_v13, 8.507059e+37  ;;  %v474_v13 = vand.u32 2147483648, %v1440_v29 }
 0x1b9   :  { %v421_v48 = vmul.f32 %v1433_v24, %v420_v40  ;;  %1242 = vrcp.f32 %v1449_v11  ;;  %v487_v7 = vand.u32 2147483647, %v1449_v11  ;;  %vm483_vm0 = vweird.f32 %v1449_v11 }
 0x1ba   :  { %v436_v51 = vmul.f32 %v1435_v27, %v435_v41  ;;  %1244 = vrcp.f32 %v1451_v37  ;;  %v489_v26 = vand.u32 2147483648, %v1449_v11  ;;  %v502_v38 = vand.u32 2147483647, %v1451_v37 }
 0x1bb   :  { %v1454_v45 = vpop.eup %1236  ;;  %v422_v61 = vadd.f32 %v1433_v24, %v421_v48  ;;  %1246 = vpow2.f32 %v408_v57  ;;  %vm1512_vm2 = vcmp.eq.f32.partialorder %v487_v7, 8.507059e+37  ;;  %v504_v39 = vand.u32 2147483648, %v1451_v37 }
 0x1bc   :  { %v449_v56 = vmul.f32 %v1454_v45, %v1431_v15  ;;  %v1466_v60 = vpop.eup %1238  ;;  %v437_v3 = vadd.f32 %v1435_v27, %v436_v51  ;;  %vm454_vm1 = vweird.f32 %v1454_v45  ;;  %v490_v49 = vor.u32 1.1754944e-38, %v489_v26 }
 0x1bd   :  { %v1241_v62 = vpop.eup %1240  ;;  %v426_v18 = vsel %vm1481_vm12, %v1433_v24, %v422_v61  ;;  %v464_v21 = vmul.f32 %v1466_v60, %v1440_v29  ;;  %vm498_vm6 = vweird.f32 %v1451_v37  ;;  %vm1540_vm8 = vmor %vm453_vm15, %vm454_vm1  ;;  %vm503_vm9 = vcmp.eq.f32.partialorder %v502_v38, 8.507059e+37 }
 0x1be   :  { %v450_v6 = vsub.f32 1.0, %v449_v56  ;;  %v1479_v10 = vadd.f32 1.0, %v1241_v62  ;;  %v441_v22 = vsel %vm1496_vm14, %v1435_v27, %v437_v3  ;;  %v431_v28 = vsel %vm1472_vm10, %v430_v2, %v426_v18 }
 0x1bf   :  { %v1243_v5 = vpop.eup %1242  ;;  %v446_v35 = vsel %vm1485_vm13, %v445_v12, %v441_v22  ;;  %v465_v36 = vsub.f32 1.0, %v464_v21  ;;  %v538_v44 = vmul.f32 %v431_v28, %v1400_v30  ;;  %v505_v30 = vor.u32 1.1754944e-38, %v504_v39 }
 0x1c0   :  { %v479_v16 = vmul.f32 %v1243_v5, %v1449_v11  ;;  %v1245_v17 = vpop.eup %1244  ;;  %1248 = vrcp.f32 %v1479_v10  ;;  %v451_v24 = vmul.f32 %v1454_v45, %v450_v6  ;;  %vm484_vm3 = vweird.f32 %v1243_v5 }
 0x1c1   :  { %v494_v9 = vmul.f32 %v1245_v17, %v1451_v37  ;;  %v1247_v34 = vpop.eup %1246  ;;  %vm499_vm4 = vweird.f32 %v1245_v17  ;;  %vm485_vm5 = vmor %vm483_vm0, %vm484_vm3  ;;  %v539_v50 = vmul.f32 %v446_v35, %v1402_v31  ;;  %v466_v56 = vmul.f32 %v1466_v60, %v465_v36  ;;  %v1213_v35 = vld [vmem:[%s1589_s6] ss:$0 sm:$0xff] }
 0x1c2   :  { %v480_v23 = vsub.f32 1.0, %v479_v16  ;;  %v1523_v42 = vadd.f32 1.0, %v1247_v34  ;;  %v452_v48 = vadd.f32 %v1454_v45, %v451_v24  ;;  %vm500_vm7 = vmor %vm498_vm6, %vm499_vm4  ;;  %v517_v62 = vand.u32 2147483647, %v1479_v10 }
 0x1c3   :  { %v495_v27 = vsub.f32 1.0, %v494_v9  ;;  %v519_v63 = vand.u32 2147483648, %v1479_v10  ;;  %vm513_vm12 = vweird.f32 %v1479_v10  ;;  %vm469_vm13 = vweird.f32 %v1466_v60 }
 0x1c4   :  { %v481_v33 = vmul.f32 %v1243_v5, %v480_v23  ;;  %1250 = vrcp.f32 %v1523_v42  ;;  %v456_v59 = vsel %vm1540_vm8, %v1454_v45, %v452_v48  ;;  %v467_v45 = vadd.f32 %v1466_v60, %v466_v56 }
 0x1c5   :  { %v496_v41 = vmul.f32 %v1245_v17, %v495_v27  ;;  %v520_v8 = vor.u32 1.1754944e-38, %v519_v63  ;;  %vm518_vm15 = vcmp.eq.f32.partialorder %v517_v62, 8.507059e+37  ;;  %vm468_vm0 = vweird.f32 %v1440_v29 }
 0x1c6   :  { %v482_v40 = vadd.f32 %v1243_v5, %v481_v33  ;;  %v1249_v43 = vpop.eup %1248  ;;  %vm1558_vm1 = vmor %vm468_vm0, %vm469_vm13  ;;  %v472_v18 = vand.u32 2147483647, %v1440_v29  ;;  %v534_v22 = vand.u32 2147483648, %v1523_v42  ;;  %v532_v9 = vand.u32 2147483647, %v1523_v42 }
 0x1c7   :  { %v497_v54 = vadd.f32 %v1245_v17, %v496_v41  ;;  %v509_v55 = vmul.f32 %v1249_v43, %v1479_v10  ;;  %vm514_vm10 = vweird.f32 %v1249_v43  ;;  %v471_v21 = vsel %vm1558_vm1, %v1466_v60, %v467_v45 }
 0x1c8   :  { %v486_v51 = vsel %vm485_vm5, %v1243_v5, %v482_v40  ;;  %v460_v5 = vor.u32 1.1754944e-38, %v459_v20  ;;  %vm515_vm14 = vmor %vm513_vm12, %vm514_vm10  ;;  %v475_v24 = vor.u32 1.1754944e-38, %v474_v13  ;;  %vm473_vm3 = vcmp.eq.f32.partialorder %v472_v18, 8.507059e+37 }
 0x1c9   :  { %v491_v57 = vsel %vm1512_vm2, %v490_v49, %v486_v51  ;;  %v501_v37 = vsel %vm500_vm7, %v1245_v17, %v497_v54  ;;  %v510_v58 = vsub.f32 1.0, %v509_v55  ;;  %vm528_vm4 = vweird.f32 %v1523_v42 }
 0x1ca   :  { %v542_v31 = vmul.f32 %v491_v57, %v1414_v52  ;;  %v506_v61 = vsel %vm503_vm9, %v505_v30, %v501_v37  ;;  %v1251_v7 = vpop.eup %1250  ;;  %v461_v4 = vsel %vm458_vm11, %v460_v5, %v456_v59  ;;  %v476_v29 = vsel %vm473_vm3, %v475_v24, %v471_v21 }
 0x1cb   :  { %v543_v15 = vmul.f32 %v506_v61, %v1416_v53  ;;  %v511_v2 = vmul.f32 %v1249_v43, %v510_v58  ;;  %v524_v53 = vmul.f32 %v1251_v7, %v1523_v42  ;;  %v540_v16 = vmul.f32 %v461_v4, %v1408_v46 }
 0x1cc   :  { %v546_v3 = vpack.c.bf16 %v542_v31, %v538_v44  ;;  %vm529_vm2 = vweird.f32 %v1251_v7  ;;  %vm533_vm6 = vcmp.eq.f32.partialorder %v532_v9, 8.507059e+37  ;;  %v541_v60 = vmul.f32 %v476_v29, %v1412_v47 }
 0x1cd   :  { %v512_v52 = vadd.f32 %v1249_v43, %v511_v2  ;;  %v547_v6 = vpack.c.bf16 %v543_v15, %v539_v50  ;;  %v525_v20 = vsub.f32 1.0, %v524_v53  ;;  %vm530_vm5 = vmor %vm528_vm4, %vm529_vm2 }
 0x1ce   :  { %818 = vmatmul.bf16.vlgmr.msrb.gmra.mxu0 %v546_v3 }
 0x1cf   :  { %v516_v12 = vsel %vm515_vm14, %v1249_v43, %v512_v52  ;;  %832 = vmatmul.bf16.vlgmr.msrb.gmra.mxu1 %v547_v6  ;;  %v526_v23 = vmul.f32 %v1251_v7, %v525_v20 }
 0x1d0   :  { %v521_v10 = vsel %vm518_vm15, %v520_v8, %v516_v12 }
 0x1d1   :  { %v544_v19 = vmul.f32 %v521_v10, %v1428_v14  ;;  %v527_v25 = vadd.f32 %v1251_v7, %v526_v23  ;;  %v535_v14 = vor.u32 1.1754944e-38, %v534_v22 }
 0x1d3   :  { %v548_v46 = vpack.c.bf16 %v544_v19, %v540_v16  ;;  %v531_v26 = vsel %vm530_vm5, %v1251_v7, %v527_v25 }
 0x1d4   :  { %v536_v28 = vsel %vm533_vm6, %v535_v14, %v531_v26 }
 0x1d5   :  { %846 = vmatmul.bf16.vlgmr.msrb.gmra.mxu2 %v548_v46  ;;  %v545_v33 = vmul.f32 %v536_v28, %v1444_v32 }
 0x1d7   :  { %v549_v27 = vpack.c.bf16 %v545_v33, %v541_v60 }
 0x1d9   :  { %860 = vmatmul.bf16.vlgmr.msrb.gmra.mxu3 %v549_v27 }
 0x24b   :  { %v819_v34 = vpop.f32.mrf.mxu0 }
 0x24c   :  { %v820_v36 = vadd.f32 %v1213_v35, %v819_v34  ;;  %v833_v38 = vpop.f32.mrf.mxu1 }
 0x24e   :  { %v834_v40 = vadd.f32 %v833_v38, %v820_v36 }
 0x253   :  { %v821_v41 = vpop.f32.mrf.mxu0 }
 0x254   :  { %v822_v43 = vadd.f32 %v1213_v35, %v821_v41  ;;  %v835_v49 = vpop.f32.mrf.mxu1 }
 0x256   :  { %v836_v50 = vadd.f32 %v835_v49, %v822_v43 }
 0x258   :  { %v847_v39 = vpop.f32.mrf.mxu2 }
 0x259   :  { %v848_v42 = vadd.f32 %v847_v39, %v834_v40 }
 0x25c   :  { %v861_v44 = vpop.f32.mrf.mxu3 }
 0x25d   :  { %v862_v48 = vadd.f32 %v861_v44, %v848_v42 }
 0x25f   :  { %v866_v32 = vadd.f32 %v862_v48, %v1360_v0 }
 0x260   :  { %v849_v47 = vpop.f32.mrf.mxu2 }
 0x261   :  { %868 = vst [vmem:[%s1590_s7] sm:$0xff] %v866_v32  ;;  %v850_v51 = vadd.f32 %v849_v47, %v836_v50 }
 0x264   :  { %v863_v54 = vpop.f32.mrf.mxu3 }
 0x265   :  { %v864_v55 = vadd.f32 %v863_v54, %v850_v51 }
 0x267   :  { %v867_v56 = vadd.f32 %v864_v55, %v1366_v1 }
 0x269   :  { %869 = vst [vmem:[%s1590_s7 + $0x8] sm:$0xff] %v867_v56 }
 0x26a   :  { %874 = vsyncpa [#allocation3], 1 }
 0x26b   :  { %875 = vsyncpa [#allocation5], 1 }

// kernel: text_encoder_forward.9
= control target key start
LH: loop header
LB: loop body
LE: loop exit
PB: predicated region body
PF: predicated region fallthrough
CT: control target
= control target key end

     0   :  { %10 = vsyncpa [#allocation3], 0  ;;  %s337_s0 = inlined_call_operand.vmem [shape: f32[2,128], index: 0, kind: input, shape index: {}]   ;;  %s338_s1 = inlined_call_operand.vmem [shape: f32[1,128], index: 1, kind: input, shape index: {}]   ;;  %s339_s2 = inlined_call_operand.vmem [shape: f32[1,128], index: 2, kind: input, shape index: {}]   ;;  %s340_s3 = inlined_call_operand.hbm [shape: bf16[128,128], index: 3, kind: input, shape index: {}]   ;;  %s341_s4 = inlined_call_operand.vmem [shape: f32[1,128], index: 4, kind: input, shape index: {}]   ;;  %s342_s5 = inlined_call_operand.hbm [shape: f32[2,128], index: 5, kind: output, shape index: {}]  }
   0x1   :  { %11 = vsyncpa [#allocation4], 0  ;;  %s22_s20 = sshll.u32 %s340_s3, 4  ;;  %s282_s21 = smov [#allocation2]   ;;  %s23_s20 = int_to_ptr.hbm [resolvable:$true] %s22_s20 }
   0x2   :  { %s24_s22 = sshll.u32 %s282_s21, 4  ;;  %s283_s23 = smov 64   ;;  %s25_s22 = int_to_ptr.vmem [resolvable:$true] %s24_s22 }
   0x3   :  { %s284_s24 = smov 4  }
   0x4   :  { %30 = dma.hbm_to_vmem [thread:$0]  %s23_s20, 1024, %s25_s22, [#allocation3], %s283_s23, %s283_s23, %s284_s24  }
   0x5   :  { %278 = dma.done.wait [#allocation3], 1024  }
   0x6   :  { %279 = vsyncadd [#allocation3], 4294966272  ;;  %vm40_vm0 = vcmask 1041408   ;;  %v37_v0 = vld [vmem:[%s337_s0] sm:$0x3]  ;;  %v285_v2 = vmov 128.0  }
   0x7   :  { %v41_v1 = vsel %vm40_vm0, %v37_v0, 0.0  ;;  %226 = vrcp.f32 %v285_v2  ;;  %v217_v3 = vld [vmem:[#allocation2 + $0x38] sm:$0xff]  ;;  %v216_v15 = vld [vmem:[#allocation2 + $0x30] sm:$0xff]  ;;  %v215_v16 = vld [vmem:[#allocation2 + $0x28] sm:$0xff]  ;;  %s286_s6 = smov [#allocation5]  }
   0x8   :  { %42 = vadd.xlane.f32.xlu0 %v41_v1  ;;  %147 = vmatpush.bf16.msra.mxu0 %v217_v3  ;;  %v214_v17 = vld [vmem:[#allocation2 + $0x20] sm:$0xff]  ;;  %v213_v18 = vld [vmem:[#allocation2 + $0x18] sm:$0xff]  ;;  %v212_v19 = vld [vmem:[#allocation2 + $0x10] sm:$0xff]  ;;  %s166_s7 = sshll.u32 %s286_s6, 4  ;;  %s167_s7 = int_to_ptr.vmem [resolvable:$true] %s166_s7 }
   0x9   :  { %v211_v20 = vld [vmem:[#allocation2 + $0x8] sm:$0xff]  ;;  %v210_v21 = vld [vmem:[#allocation2] sm:$0xff] }
   0xa   :  { %v223_v31 = vld [vmem:[%s338_s1] ss:$0 sm:$0xff]  ;;  %s168_s1 = sshll.u32 %s342_s5, 4  ;;  %s169_s1 = int_to_ptr.hbm [resolvable:$true] %s168_s1 }
   0xb   :  { %v224_v34 = vld [vmem:[%s339_s2] ss:$0 sm:$0xff] }
   0xc   :  { %148 = vmatpush.bf16.msra.mxu0 %v216_v15  ;;  %v225_v38 = vld [vmem:[%s341_s4] ss:$0 sm:$0xff] }
   0xd   :  { %v227_v4 = vpop.eup %226 }
   0xe   :  { %v45_v5 = vmul.f32 128.0, %v227_v4  ;;  %vm49_vm1 = vweird.f32 %v227_v4 }
  0x10   :  { %v46_v6 = vsub.f32 1.0, %v45_v5  ;;  %149 = vmatpush.bf16.msra.mxu0 %v215_v16 }
  0x12   :  { %v47_v7 = vmul.f32 %v227_v4, %v46_v6 }
  0x14   :  { %v48_v8 = vadd.f32 %v227_v4, %v47_v7  ;;  %150 = vmatpush.bf16.msra.mxu0 %v214_v17 }
  0x16   :  { %v50_v9 = vsel %vm49_vm1, %v227_v4, %v48_v8 }
  0x18   :  { %151 = vmatpush.bf16.msra.mxu0 %v213_v18 }
  0x1c   :  { %152 = vmatpush.bf16.msra.mxu0 %v212_v19 }
  0x20   :  { %153 = vmatpush.bf16.msra.mxu0 %v211_v20 }
  0x24   :  { %154 = vmatpush.bf16.msra.mxu0 %v210_v21 }
  0x7b   :  { %v43_v10 = vpop.xlane.xlu0 %42 }
  0x7c   :  { %v51_v11 = vmul.f32 %v50_v9, %v43_v10 }
  0x7e   :  { %v52_v12 = vsub.f32 %v37_v0, %v51_v11 }
  0x80   :  { %v53_v13 = vmul.f32 %v52_v12, %v52_v12 }
  0x82   :  { %v54_v14 = vsel %vm40_vm0, %v53_v13, 0.0 }
  0x83   :  { %55 = vadd.xlane.f32.xlu0 %v54_v14 }
  0xf6   :  { %v56_v22 = vpop.xlane.xlu0 %55 }
  0xf7   :  { %v57_v23 = vmul.f32 %v56_v22, %v50_v9 }
  0xf9   :  { %v58_v24 = vadd.f32 1e-05, %v57_v23 }
  0xfb   :  { %228 = vrsqrt.f32 %v58_v24  ;;  %vm65_vm3 = vweird.f32 %v58_v24 }
 0x101   :  { %v229_v25 = vpop.eup %228 }
 0x102   :  { %v60_v26 = vmul.f32 %v229_v25, %v58_v24  ;;  %vm66_vm2 = vweird.f32 %v229_v25 }
 0x103   :  { %vm67_vm4 = vmor %vm65_vm3, %vm66_vm2 }
 0x104   :  { %v61_v27 = vmul.f32 %v229_v25, %v60_v26 }
 0x106   :  { %v62_v28 = vmul.f32 0.5, %v61_v27 }
 0x108   :  { %v63_v29 = vsub.f32 1.5, %v62_v28 }
 0x10a   :  { %v64_v30 = vmul.f32 %v229_v25, %v63_v29 }
 0x10c   :  { %v68_v32 = vsel %vm67_vm4, %v229_v25, %v64_v30 }
 0x10d   :  { %v69_v33 = vmul.f32 %v68_v32, %v52_v12 }
 0x10f   :  { %v73_v35 = vmul.f32 %v223_v31, %v69_v33 }
 0x111   :  { %v77_v36 = vadd.f32 %v224_v34, %v73_v35 }
 0x113   :  { %v78_v37 = vpack.c.bf16 %v77_v36, %v77_v36 }
 0x115   :  { %155 = vmatmul.bf16.vlgmr.msra.gmra.mxu0 %v78_v37 }
 0x192   :  { %v156_v39 = vpop.f32.mrf.mxu0 }
 0x193   :  { %v157_v40 = vadd.f32 %v225_v38, %v156_v39 }
 0x195   :  { %160 = vst [vmem:[#allocation5] sm:$0x3] %v157_v40 }
 0x196   :  { %171 = dma.vmem_to_hbm [thread:$0]  %s167_s7, 32, %s169_s1, [#allocation4]  }
 0x19a   :  { %v158_v41 = vpop.f32.mrf.mxu0 }
 0x19b   :  { %280 = dma.done.wait [#allocation4], 32  }
 0x19c   :  { %281 = vsyncadd [#allocation4], 4294967264 }
 0x19d   :  { %176 = vsyncpa [#allocation3], 1 }
 0x19e   :  { %177 = vsyncpa [#allocation4], 1 }

</bundles_post_ra>
